<compile_context>
chip_gen: v7x
topology: tpu7x:2x2x1
jax: 0.10.0
libtpu: 0.0.40
codegen_flags: <defaults>
</compile_context>

<pallas_src>
import functools
import math

import numpy as np

import jax
import jax.numpy as jnp
from jax import lax
from jax.experimental import pallas as pl
from jax.experimental.pallas import tpu as pltpu

SILU_NORM = 1.6789717          # e3nn normalize2mom constant for SiLU
INV_SQRT3 = 1.0 / math.sqrt(3.0)
INV_SQRT2 = 1.0 / math.sqrt(2.0)
ELEM_PAD = 8                   # chemical-element axis padded to 8
MLP_HIDDEN_PAD = 128           # radial-MLP hidden padded 64 -> 128 (lane dense)

SYMCON_NODE_TILE = 128         # symcon tile (VMEM-bound, keep <= 128 for v7x)
SCATTER_NODE_TILE = 512        # scatter_sum+linear node tile (cuts m_all re-streaming)
EDGE_TILE_TARGET = 512         # edge-kernel / scatter K-axis tile (multiple of 128)


def _round_up(x, m):
    return ((x + m - 1) // m) * m


def _node_tiles(n):
    """(symcon_tile, scatter_tile, n_pad); scatter_tile is a multiple of symcon_tile."""
    n8 = _round_up(n, 8)
    # prefer >= 2 tiles so a "parallel" grid axis can shard across v7x's 2 TCs
    tile_small = min(SYMCON_NODE_TILE, max(8, _round_up(max(n8 // 2, 1), 8)))
    blocks = -(-n8 // tile_small)
    mult = max(1, min(SCATTER_NODE_TILE // tile_small, blocks))
    tile_big = tile_small * mult
    n_pad = _round_up(n8, tile_big)
    return tile_small, tile_big, n_pad


def _edge_tiles(e):
    """Edge tile is either the full (x8-padded) edge count or 512 (multiple of 128)."""
    e8 = _round_up(e, 8)
    tile_e = e8 if e8 <= EDGE_TILE_TARGET else EDGE_TILE_TARGET
    e_pad = _round_up(e8, tile_e)
    return tile_e, e_pad
    # TODO(synk): for small graphs on v7x, split edges into >=2 tiles (needs a
    # 128-aligned tile or a transposed jedges layout to stay layout-legal).


_P1 = pltpu.CompilerParams(dimension_semantics=("parallel",))


# ---------------------------------------------------------------------------
# 1) Row-tiled matmul: linear_up as a single (N,4C)x(4C,4C) block-diag matmul.
# ---------------------------------------------------------------------------
def _rowmm_kernel(x_ref, w_ref, o_ref):
    o_ref[...] = jnp.dot(x_ref[...], w_ref[...], preferred_element_type=jnp.float32)


def row_matmul(x, w, tile_rows):
    m, k = x.shape
    n = w.shape[1]
    return pl.pallas_call(
        _rowmm_kernel,
        out_shape=jax.ShapeDtypeStruct((m, n), jnp.float32),
        grid=(m // tile_rows,),
        in_specs=[
            pl.BlockSpec((tile_rows, k), lambda i: (i, 0)),
            pl.BlockSpec((k, n), lambda i: (0, 0)),
        ],
        out_specs=pl.BlockSpec((tile_rows, n), lambda i: (i, 0)),
        compiler_params=_P1,
    )(x, w)


# ---------------------------------------------------------------------------
# 2) Fused edge kernel: radial FullyConnectedNet (scales folded, hidden padded
#    to 128) + weighted 'uvu' tensor product -> slot-major flat messages (E, 11C).
#    message layout: [p0(C) | p1(C) | p2 m-major(3C) | p3 m-major(3C) | p4 m-major(3C)]
# ---------------------------------------------------------------------------
def _edge_kernel(c, rfeat_ref, attr_ref, hsend_ref,
                 mw1_ref, mw2_ref, mw3_ref, mw4_ref, arep_ref, m_ref):
    # radial MLP; 1/sqrt(fan_in) and SILU_NORM already folded into the weights
    h = rfeat_ref[...]
    h = jax.nn.silu(jnp.dot(h, mw1_ref[...], preferred_element_type=jnp.float32))
    h = jax.nn.silu(jnp.dot(h, mw2_ref[...], preferred_element_type=jnp.float32))
    h = jax.nn.silu(jnp.dot(h, mw3_ref[...], preferred_element_type=jnp.float32))
    tpw = jnp.dot(h, mw4_ref[...], preferred_element_type=jnp.float32)   # (TE, 5C)

    hs = hsend_ref[...]                       # (TE, 4C) m-major [s | vx | vy | vz]
    xs = hs[:, 0:c]                           # (TE, C)
    xv = hs[:, c:4 * c]                       # (TE, 3C)
    attr = attr_ref[...]                      # (TE, 4) = [a0 | a_x a_y a_z]
    a0 = attr[:, 0:1]                         # broadcasts along lanes

    # lane-replicated edge-attr slabs via a constant matmul on the idle MXU:
    #   block m of av_rep = a_m, of av_s1 = a_{(m+1)%3}, of av_s2 = a_{(m+2)%3}
    aslab = jnp.dot(attr, arep_ref[...], preferred_element_type=jnp.float32)  # (TE, 9C)
    av_rep = aslab[:, 0:3 * c]
    av_s1 = aslab[:, 3 * c:6 * c]
    av_s2 = aslab[:, 6 * c:9 * c]

    # per-path tensor-product weights
    tw0 = tpw[:, 0:c]
    tw1 = tpw[:, c:2 * c]
    tw2 = tpw[:, 2 * c:3 * c]
    tw3 = tpw[:, 3 * c:4 * c]
    tw4 = tpw[:, 4 * c:5 * c]

    # rotated copies of the vector slab for the cross product
    v0, v1, v2 = xv[:, 0:c], xv[:, c:2 * c], xv[:, 2 * c:3 * c]
    xv_s1 = jnp.concatenate([v1, v2, v0], axis=1)     # block m = v_{(m+1)%3}
    xv_s2 = jnp.concatenate([v2, v0, v1], axis=1)     # block m = v_{(m+2)%3}

    # path 0: 0e x 0e -> 0e
    p0 = tw0 * xs * a0
    # path 1: 1e x 1e -> 0e
    dva = xv * av_rep
    p1 = tw1 * (dva[:, 0:c] + dva[:, c:2 * c] + dva[:, 2 * c:3 * c]) * INV_SQRT3
    # path 2: 0e x 1e -> 1e (m-major slab)
    w2xs = tw2 * xs
    p2 = jnp.concatenate([w2xs, w2xs, w2xs], axis=1) * av_rep
    # path 3: 1e x 0e -> 1e
    w3a0 = tw3 * a0
    p3 = jnp.concatenate([w3a0, w3a0, w3a0], axis=1) * xv
    # path 4: 1e x 1e -> 1e (real-basis epsilon == cross product, (y,z,x) convention)
    cross = xv_s1 * av_s2 - xv_s2 * av_s1
    p4 = jnp.concatenate([tw4, tw4, tw4], axis=1) * cross * INV_SQRT2

    # single lane-dense store of the whole message row
    m_ref[...] = jnp.concatenate([p0, p1, p2, p3, p4], axis=1)


def edge_messages(edge_feats, edge_attrs, h_send, mlp_ws, arep, c, tile_e):
    e, nb = edge_feats.shape
    w1, w2, w3, w4 = mlp_ws
    kern = functools.partial(_edge_kernel, c)
    return pl.pallas_call(
        kern,
        out_shape=jax.ShapeDtypeStruct((e, 11 * c), jnp.float32),
        grid=(e // tile_e,),
        in_specs=[
            pl.BlockSpec((tile_e, nb), lambda i: (i, 0)),
            pl.BlockSpec((tile_e, 4), lambda i: (i, 0)),
            pl.BlockSpec((tile_e, 4 * c), lambda i: (i, 0)),
            pl.BlockSpec(w1.shape, lambda i: (0, 0)),
            pl.BlockSpec(w2.shape, lambda i: (0, 0)),
            pl.BlockSpec(w3.shape, lambda i: (0, 0)),
            pl.BlockSpec(w4.shape, lambda i: (0, 0)),
            pl.BlockSpec(arep.shape, lambda i: (0, 0)),
        ],
        out_specs=pl.BlockSpec((tile_e, 11 * c), lambda i: (i, 0)),
        compiler_params=_P1,
    )(edge_feats, edge_attrs, h_send, w1, w2, w3, w4, arep)


# ---------------------------------------------------------------------------
# 3) Fused scatter_sum + o3.Linear(irreps_middle -> target).
#    In-kernel one-hot from jedges; edge axis K-tiled ("arbitrary") with a
#    float32 VMEM accumulator; large node tile so m_all is re-streamed rarely.
# ---------------------------------------------------------------------------
def _scatter_linear_kernel(tile_n, jedge_ref, m_ref, wlin_ref, o_ref, acc_ref):
    k = pl.program_id(1)

    @pl.when(k == 0)
    def _():
        acc_ref[...] = jnp.zeros_like(acc_ref)

    tile_e = jedge_ref.shape[1]
    node_base = pl.program_id(0) * tile_n
    row_ids = node_base + lax.broadcasted_iota(jnp.int32, (tile_n, tile_e), 0)
    onehot = (row_ids == jedge_ref[...]).astype(jnp.float32)        # (TN, TE)
    acc_ref[...] += jnp.dot(onehot, m_ref[...], preferred_element_type=jnp.float32)

    @pl.when(k == pl.num_programs(1) - 1)
    def _():
        o_ref[...] = jnp.dot(acc_ref[...], wlin_ref[...],
                             preferred_element_type=jnp.float32)


def scatter_linear(jedges2d, m_all, w_lin, n_pad, tile_n, tile_e):
    e_pad, mid = m_all.shape
    cout = w_lin.shape[1]
    kern = functools.partial(_scatter_linear_kernel, tile_n)
    return pl.pallas_call(
        kern,
        out_shape=jax.ShapeDtypeStruct((n_pad, cout), jnp.float32),
        grid=(n_pad // tile_n, e_pad // tile_e),
        in_specs=[
            pl.BlockSpec((1, tile_e), lambda i, k: (0, k)),
            pl.BlockSpec((tile_e, mid), lambda i, k: (k, 0)),
            pl.BlockSpec((mid, cout), lambda i, k: (0, 0)),
        ],
        out_specs=pl.BlockSpec((tile_n, cout), lambda i, k: (i, 0)),
        scratch_shapes=[pltpu.VMEM((tile_n, mid), jnp.float32)],
        compiler_params=pltpu.CompilerParams(
            dimension_semantics=("parallel", "arbitrary")),
    )(jedges2d, m_all, w_lin)
    # TODO(synk): for v5e (compute-bound one-hot), replace with a sorted-edge /
    # CSR segment formulation via PrefetchScalarGridSpec.


# ---------------------------------------------------------------------------
# 4) Fused symmetric contraction (correlation=3) + linearproduct.
#    Tables resident in VMEM; per-node element selection via an in-kernel
#    one-hot matmul; lane-replication matmuls hoisted (4 per tile, widest
#    width, with narrower widths taken as lane prefixes of the same result).
# ---------------------------------------------------------------------------
def _symcon_kernel(c, h_ref, z_ref,
                   uw3_0_ref, uw2_0_ref, uw1_0_ref,
                   uw3_1_ref, uw2_1_ref, uw1_1_ref,
                   tmat_ref, wprod_ref, o_ref):
    tile_n = h_ref.shape[0]
    x = h_ref[...]                                          # (TN, 4C) m-major flat
    onehot = (z_ref[...] ==
              lax.broadcasted_iota(jnp.int32, (tile_n, ELEM_PAD), 1)
              ).astype(jnp.float32)                         # (TN, 8)

    # hoisted lane replication: rep[i][:, q] == x_i[:, q % c]  (widest = 48 reps)
    rep = [jnp.dot(x[:, i * c:(i + 1) * c], tmat_ref[...],
                   preferred_element_type=jnp.float32) for i in range(4)]

    def contract(uw3_ref, uw2_ref, uw1_ref, d):
        sel3 = jnp.dot(onehot, uw3_ref[...], preferred_element_type=jnp.float32)
        sel2 = jnp.dot(onehot, uw2_ref[...], preferred_element_type=jnp.float32)
        sel1 = jnp.dot(onehot, uw1_ref[...], preferred_element_type=jnp.float32)
        b3 = 16 * d * c                       # per-chunk widths (channel fastest)
        b2 = 4 * d * c
        b1 = d * c
        # correlation-3: contract i (slowest index of sel3) -> flat (t, u, d_, c)
        out1 = rep[0][:, :b3] * sel3[:, 0:b3]
        for i in range(1, 4):
            out1 = out1 + rep[i][:, :b3] * sel3[:, i * b3:(i + 1) * b3]
        # add correlation-2 weights, contract t -> flat (u, d_, c)
        s2 = out1 + sel2
        out2 = rep[0][:, :b2] * s2[:, 0:b2]
        for t in range(1, 4):
            out2 = out2 + rep[t][:, :b2] * s2[:, t * b2:(t + 1) * b2]
        # add correlation-1 weights, contract u -> flat (d_, c)
        s1 = out2 + sel1
        out3 = rep[0][:, :b1] * s1[:, 0:b1]
        for u in range(1, 4):
            out3 = out3 + rep[u][:, :b1] * s1[:, u * b1:(u + 1) * b1]
        return out3                            # (TN, d*C), m-major for d=3

    y0 = contract(uw3_0_ref, uw2_0_ref, uw1_0_ref, 1)       # (TN, C)
    y1 = contract(uw3_1_ref, uw2_1_ref, uw1_1_ref, 3)       # (TN, 3C)
    feat = jnp.concatenate([y0, y1], axis=1)                # (TN, 4C) m-major
    # linearproduct (block-diag, emits the e3nn flat layout directly)
    o_ref[...] = jnp.dot(feat, wprod_ref[...], preferred_element_type=jnp.float32)


def symcon_product(h, z2d, tables, tmat, w_prod, c, tile_n):
    n_pad = h.shape[0]
    uw3_0, uw2_0, uw1_0 = tables[0]
    uw3_1, uw2_1, uw1_1 = tables[1]
    kern = functools.partial(_symcon_kernel, c)
    return pl.pallas_call(
        kern,
        out_shape=jax.ShapeDtypeStruct((n_pad, 4 * c), jnp.float32),
        grid=(n_pad // tile_n,),
        in_specs=[
            pl.BlockSpec((tile_n, 4 * c), lambda i: (i, 0)),
            pl.BlockSpec((tile_n, 1), lambda i: (i, 0)),
            pl.BlockSpec(uw3_0.shape, lambda i: (0, 0)),
            pl.BlockSpec(uw2_0.shape, lambda i: (0, 0)),
            pl.BlockSpec(uw1_0.shape, lambda i: (0, 0)),
            pl.BlockSpec(uw3_1.shape, lambda i: (0, 0)),
            pl.BlockSpec(uw2_1.shape, lambda i: (0, 0)),
            pl.BlockSpec(uw1_1.shape, lambda i: (0, 0)),
            pl.BlockSpec(tmat.shape, lambda i: (0, 0)),
            pl.BlockSpec(w_prod.shape, lambda i: (0, 0)),
        ],
        out_specs=pl.BlockSpec((tile_n, 4 * c), lambda i: (i, 0)),
        compiler_params=pltpu.CompilerParams(
            dimension_semantics=("parallel",),
            vmem_limit_bytes=48 * 1024 * 1024),
    )(h, z2d, uw3_0, uw2_0, uw1_0, uw3_1, uw2_1, uw1_1, tmat, w_prod)
    # TODO(synk): on v7x, group nodes by element (host sort + scalar prefetch)
    # to drop the K=8 selection matmuls and their multi-MiB sel intermediates.


# ---------------------------------------------------------------------------
# Parameter prep (deterministic synthetic; shapes follow the module __init__).
# All o3.Linear blocks are folded into block-diagonal matrices on the flat
# layouts, with 1/sqrt(fan_in) scales and the e3nn layout permutation baked in.
# ---------------------------------------------------------------------------
def init_params(key, c, num_bessel, num_elements):
    keys = jax.random.split(key, 10)

    def w(k, shape):
        return np.asarray(jax.random.normal(k, shape, dtype=jnp.float32))

    w_up0, w_up1 = w(keys[0], (c, c)), w(keys[1], (c, c))
    mlp_w1, mlp_w2 = w(keys[2], (num_bessel, 64)), w(keys[3], (64, 64))
    mlp_w3, mlp_w4 = w(keys[4], (64, 64)), w(keys[5], (64, 5 * c))
    w_lin0, w_lin1 = w(keys[6], (2 * c, c)), w(keys[7], (3 * c, c))
    w_prod0, w_prod1 = w(keys[8], (c, c)), w(keys[9], (c, c))

    # m-major internal index k  <->  e3nn flat index perm[k]
    perm = np.concatenate(
        [np.arange(c),
         np.array([c + ch * 3 + m for m in range(3) for ch in range(c)])])

    a1 = 1.0 / math.sqrt(c)

    def blockdiag(ws, wv, scale_s, scale_v):
        bd = np.zeros((4 * c, 4 * c), np.float32)
        bd[0:c, 0:c] = ws * scale_s
        for m in range(3):
            sl = slice(c * (1 + m), c * (2 + m))
            bd[sl, sl] = wv * scale_v
        return bd

    # linear_up: e3nn-layout input rows -> m-major output
    bd_up = blockdiag(w_up0, w_up1, a1, a1)
    w_up = np.zeros_like(bd_up)
    w_up[perm, :] = bd_up

    # linear: slot-major middle (11C) -> m-major target (4C)
    w_lin = np.zeros((11 * c, 4 * c), np.float32)
    w_lin[0:2 * c, 0:c] = w_lin0 / math.sqrt(2 * c)
    for k in range(3):                  # middle 1e path index (slot2/3/4)
        for m in range(3):
            r0 = 2 * c + 3 * c * k + m * c
            w_lin[r0:r0 + c, c * (1 + m):c * (2 + m)] = \
                w_lin1[k * c:(k + 1) * c, :] / math.sqrt(3 * c)

    # linearproduct: m-major input -> e3nn-layout output columns
    bd_prod = blockdiag(w_prod0, w_prod1, a1, a1)
    w_prod = np.zeros_like(bd_prod)
    w_prod[:, perm] = bd_prod

    # radial MLP: fold 1/sqrt(fan_in) and the SiLU normalize2mom constant;
    # zero-pad the hidden width 64 -> 128 (silu(0)=0 keeps semantics exact).
    s64 = 1.0 / math.sqrt(64.0)
    m1 = mlp_w1 / math.sqrt(num_bessel)
    m2 = mlp_w2 * (SILU_NORM * s64)
    m3 = mlp_w3 * (SILU_NORM * s64)
    m4 = mlp_w4 * (SILU_NORM * s64)
    hp = MLP_HIDDEN_PAD
    p1 = np.zeros((num_bessel, hp), np.float32); p1[:, :64] = m1
    p2 = np.zeros((hp, hp), np.float32);          p2[:64, :64] = m2
    p3 = np.zeros((hp, hp), np.float32);          p3[:64, :64] = m3
    p4 = np.zeros((hp, 5 * c), np.float32);       p4[:64, :] = m4
    mlp = (p1, p2, p3, p4)

    # edge-attr lane-replication matrix: (TE,4) @ (4,9C) -> [av | av_s1 | av_s2]
    arep = np.zeros((4, 9 * c), np.float32)
    for m in range(3):
        arep[1 + m, m * c:(m + 1) * c] = 1.0
        arep[1 + (m + 1) % 3, 3 * c + m * c:3 * c + (m + 1) * c] = 1.0
        arep[1 + (m + 2) % 3, 6 * c + m * c:6 * c + (m + 1) * c] = 1.0

    # Symmetric-contraction coupling tensors and per-element weights (corr=3).
    n_paths = {3: {0: 2, 1: 2}, 2: {0: 2, 1: 1}, 1: {0: 1, 1: 1}}
    rng = np.random.RandomState(0)
    tables = {}
    for l_out in (0, 1):
        d = 2 * l_out + 1
        # TODO(synk): U3/U2/U1 are deterministic synthetic stand-ins for MACE's
        # U_matrix_real generalized Clebsch-Gordan tensors (init-time CPU precompute).
        u3 = rng.standard_normal((d, 4, 4, 4, n_paths[3][l_out])).astype(np.float32) * 0.3
        u2 = rng.standard_normal((d, 4, 4, n_paths[2][l_out])).astype(np.float32) * 0.3
        u1 = rng.standard_normal((d, 4, n_paths[1][l_out])).astype(np.float32) * 0.3
        w3_ = rng.standard_normal((num_elements, n_paths[3][l_out], c)).astype(np.float32) * 0.3
        w2_ = rng.standard_normal((num_elements, n_paths[2][l_out], c)).astype(np.float32) * 0.3
        w1_ = rng.standard_normal((num_elements, n_paths[1][l_out], c)).astype(np.float32) * 0.3
        # Pre-contract U with per-element weights; successive contraction index
        # is the slowest-varying, channel fastest.
        uw3 = np.einsum("dutip,epc->eitudc", u3, w3_)   # (E, i, t, u, d, c)
        uw2 = np.einsum("dutp,epc->etudc", u2, w2_)     # (E, t, u, d, c)
        uw1 = np.einsum("dup,epc->eudc", u1, w1_)       # (E, u, d, c)

        def prep(arr):
            arr = arr.reshape(num_elements, -1)
            out = np.zeros((ELEM_PAD, arr.shape[1]), np.float32)
            out[:num_elements] = arr
            return jnp.asarray(out)

        tables[l_out] = (prep(uw3), prep(uw2), prep(uw1))

    # lane-replication matrix: tile a (rows, C) block up to 48x along lanes via MXU
    reps_max = 16 * 3
    q = np.arange(reps_max * c)
    tmat = (q[None, :] % c == np.arange(c)[:, None]).astype(np.float32)

    return {
        "w_up": jnp.asarray(w_up),
        "w_lin": jnp.asarray(w_lin),
        "w_prod": jnp.asarray(w_prod),
        "mlp": tuple(jnp.asarray(x) for x in mlp),
        "arep": jnp.asarray(arep),
        "symcon": tables,
        "tmat": jnp.asarray(tmat),
    }


# ---------------------------------------------------------------------------
# Forward pass (mirrors InteractionBlock.forward, max_l = 1, correlation = 3)
# ---------------------------------------------------------------------------
def interaction_block_forward(params, node_feats, edge_feats, edge_attrs,
                              iedges, jedges, atomic_numbers, *, num_channels):
    c = num_channels
    n = node_feats.shape[0]
    e = edge_feats.shape[0]

    tile_nc, tile_ns, n_pad = _node_tiles(n)
    tile_e, e_pad = _edge_tiles(e)

    # pad rows; padded edges scatter to node id -1 so they contribute nothing
    nf = jnp.zeros((n_pad, 4 * c), jnp.float32).at[:n].set(node_feats)
    ef = jnp.zeros((e_pad, edge_feats.shape[1]), jnp.float32).at[:e].set(edge_feats)
    ea = jnp.zeros((e_pad, 4), jnp.float32).at[:e].set(edge_attrs)
    ie = jnp.zeros((e_pad,), jnp.int32).at[:e].set(iedges.astype(jnp.int32))
    je = jnp.full((e_pad,), -1, jnp.int32).at[:e].set(jedges.astype(jnp.int32))
    z = jnp.zeros((n_pad, 1), jnp.int32).at[:n, 0].set(atomic_numbers.astype(jnp.int32))

    # 1) linear_up (e3nn layout in, m-major flat out), one lane-dense matmul
    h = row_matmul(nf, params["w_up"], tile_ns)

    # 2) gather sender-node features (plain-JAX glue)
    # TODO(synk): could be fused into the edge kernel via scalar-prefetched
    # iedges + in-kernel DMA gather to avoid the (E,4C) HBM intermediate.
    h_send = jnp.take(h, ie, axis=0)

    # 3) fused radial MLP + weighted tensor product per edge -> (E, 11C)
    m_all = edge_messages(ef, ea, h_send, params["mlp"], params["arep"], c, tile_e)

    # 4) fused scatter_sum (in-kernel one-hot, K-tiled edges) + linear -> (N, 4C)
    h = scatter_linear(je.reshape(1, e_pad), m_all, params["w_lin"],
                       n_pad, tile_ns, tile_e)

    # 5) fused symmetric contraction (in-kernel element selection) + linearproduct
    out = symcon_product(h, z, params["symcon"], params["tmat"],
                         params["w_prod"], c, tile_nc)

    # back to the e3nn flat layout (already emitted by the fused linearproduct)
    return out[:n]


if __name__ == "__main__":
    C = 32            # num_channels
    NUM_BESSEL = 8
    NUM_ELEMENTS = 3
    N_NODES = 16
    N_EDGES = 32

    key = jax.random.PRNGKey(0)
    kp, kn, ke, ka, ki, kj, kz = jax.random.split(key, 7)

    params = init_params(kp, C, NUM_BESSEL, NUM_ELEMENTS)
    node_feats = jax.random.normal(kn, (N_NODES, C * 4), dtype=jnp.float32)
    edge_feats = jax.random.normal(ke, (N_EDGES, NUM_BESSEL), dtype=jnp.float32)
    edge_attrs = jax.random.normal(ka, (N_EDGES, 4), dtype=jnp.float32)
    iedges = jax.random.randint(ki, (N_EDGES,), 0, N_NODES)
    jedges = jax.random.randint(kj, (N_EDGES,), 0, N_NODES)
    atomic_numbers = jax.random.randint(kz, (N_NODES,), 0, NUM_ELEMENTS)

    fwd = jax.jit(functools.partial(interaction_block_forward, num_channels=C))
    out = fwd(params, node_feats, edge_feats, edge_attrs, iedges, jedges, atomic_numbers)
    jax.block_until_ready(out)
    assert out.shape == (N_NODES, C * 4) and out.dtype == jnp.float32
    print("KERNEL_OK")
</pallas_src>

<mosaic_0001>
module attributes {stable_mosaic.version = 11 : i64} {
  func.func @_rowmm_kernel(%arg0: i32, %arg1: memref<16x128xf32, #tpu.memory_space<vmem>>, %arg2: memref<128x128xf32, #tpu.memory_space<vmem>>, %arg3: memref<16x128xf32, #tpu.memory_space<vmem>>) attributes {dimension_semantics = [#tpu.dimension_semantics<parallel>], iteration_bounds = array<i64: 1>, scalar_prefetch = 0 : i64, scratch_operands = 0 : i64, tpu.core_type = #tpu.core_type<tc>, window_params = [{transform_indices = @transform_0, window_bounds = array<i64: 16, 128>}, {pipeline_mode = #tpu.pipeline_mode<synchronous>, transform_indices = @transform_1, window_bounds = array<i64: 128, 128>}, {transform_indices = @transform_2, window_bounds = array<i64: 16, 128>}]} {
    %c0 = arith.constant 0 : index
    %c0_0 = arith.constant 0 : index
    %0 = vector.load %arg1[%c0, %c0_0] : memref<16x128xf32, #tpu.memory_space<vmem>>, vector<16x128xf32>
    %c0_1 = arith.constant 0 : index
    %c0_2 = arith.constant 0 : index
    %1 = vector.load %arg2[%c0_1, %c0_2] : memref<128x128xf32, #tpu.memory_space<vmem>>, vector<128x128xf32>
    %cst = arith.constant dense<0.000000e+00> : vector<16x128xf32>
    %2 = tpu.matmul %0, %1, %cst {dimension_numbers = #tpu.dot_dimension_numbers<[1], [0], [0], [1], [0, 0, 1, 1], [], []>} : vector<16x128xf32>, vector<128x128xf32>, vector<16x128xf32> -> vector<16x128xf32>
    %c0_3 = arith.constant 0 : index
    %c0_4 = arith.constant 0 : index
    %3 = vector.load %arg3[%c0_3, %c0_4] : memref<16x128xf32, #tpu.memory_space<vmem>>, vector<16x128xf32>
    tpu.vector_store %arg3[%c0_3, %c0_4], %2 {strides = array<i32>} : memref<16x128xf32, #tpu.memory_space<vmem>>, vector<16x128xf32>,
    return
  }
  func.func @transform_0(%arg0: i32) -> (i32, i32) {
    %c0_i32 = arith.constant 0 : i32
    %c0_i32_0 = arith.constant 0 : i32
    return %arg0, %c0_i32 : i32, i32
  }
  func.func @transform_1(%arg0: i32) -> (i32, i32) {
    %c0_i32 = arith.constant 0 : i32
    %c0_i32_0 = arith.constant 0 : i32
    %c0_i32_1 = arith.constant 0 : i32
    return %c0_i32, %c0_i32_0 : i32, i32
  }
  func.func @transform_2(%arg0: i32) -> (i32, i32) {
    %c0_i32 = arith.constant 0 : i32
    %c0_i32_0 = arith.constant 0 : i32
    return %arg0, %c0_i32 : i32, i32
  }
}

module attributes {stable_mosaic.version = 11 : i64} {
  func.func @_scatter_linear_kernel(%arg0: i32, %arg1: i32, %arg2: memref<1x32xi32, #tpu.memory_space<vmem>>, %arg3: memref<32x352xf32, #tpu.memory_space<vmem>>, %arg4: memref<352x128xf32, #tpu.memory_space<vmem>>, %arg5: memref<16x128xf32, #tpu.memory_space<vmem>>, %arg6: memref<16x352xf32, #tpu.memory_space<vmem>>) attributes {dimension_semantics = [#tpu.dimension_semantics<parallel>, #tpu.dimension_semantics<arbitrary>], iteration_bounds = array<i64: 1, 1>, scalar_prefetch = 0 : i64, scratch_operands = 1 : i64, tpu.core_type = #tpu.core_type<tc>, window_params = [{transform_indices = @transform_0, window_bounds = array<i64: 1, 32>}, {transform_indices = @transform_1, window_bounds = array<i64: 32, 352>}, {pipeline_mode = #tpu.pipeline_mode<synchronous>, transform_indices = @transform_2, window_bounds = array<i64: 352, 128>}, {transform_indices = @transform_3, window_bounds = array<i64: 16, 128>}]} {
    %c0_i32 = arith.constant 0 : i32
    %0 = arith.cmpi eq, %arg1, %c0_i32 : i32
    %1 = arith.extui %0 : i1 to i32
    %c0_i32_0 = arith.constant 0 : i32
    %2 = arith.cmpi ne, %1, %c0_i32_0 : i32
    scf.if %2 {
      %cst_10 = arith.constant 0.000000e+00 : f32
      %20 = vector.broadcast %cst_10 : f32 to vector<16x352xf32>
      %c0_11 = arith.constant 0 : index
      %c0_12 = arith.constant 0 : index
      %21 = vector.load %arg6[%c0_11, %c0_12] : memref<16x352xf32, #tpu.memory_space<vmem>>, vector<16x352xf32>
      tpu.vector_store %arg6[%c0_11, %c0_12], %20 {strides = array<i32>} : memref<16x352xf32, #tpu.memory_space<vmem>>, vector<16x352xf32>,
    } else {
    }
    %c16_i32 = arith.constant 16 : i32
    %3 = arith.muli %arg0, %c16_i32 : i32
    %4 = tpu.iota {dimensions = array<i32: 0>} : vector<16x32xi32>
    %5 = vector.broadcast %3 : i32 to vector<16x32xi32>
    %6 = arith.addi %5, %4 : vector<16x32xi32>
    %c0 = arith.constant 0 : index
    %c0_1 = arith.constant 0 : index
    %7 = vector.load %arg2[%c0, %c0_1] : memref<1x32xi32, #tpu.memory_space<vmem>>, vector<1x32xi32>
    %8 = vector.broadcast %7 : vector<1x32xi32> to vector<16x32xi32>
    %9 = arith.cmpi eq, %6, %8 : vector<16x32xi32>
    %10 = arith.extui %9 : vector<16x32xi1> to vector<16x32xi32>
    %11 = arith.sitofp %10 : vector<16x32xi32> to vector<16x32xf32>
    %c0_2 = arith.constant 0 : index
    %c0_3 = arith.constant 0 : index
    %12 = vector.load %arg6[%c0_2, %c0_3] : memref<16x352xf32, #tpu.memory_space<vmem>>, vector<16x352xf32>
    %c0_4 = arith.constant 0 : index
    %c0_5 = arith.constant 0 : index
    %13 = vector.load %arg3[%c0_4, %c0_5] : memref<32x352xf32, #tpu.memory_space<vmem>>, vector<32x352xf32>
    %cst = arith.constant dense<0.000000e+00> : vector<16x352xf32>
    %14 = tpu.matmul %11, %13, %cst {dimension_numbers = #tpu.dot_dimension_numbers<[1], [0], [0], [1], [0, 0, 1, 1], [], []>} : vector<16x32xf32>, vector<32x352xf32>, vector<16x352xf32> -> vector<16x352xf32>
    %15 = arith.addf %12, %14 : vector<16x352xf32>
    %c0_6 = arith.constant 0 : index
    %c0_7 = arith.constant 0 : index
    %16 = vector.load %arg6[%c0_6, %c0_7] : memref<16x352xf32, #tpu.memory_space<vmem>>, vector<16x352xf32>
    tpu.vector_store %arg6[%c0_6, %c0_7], %15 {strides = array<i32>} : memref<16x352xf32, #tpu.memory_space<vmem>>, vector<16x352xf32>,
    %c0_i32_8 = arith.constant 0 : i32
    %17 = arith.cmpi eq, %arg1, %c0_i32_8 : i32
    %18 = arith.extui %17 : i1 to i32
    %c0_i32_9 = arith.constant 0 : i32
    %19 = arith.cmpi ne, %18, %c0_i32_9 : i32
    scf.if %19 {
      %c0_10 = arith.constant 0 : index
      %c0_11 = arith.constant 0 : index
      %20 = vector.load %arg6[%c0_10, %c0_11] : memref<16x352xf32, #tpu.memory_space<vmem>>, vector<16x352xf32>
      %c0_12 = arith.constant 0 : index
      %c0_13 = arith.constant 0 : index
      %21 = vector.load %arg4[%c0_12, %c0_13] : memref<352x128xf32, #tpu.memory_space<vmem>>, vector<352x128xf32>
      %cst_14 = arith.constant dense<0.000000e+00> : vector<16x128xf32>
      %22 = tpu.matmul %20, %21, %cst_14 {dimension_numbers = #tpu.dot_dimension_numbers<[1], [0], [0], [1], [0, 0, 1, 1], [], []>} : vector<16x352xf32>, vector<352x128xf32>, vector<16x128xf32> -> vector<16x128xf32>
      %c0_15 = arith.constant 0 : index
      %c0_16 = arith.constant 0 : index
      %23 = vector.load %arg5[%c0_15, %c0_16] : memref<16x128xf32, #tpu.memory_space<vmem>>, vector<16x128xf32>
      tpu.vector_store %arg5[%c0_15, %c0_16], %22 {strides = array<i32>} : memref<16x128xf32, #tpu.memory_space<vmem>>, vector<16x128xf32>,
    } else {
    }
    return
  }
  func.func @transform_0(%arg0: i32, %arg1: i32) -> (i32, i32) {
    %c0_i32 = arith.constant 0 : i32
    %c0_i32_0 = arith.constant 0 : i32
    return %c0_i32, %arg1 : i32, i32
  }
  func.func @transform_1(%arg0: i32, %arg1: i32) -> (i32, i32) {
    %c0_i32 = arith.constant 0 : i32
    %c0_i32_0 = arith.constant 0 : i32
    return %arg1, %c0_i32 : i32, i32
  }
  func.func @transform_2(%arg0: i32, %arg1: i32) -> (i32, i32) {
    %c0_i32 = arith.constant 0 : i32
    %c0_i32_0 = arith.constant 0 : i32
    %c0_i32_1 = arith.constant 0 : i32
    return %c0_i32, %c0_i32_0 : i32, i32
  }
  func.func @transform_3(%arg0: i32, %arg1: i32) -> (i32, i32) {
    %c0_i32 = arith.constant 0 : i32
    %c0_i32_0 = arith.constant 0 : i32
    return %arg0, %c0_i32 : i32, i32
  }
}

module attributes {stable_mosaic.version = 11 : i64} {
  func.func @_edge_kernel(%arg0: i32, %arg1: memref<32x8xf32, #tpu.memory_space<vmem>>, %arg2: memref<32x4xf32, #tpu.memory_space<vmem>>, %arg3: memref<32x128xf32, #tpu.memory_space<vmem>>, %arg4: memref<8x128xf32, #tpu.memory_space<vmem>>, %arg5: memref<128x128xf32, #tpu.memory_space<vmem>>, %arg6: memref<128x128xf32, #tpu.memory_space<vmem>>, %arg7: memref<128x160xf32, #tpu.memory_space<vmem>>, %arg8: memref<4x288xf32, #tpu.memory_space<vmem>>, %arg9: memref<32x352xf32, #tpu.memory_space<vmem>>) attributes {dimension_semantics = [#tpu.dimension_semantics<parallel>], iteration_bounds = array<i64: 1>, scalar_prefetch = 0 : i64, scratch_operands = 0 : i64, tpu.core_type = #tpu.core_type<tc>, window_params = [{transform_indices = @transform_0, window_bounds = array<i64: 32, 8>}, {transform_indices = @transform_1, window_bounds = array<i64: 32, 4>}, {transform_indices = @transform_2, window_bounds = array<i64: 32, 128>}, {pipeline_mode = #tpu.pipeline_mode<synchronous>, transform_indices = @transform_3, window_bounds = array<i64: 8, 128>}, {pipeline_mode = #tpu.pipeline_mode<synchronous>, transform_indices = @transform_4, window_bounds = array<i64: 128, 128>}, {pipeline_mode = #tpu.pipeline_mode<synchronous>, transform_indices = @transform_5, window_bounds = array<i64: 128, 128>}, {pipeline_mode = #tpu.pipeline_mode<synchronous>, transform_indices = @transform_6, window_bounds = array<i64: 128, 160>}, {pipeline_mode = #tpu.pipeline_mode<synchronous>, transform_indices = @transform_7, window_bounds = array<i64: 4, 288>}, {transform_indices = @transform_8, window_bounds = array<i64: 32, 352>}]} {
    %c0 = arith.constant 0 : index
    %c0_0 = arith.constant 0 : index
    %0 = vector.load %arg1[%c0, %c0_0] : memref<32x8xf32, #tpu.memory_space<vmem>>, vector<32x8xf32>
    %c0_1 = arith.constant 0 : index
    %c0_2 = arith.constant 0 : index
    %1 = vector.load %arg4[%c0_1, %c0_2] : memref<8x128xf32, #tpu.memory_space<vmem>>, vector<8x128xf32>
    %cst = arith.constant dense<0.000000e+00> : vector<32x128xf32>
    %2 = tpu.matmul %0, %1, %cst {dimension_numbers = #tpu.dot_dimension_numbers<[1], [0], [0], [1], [0, 0, 1, 1], [], []>} : vector<32x8xf32>, vector<8x128xf32>, vector<32x128xf32> -> vector<32x128xf32>
    %3 = arith.negf %2 : vector<32x128xf32>
    %4 = math.exp %3 : vector<32x128xf32>
    %cst_3 = arith.constant 1.000000e+00 : f32
    %5 = vector.broadcast %cst_3 : f32 to vector<32x128xf32>
    %6 = arith.addf %5, %4 : vector<32x128xf32>
    %7 = arith.divf %5, %6 : vector<32x128xf32>
    %8 = arith.mulf %2, %7 : vector<32x128xf32>
    %c0_4 = arith.constant 0 : index
    %c0_5 = arith.constant 0 : index
    %9 = vector.load %arg5[%c0_4, %c0_5] : memref<128x128xf32, #tpu.memory_space<vmem>>, vector<128x128xf32>
    %cst_6 = arith.constant dense<0.000000e+00> : vector<32x128xf32>
    %10 = tpu.matmul %8, %9, %cst_6 {dimension_numbers = #tpu.dot_dimension_numbers<[1], [0], [0], [1], [0, 0, 1, 1], [], []>} : vector<32x128xf32>, vector<128x128xf32>, vector<32x128xf32> -> vector<32x128xf32>
    %11 = arith.negf %10 : vector<32x128xf32>
    %12 = math.exp %11 : vector<32x128xf32>
    %cst_7 = arith.constant 1.000000e+00 : f32
    %13 = vector.broadcast %cst_7 : f32 to vector<32x128xf32>
    %14 = arith.addf %13, %12 : vector<32x128xf32>
    %15 = arith.divf %13, %14 : vector<32x128xf32>
    %16 = arith.mulf %10, %15 : vector<32x128xf32>
    %c0_8 = arith.constant 0 : index
    %c0_9 = arith.constant 0 : index
    %17 = vector.load %arg6[%c0_8, %c0_9] : memref<128x128xf32, #tpu.memory_space<vmem>>, vector<128x128xf32>
    %cst_10 = arith.constant dense<0.000000e+00> : vector<32x128xf32>
    %18 = tpu.matmul %16, %17, %cst_10 {dimension_numbers = #tpu.dot_dimension_numbers<[1], [0], [0], [1], [0, 0, 1, 1], [], []>} : vector<32x128xf32>, vector<128x128xf32>, vector<32x128xf32> -> vector<32x128xf32>
    %19 = arith.negf %18 : vector<32x128xf32>
    %20 = math.exp %19 : vector<32x128xf32>
    %cst_11 = arith.constant 1.000000e+00 : f32
    %21 = vector.broadcast %cst_11 : f32 to vector<32x128xf32>
    %22 = arith.addf %21, %20 : vector<32x128xf32>
    %23 = arith.divf %21, %22 : vector<32x128xf32>
    %24 = arith.mulf %18, %23 : vector<32x128xf32>
    %c0_12 = arith.constant 0 : index
    %c0_13 = arith.constant 0 : index
    %25 = vector.load %arg7[%c0_12, %c0_13] : memref<128x160xf32, #tpu.memory_space<vmem>>, vector<128x160xf32>
    %cst_14 = arith.constant dense<0.000000e+00> : vector<32x160xf32>
    %26 = tpu.matmul %24, %25, %cst_14 {dimension_numbers = #tpu.dot_dimension_numbers<[1], [0], [0], [1], [0, 0, 1, 1], [], []>} : vector<32x128xf32>, vector<128x160xf32>, vector<32x160xf32> -> vector<32x160xf32>
    %c0_15 = arith.constant 0 : index
    %c0_16 = arith.constant 0 : index
    %27 = vector.load %arg3[%c0_15, %c0_16] : memref<32x128xf32, #tpu.memory_space<vmem>>, vector<32x128xf32>
    %28 = vector.extract_strided_slice %27 {offsets = [0, 0], sizes = [32, 32], strides = [1, 1]} : vector<32x128xf32> to vector<32x32xf32>
    %29 = vector.extract_strided_slice %27 {offsets = [0, 32], sizes = [32, 96], strides = [1, 1]} : vector<32x128xf32> to vector<32x96xf32>
    %c0_17 = arith.constant 0 : index
    %c0_18 = arith.constant 0 : index
    %30 = vector.load %arg2[%c0_17, %c0_18] : memref<32x4xf32, #tpu.memory_space<vmem>>, vector<32x4xf32>
    %31 = vector.extract_strided_slice %30 {offsets = [0, 0], sizes = [32, 1], strides = [1, 1]} : vector<32x4xf32> to vector<32x1xf32>
    %c0_19 = arith.constant 0 : index
    %c0_20 = arith.constant 0 : index
    %32 = vector.load %arg8[%c0_19, %c0_20] : memref<4x288xf32, #tpu.memory_space<vmem>>, vector<4x288xf32>
    %cst_21 = arith.constant dense<0.000000e+00> : vector<32x288xf32>
    %33 = tpu.matmul %30, %32, %cst_21 {dimension_numbers = #tpu.dot_dimension_numbers<[1], [0], [0], [1], [0, 0, 1, 1], [], []>} : vector<32x4xf32>, vector<4x288xf32>, vector<32x288xf32> -> vector<32x288xf32>
    %34 = vector.extract_strided_slice %33 {offsets = [0, 0], sizes = [32, 96], strides = [1, 1]} : vector<32x288xf32> to vector<32x96xf32>
    %35 = vector.extract_strided_slice %33 {offsets = [0, 96], sizes = [32, 96], strides = [1, 1]} : vector<32x288xf32> to vector<32x96xf32>
    %36 = vector.extract_strided_slice %33 {offsets = [0, 192], sizes = [32, 96], strides = [1, 1]} : vector<32x288xf32> to vector<32x96xf32>
    %37 = vector.extract_strided_slice %26 {offsets = [0, 0], sizes = [32, 32], strides = [1, 1]} : vector<32x160xf32> to vector<32x32xf32>
    %38 = vector.extract_strided_slice %26 {offsets = [0, 32], sizes = [32, 32], strides = [1, 1]} : vector<32x160xf32> to vector<32x32xf32>
    %39 = vector.extract_strided_slice %26 {offsets = [0, 64], sizes = [32, 32], strides = [1, 1]} : vector<32x160xf32> to vector<32x32xf32>
    %40 = vector.extract_strided_slice %26 {offsets = [0, 96], sizes = [32, 32], strides = [1, 1]} : vector<32x160xf32> to vector<32x32xf32>
    %41 = vector.extract_strided_slice %26 {offsets = [0, 128], sizes = [32, 32], strides = [1, 1]} : vector<32x160xf32> to vector<32x32xf32>
    %42 = vector.extract_strided_slice %29 {offsets = [0, 0], sizes = [32, 32], strides = [1, 1]} : vector<32x96xf32> to vector<32x32xf32>
    %43 = vector.extract_strided_slice %29 {offsets = [0, 32], sizes = [32, 32], strides = [1, 1]} : vector<32x96xf32> to vector<32x32xf32>
    %44 = vector.extract_strided_slice %29 {offsets = [0, 64], sizes = [32, 32], strides = [1, 1]} : vector<32x96xf32> to vector<32x32xf32>
    %45 = tpu.concatenate %43, %44, %42 in 1 : vector<32x32xf32>, vector<32x32xf32>, vector<32x32xf32> -> vector<32x96xf32>
    %46 = tpu.concatenate %44, %42, %43 in 1 : vector<32x32xf32>, vector<32x32xf32>, vector<32x32xf32> -> vector<32x96xf32>
    %47 = arith.mulf %37, %28 : vector<32x32xf32>
    %48 = vector.broadcast %31 : vector<32x1xf32> to vector<32x32xf32>
    %49 = arith.mulf %47, %48 : vector<32x32xf32>
    %50 = arith.mulf %29, %34 : vector<32x96xf32>
    %51 = vector.extract_strided_slice %50 {offsets = [0, 0], sizes = [32, 32], strides = [1, 1]} : vector<32x96xf32> to vector<32x32xf32>
    %52 = vector.extract_strided_slice %50 {offsets = [0, 32], sizes = [32, 32], strides = [1, 1]} : vector<32x96xf32> to vector<32x32xf32>
    %53 = arith.addf %51, %52 : vector<32x32xf32>
    %54 = vector.extract_strided_slice %50 {offsets = [0, 64], sizes = [32, 32], strides = [1, 1]} : vector<32x96xf32> to vector<32x32xf32>
    %55 = arith.addf %53, %54 : vector<32x32xf32>
    %56 = arith.mulf %38, %55 : vector<32x32xf32>
    %cst_22 = arith.constant 0.577350259 : f32
    %57 = vector.broadcast %cst_22 : f32 to vector<32x32xf32>
    %58 = arith.mulf %56, %57 : vector<32x32xf32>
    %59 = arith.mulf %39, %28 : vector<32x32xf32>
    %60 = tpu.concatenate %59, %59, %59 in 1 : vector<32x32xf32>, vector<32x32xf32>, vector<32x32xf32> -> vector<32x96xf32>
    %61 = arith.mulf %60, %34 : vector<32x96xf32>
    %62 = vector.broadcast %31 : vector<32x1xf32> to vector<32x32xf32>
    %63 = arith.mulf %40, %62 : vector<32x32xf32>
    %64 = tpu.concatenate %63, %63, %63 in 1 : vector<32x32xf32>, vector<32x32xf32>, vector<32x32xf32> -> vector<32x96xf32>
    %65 = arith.mulf %64, %29 : vector<32x96xf32>
    %66 = arith.mulf %45, %36 : vector<32x96xf32>
    %67 = arith.mulf %46, %35 : vector<32x96xf32>
    %68 = arith.subf %66, %67 : vector<32x96xf32>
    %69 = tpu.concatenate %41, %41, %41 in 1 : vector<32x32xf32>, vector<32x32xf32>, vector<32x32xf32> -> vector<32x96xf32>
    %70 = arith.mulf %69, %68 : vector<32x96xf32>
    %cst_23 = arith.constant 0.707106769 : f32
    %71 = vector.broadcast %cst_23 : f32 to vector<32x96xf32>
    %72 = arith.mulf %70, %71 : vector<32x96xf32>
    %73 = tpu.concatenate %49, %58, %61, %65, %72 in 1 : vector<32x32xf32>, vector<32x32xf32>, vector<32x96xf32>, vector<32x96xf32>, vector<32x96xf32> -> vector<32x352xf32>
    %c0_24 = arith.constant 0 : index
    %c0_25 = arith.constant 0 : index
    %74 = vector.load %arg9[%c0_24, %c0_25] : memref<32x352xf32, #tpu.memory_space<vmem>>, vector<32x352xf32>
    tpu.vector_store %arg9[%c0_24, %c0_25], %73 {strides = array<i32>} : memref<32x352xf32, #tpu.memory_space<vmem>>, vector<32x352xf32>,
    return
  }
  func.func @transform_0(%arg0: i32) -> (i32, i32) {
    %c0_i32 = arith.constant 0 : i32
    %c0_i32_0 = arith.constant 0 : i32
    return %arg0, %c0_i32 : i32, i32
  }
  func.func @transform_1(%arg0: i32) -> (i32, i32) {
    %c0_i32 = arith.constant 0 : i32
    %c0_i32_0 = arith.constant 0 : i32
    return %arg0, %c0_i32 : i32, i32
  }
  func.func @transform_2(%arg0: i32) -> (i32, i32) {
    %c0_i32 = arith.constant 0 : i32
    %c0_i32_0 = arith.constant 0 : i32
    return %arg0, %c0_i32 : i32, i32
  }
  func.func @transform_3(%arg0: i32) -> (i32, i32) {
    %c0_i32 = arith.constant 0 : i32
    %c0_i32_0 = arith.constant 0 : i32
    %c0_i32_1 = arith.constant 0 : i32
    return %c0_i32, %c0_i32_0 : i32, i32
  }
  func.func @transform_4(%arg0: i32) -> (i32, i32) {
    %c0_i32 = arith.constant 0 : i32
    %c0_i32_0 = arith.constant 0 : i32
    %c0_i32_1 = arith.constant 0 : i32
    return %c0_i32, %c0_i32_0 : i32, i32
  }
  func.func @transform_5(%arg0: i32) -> (i32, i32) {
    %c0_i32 = arith.constant 0 : i32
    %c0_i32_0 = arith.constant 0 : i32
    %c0_i32_1 = arith.constant 0 : i32
    return %c0_i32, %c0_i32_0 : i32, i32
  }
  func.func @transform_6(%arg0: i32) -> (i32, i32) {
    %c0_i32 = arith.constant 0 : i32
    %c0_i32_0 = arith.constant 0 : i32
    %c0_i32_1 = arith.constant 0 : i32
    return %c0_i32, %c0_i32_0 : i32, i32
  }
  func.func @transform_7(%arg0: i32) -> (i32, i32) {
    %c0_i32 = arith.constant 0 : i32
    %c0_i32_0 = arith.constant 0 : i32
    %c0_i32_1 = arith.constant 0 : i32
    return %c0_i32, %c0_i32_0 : i32, i32
  }
  func.func @transform_8(%arg0: i32) -> (i32, i32) {
    %c0_i32 = arith.constant 0 : i32
    %c0_i32_0 = arith.constant 0 : i32
    return %arg0, %c0_i32 : i32, i32
  }
}

module attributes {stable_mosaic.version = 11 : i64} {
  func.func @_symcon_kernel(%arg0: i32, %arg1: memref<8x128xf32, #tpu.memory_space<vmem>>, %arg2: memref<8x1xi32, #tpu.memory_space<vmem>>, %arg3: memref<8x2048xf32, #tpu.memory_space<vmem>>, %arg4: memref<8x512xf32, #tpu.memory_space<vmem>>, %arg5: memref<8x128xf32, #tpu.memory_space<vmem>>, %arg6: memref<8x6144xf32, #tpu.memory_space<vmem>>, %arg7: memref<8x1536xf32, #tpu.memory_space<vmem>>, %arg8: memref<8x384xf32, #tpu.memory_space<vmem>>, %arg9: memref<32x1536xf32, #tpu.memory_space<vmem>>, %arg10: memref<128x128xf32, #tpu.memory_space<vmem>>, %arg11: memref<8x128xf32, #tpu.memory_space<vmem>>) attributes {dimension_semantics = [#tpu.dimension_semantics<parallel>], iteration_bounds = array<i64: 2>, scalar_prefetch = 0 : i64, scratch_operands = 0 : i64, tpu.core_type = #tpu.core_type<tc>, window_params = [{transform_indices = @transform_0, window_bounds = array<i64: 8, 128>}, {transform_indices = @transform_1, window_bounds = array<i64: 8, 1>}, {pipeline_mode = #tpu.pipeline_mode<synchronous>, transform_indices = @transform_2, window_bounds = array<i64: 8, 2048>}, {pipeline_mode = #tpu.pipeline_mode<synchronous>, transform_indices = @transform_3, window_bounds = array<i64: 8, 512>}, {pipeline_mode = #tpu.pipeline_mode<synchronous>, transform_indices = @transform_4, window_bounds = array<i64: 8, 128>}, {pipeline_mode = #tpu.pipeline_mode<synchronous>, transform_indices = @transform_5, window_bounds = array<i64: 8, 6144>}, {pipeline_mode = #tpu.pipeline_mode<synchronous>, transform_indices = @transform_6, window_bounds = array<i64: 8, 1536>}, {pipeline_mode = #tpu.pipeline_mode<synchronous>, transform_indices = @transform_7, window_bounds = array<i64: 8, 384>}, {pipeline_mode = #tpu.pipeline_mode<synchronous>, transform_indices = @transform_8, window_bounds = array<i64: 32, 1536>}, {pipeline_mode = #tpu.pipeline_mode<synchronous>, transform_indices = @transform_9, window_bounds = array<i64: 128, 128>}, {transform_indices = @transform_10, window_bounds = array<i64: 8, 128>}]} {
    %c0 = arith.constant 0 : index
    %c0_0 = arith.constant 0 : index
    %0 = vector.load %arg1[%c0, %c0_0] : memref<8x128xf32, #tpu.memory_space<vmem>>, vector<8x128xf32>
    %c0_1 = arith.constant 0 : index
    %c0_2 = arith.constant 0 : index
    %1 = vector.load %arg2[%c0_1, %c0_2] : memref<8x1xi32, #tpu.memory_space<vmem>>, vector<8x1xi32>
    %2 = tpu.iota {dimensions = array<i32: 1>} : vector<8x8xi32>
    %3 = vector.broadcast %1 : vector<8x1xi32> to vector<8x8xi32>
    %4 = arith.cmpi eq, %3, %2 : vector<8x8xi32>
    %5 = arith.extui %4 : vector<8x8xi1> to vector<8x8xi32>
    %6 = arith.sitofp %5 : vector<8x8xi32> to vector<8x8xf32>
    %7 = vector.extract_strided_slice %0 {offsets = [0, 0], sizes = [8, 32], strides = [1, 1]} : vector<8x128xf32> to vector<8x32xf32>
    %c0_3 = arith.constant 0 : index
    %c0_4 = arith.constant 0 : index
    %8 = vector.load %arg9[%c0_3, %c0_4] : memref<32x1536xf32, #tpu.memory_space<vmem>>, vector<32x1536xf32>
    %cst = arith.constant dense<0.000000e+00> : vector<8x1536xf32>
    %9 = tpu.matmul %7, %8, %cst {dimension_numbers = #tpu.dot_dimension_numbers<[1], [0], [0], [1], [0, 0, 1, 1], [], []>} : vector<8x32xf32>, vector<32x1536xf32>, vector<8x1536xf32> -> vector<8x1536xf32>
    %10 = vector.extract_strided_slice %0 {offsets = [0, 32], sizes = [8, 32], strides = [1, 1]} : vector<8x128xf32> to vector<8x32xf32>
    %c0_5 = arith.constant 0 : index
    %c0_6 = arith.constant 0 : index
    %11 = vector.load %arg9[%c0_5, %c0_6] : memref<32x1536xf32, #tpu.memory_space<vmem>>, vector<32x1536xf32>
    %cst_7 = arith.constant dense<0.000000e+00> : vector<8x1536xf32>
    %12 = tpu.matmul %10, %11, %cst_7 {dimension_numbers = #tpu.dot_dimension_numbers<[1], [0], [0], [1], [0, 0, 1, 1], [], []>} : vector<8x32xf32>, vector<32x1536xf32>, vector<8x1536xf32> -> vector<8x1536xf32>
    %13 = vector.extract_strided_slice %0 {offsets = [0, 64], sizes = [8, 32], strides = [1, 1]} : vector<8x128xf32> to vector<8x32xf32>
    %c0_8 = arith.constant 0 : index
    %c0_9 = arith.constant 0 : index
    %14 = vector.load %arg9[%c0_8, %c0_9] : memref<32x1536xf32, #tpu.memory_space<vmem>>, vector<32x1536xf32>
    %cst_10 = arith.constant dense<0.000000e+00> : vector<8x1536xf32>
    %15 = tpu.matmul %13, %14, %cst_10 {dimension_numbers = #tpu.dot_dimension_numbers<[1], [0], [0], [1], [0, 0, 1, 1], [], []>} : vector<8x32xf32>, vector<32x1536xf32>, vector<8x1536xf32> -> vector<8x1536xf32>
    %16 = vector.extract_strided_slice %0 {offsets = [0, 96], sizes = [8, 32], strides = [1, 1]} : vector<8x128xf32> to vector<8x32xf32>
    %c0_11 = arith.constant 0 : index
    %c0_12 = arith.constant 0 : index
    %17 = vector.load %arg9[%c0_11, %c0_12] : memref<32x1536xf32, #tpu.memory_space<vmem>>, vector<32x1536xf32>
    %cst_13 = arith.constant dense<0.000000e+00> : vector<8x1536xf32>
    %18 = tpu.matmul %16, %17, %cst_13 {dimension_numbers = #tpu.dot_dimension_numbers<[1], [0], [0], [1], [0, 0, 1, 1], [], []>} : vector<8x32xf32>, vector<32x1536xf32>, vector<8x1536xf32> -> vector<8x1536xf32>
    %c0_14 = arith.constant 0 : index
    %c0_15 = arith.constant 0 : index
    %19 = vector.load %arg3[%c0_14, %c0_15] : memref<8x2048xf32, #tpu.memory_space<vmem>>, vector<8x2048xf32>
    %cst_16 = arith.constant dense<0.000000e+00> : vector<8x2048xf32>
    %20 = tpu.matmul %6, %19, %cst_16 {dimension_numbers = #tpu.dot_dimension_numbers<[1], [0], [0], [1], [0, 0, 1, 1], [], []>} : vector<8x8xf32>, vector<8x2048xf32>, vector<8x2048xf32> -> vector<8x2048xf32>
    %c0_17 = arith.constant 0 : index
    %c0_18 = arith.constant 0 : index
    %21 = vector.load %arg4[%c0_17, %c0_18] : memref<8x512xf32, #tpu.memory_space<vmem>>, vector<8x512xf32>
    %cst_19 = arith.constant dense<0.000000e+00> : vector<8x512xf32>
    %22 = tpu.matmul %6, %21, %cst_19 {dimension_numbers = #tpu.dot_dimension_numbers<[1], [0], [0], [1], [0, 0, 1, 1], [], []>} : vector<8x8xf32>, vector<8x512xf32>, vector<8x512xf32> -> vector<8x512xf32>
    %c0_20 = arith.constant 0 : index
    %c0_21 = arith.constant 0 : index
    %23 = vector.load %arg5[%c0_20, %c0_21] : memref<8x128xf32, #tpu.memory_space<vmem>>, vector<8x128xf32>
    %cst_22 = arith.constant dense<0.000000e+00> : vector<8x128xf32>
    %24 = tpu.matmul %6, %23, %cst_22 {dimension_numbers = #tpu.dot_dimension_numbers<[1], [0], [0], [1], [0, 0, 1, 1], [], []>} : vector<8x8xf32>, vector<8x128xf32>, vector<8x128xf32> -> vector<8x128xf32>
    %25 = vector.extract_strided_slice %9 {offsets = [0, 0], sizes = [8, 512], strides = [1, 1]} : vector<8x1536xf32> to vector<8x512xf32>
    %26 = vector.extract_strided_slice %20 {offsets = [0, 0], sizes = [8, 512], strides = [1, 1]} : vector<8x2048xf32> to vector<8x512xf32>
    %27 = arith.mulf %25, %26 : vector<8x512xf32>
    %28 = vector.extract_strided_slice %12 {offsets = [0, 0], sizes = [8, 512], strides = [1, 1]} : vector<8x1536xf32> to vector<8x512xf32>
    %29 = vector.extract_strided_slice %20 {offsets = [0, 512], sizes = [8, 512], strides = [1, 1]} : vector<8x2048xf32> to vector<8x512xf32>
    %30 = arith.mulf %28, %29 : vector<8x512xf32>
    %31 = arith.addf %27, %30 : vector<8x512xf32>
    %32 = vector.extract_strided_slice %15 {offsets = [0, 0], sizes = [8, 512], strides = [1, 1]} : vector<8x1536xf32> to vector<8x512xf32>
    %33 = vector.extract_strided_slice %20 {offsets = [0, 1024], sizes = [8, 512], strides = [1, 1]} : vector<8x2048xf32> to vector<8x512xf32>
    %34 = arith.mulf %32, %33 : vector<8x512xf32>
    %35 = arith.addf %31, %34 : vector<8x512xf32>
    %36 = vector.extract_strided_slice %18 {offsets = [0, 0], sizes = [8, 512], strides = [1, 1]} : vector<8x1536xf32> to vector<8x512xf32>
    %37 = vector.extract_strided_slice %20 {offsets = [0, 1536], sizes = [8, 512], strides = [1, 1]} : vector<8x2048xf32> to vector<8x512xf32>
    %38 = arith.mulf %36, %37 : vector<8x512xf32>
    %39 = arith.addf %35, %38 : vector<8x512xf32>
    %40 = arith.addf %39, %22 : vector<8x512xf32>
    %41 = vector.extract_strided_slice %9 {offsets = [0, 0], sizes = [8, 128], strides = [1, 1]} : vector<8x1536xf32> to vector<8x128xf32>
    %42 = vector.extract_strided_slice %40 {offsets = [0, 0], sizes = [8, 128], strides = [1, 1]} : vector<8x512xf32> to vector<8x128xf32>
    %43 = arith.mulf %41, %42 : vector<8x128xf32>
    %44 = vector.extract_strided_slice %12 {offsets = [0, 0], sizes = [8, 128], strides = [1, 1]} : vector<8x1536xf32> to vector<8x128xf32>
    %45 = vector.extract_strided_slice %40 {offsets = [0, 128], sizes = [8, 128], strides = [1, 1]} : vector<8x512xf32> to vector<8x128xf32>
    %46 = arith.mulf %44, %45 : vector<8x128xf32>
    %47 = arith.addf %43, %46 : vector<8x128xf32>
    %48 = vector.extract_strided_slice %15 {offsets = [0, 0], sizes = [8, 128], strides = [1, 1]} : vector<8x1536xf32> to vector<8x128xf32>
    %49 = vector.extract_strided_slice %40 {offsets = [0, 256], sizes = [8, 128], strides = [1, 1]} : vector<8x512xf32> to vector<8x128xf32>
    %50 = arith.mulf %48, %49 : vector<8x128xf32>
    %51 = arith.addf %47, %50 : vector<8x128xf32>
    %52 = vector.extract_strided_slice %18 {offsets = [0, 0], sizes = [8, 128], strides = [1, 1]} : vector<8x1536xf32> to vector<8x128xf32>
    %53 = vector.extract_strided_slice %40 {offsets = [0, 384], sizes = [8, 128], strides = [1, 1]} : vector<8x512xf32> to vector<8x128xf32>
    %54 = arith.mulf %52, %53 : vector<8x128xf32>
    %55 = arith.addf %51, %54 : vector<8x128xf32>
    %56 = arith.addf %55, %24 : vector<8x128xf32>
    %57 = vector.extract_strided_slice %9 {offsets = [0, 0], sizes = [8, 32], strides = [1, 1]} : vector<8x1536xf32> to vector<8x32xf32>
    %58 = vector.extract_strided_slice %56 {offsets = [0, 0], sizes = [8, 32], strides = [1, 1]} : vector<8x128xf32> to vector<8x32xf32>
    %59 = arith.mulf %57, %58 : vector<8x32xf32>
    %60 = vector.extract_strided_slice %12 {offsets = [0, 0], sizes = [8, 32], strides = [1, 1]} : vector<8x1536xf32> to vector<8x32xf32>
    %61 = vector.extract_strided_slice %56 {offsets = [0, 32], sizes = [8, 32], strides = [1, 1]} : vector<8x128xf32> to vector<8x32xf32>
    %62 = arith.mulf %60, %61 : vector<8x32xf32>
    %63 = arith.addf %59, %62 : vector<8x32xf32>
    %64 = vector.extract_strided_slice %15 {offsets = [0, 0], sizes = [8, 32], strides = [1, 1]} : vector<8x1536xf32> to vector<8x32xf32>
    %65 = vector.extract_strided_slice %56 {offsets = [0, 64], sizes = [8, 32], strides = [1, 1]} : vector<8x128xf32> to vector<8x32xf32>
    %66 = arith.mulf %64, %65 : vector<8x32xf32>
    %67 = arith.addf %63, %66 : vector<8x32xf32>
    %68 = vector.extract_strided_slice %18 {offsets = [0, 0], sizes = [8, 32], strides = [1, 1]} : vector<8x1536xf32> to vector<8x32xf32>
    %69 = vector.extract_strided_slice %56 {offsets = [0, 96], sizes = [8, 32], strides = [1, 1]} : vector<8x128xf32> to vector<8x32xf32>
    %70 = arith.mulf %68, %69 : vector<8x32xf32>
    %71 = arith.addf %67, %70 : vector<8x32xf32>
    %c0_23 = arith.constant 0 : index
    %c0_24 = arith.constant 0 : index
    %72 = vector.load %arg6[%c0_23, %c0_24] : memref<8x6144xf32, #tpu.memory_space<vmem>>, vector<8x6144xf32>
    %cst_25 = arith.constant dense<0.000000e+00> : vector<8x6144xf32>
    %73 = tpu.matmul %6, %72, %cst_25 {dimension_numbers = #tpu.dot_dimension_numbers<[1], [0], [0], [1], [0, 0, 1, 1], [], []>} : vector<8x8xf32>, vector<8x6144xf32>, vector<8x6144xf32> -> vector<8x6144xf32>
    %c0_26 = arith.constant 0 : index
    %c0_27 = arith.constant 0 : index
    %74 = vector.load %arg7[%c0_26, %c0_27] : memref<8x1536xf32, #tpu.memory_space<vmem>>, vector<8x1536xf32>
    %cst_28 = arith.constant dense<0.000000e+00> : vector<8x1536xf32>
    %75 = tpu.matmul %6, %74, %cst_28 {dimension_numbers = #tpu.dot_dimension_numbers<[1], [0], [0], [1], [0, 0, 1, 1], [], []>} : vector<8x8xf32>, vector<8x1536xf32>, vector<8x1536xf32> -> vector<8x1536xf32>
    %c0_29 = arith.constant 0 : index
    %c0_30 = arith.constant 0 : index
    %76 = vector.load %arg8[%c0_29, %c0_30] : memref<8x384xf32, #tpu.memory_space<vmem>>, vector<8x384xf32>
    %cst_31 = arith.constant dense<0.000000e+00> : vector<8x384xf32>
    %77 = tpu.matmul %6, %76, %cst_31 {dimension_numbers = #tpu.dot_dimension_numbers<[1], [0], [0], [1], [0, 0, 1, 1], [], []>} : vector<8x8xf32>, vector<8x384xf32>, vector<8x384xf32> -> vector<8x384xf32>
    %78 = vector.extract_strided_slice %73 {offsets = [0, 0], sizes = [8, 1536], strides = [1, 1]} : vector<8x6144xf32> to vector<8x1536xf32>
    %79 = arith.mulf %9, %78 : vector<8x1536xf32>
    %80 = vector.extract_strided_slice %73 {offsets = [0, 1536], sizes = [8, 1536], strides = [1, 1]} : vector<8x6144xf32> to vector<8x1536xf32>
    %81 = arith.mulf %12, %80 : vector<8x1536xf32>
    %82 = arith.addf %79, %81 : vector<8x1536xf32>
    %83 = vector.extract_strided_slice %73 {offsets = [0, 3072], sizes = [8, 1536], strides = [1, 1]} : vector<8x6144xf32> to vector<8x1536xf32>
    %84 = arith.mulf %15, %83 : vector<8x1536xf32>
    %85 = arith.addf %82, %84 : vector<8x1536xf32>
    %86 = vector.extract_strided_slice %73 {offsets = [0, 4608], sizes = [8, 1536], strides = [1, 1]} : vector<8x6144xf32> to vector<8x1536xf32>
    %87 = arith.mulf %18, %86 : vector<8x1536xf32>
    %88 = arith.addf %85, %87 : vector<8x1536xf32>
    %89 = arith.addf %88, %75 : vector<8x1536xf32>
    %90 = vector.extract_strided_slice %9 {offsets = [0, 0], sizes = [8, 384], strides = [1, 1]} : vector<8x1536xf32> to vector<8x384xf32>
    %91 = vector.extract_strided_slice %89 {offsets = [0, 0], sizes = [8, 384], strides = [1, 1]} : vector<8x1536xf32> to vector<8x384xf32>
    %92 = arith.mulf %90, %91 : vector<8x384xf32>
    %93 = vector.extract_strided_slice %12 {offsets = [0, 0], sizes = [8, 384], strides = [1, 1]} : vector<8x1536xf32> to vector<8x384xf32>
    %94 = vector.extract_strided_slice %89 {offsets = [0, 384], sizes = [8, 384], strides = [1, 1]} : vector<8x1536xf32> to vector<8x384xf32>
    %95 = arith.mulf %93, %94 : vector<8x384xf32>
    %96 = arith.addf %92, %95 : vector<8x384xf32>
    %97 = vector.extract_strided_slice %15 {offsets = [0, 0], sizes = [8, 384], strides = [1, 1]} : vector<8x1536xf32> to vector<8x384xf32>
    %98 = vector.extract_strided_slice %89 {offsets = [0, 768], sizes = [8, 384], strides = [1, 1]} : vector<8x1536xf32> to vector<8x384xf32>
    %99 = arith.mulf %97, %98 : vector<8x384xf32>
    %100 = arith.addf %96, %99 : vector<8x384xf32>
    %101 = vector.extract_strided_slice %18 {offsets = [0, 0], sizes = [8, 384], strides = [1, 1]} : vector<8x1536xf32> to vector<8x384xf32>
    %102 = vector.extract_strided_slice %89 {offsets = [0, 1152], sizes = [8, 384], strides = [1, 1]} : vector<8x1536xf32> to vector<8x384xf32>
    %103 = arith.mulf %101, %102 : vector<8x384xf32>
    %104 = arith.addf %100, %103 : vector<8x384xf32>
    %105 = arith.addf %104, %77 : vector<8x384xf32>
    %106 = vector.extract_strided_slice %9 {offsets = [0, 0], sizes = [8, 96], strides = [1, 1]} : vector<8x1536xf32> to vector<8x96xf32>
    %107 = vector.extract_strided_slice %105 {offsets = [0, 0], sizes = [8, 96], strides = [1, 1]} : vector<8x384xf32> to vector<8x96xf32>
    %108 = arith.mulf %106, %107 : vector<8x96xf32>
    %109 = vector.extract_strided_slice %12 {offsets = [0, 0], sizes = [8, 96], strides = [1, 1]} : vector<8x1536xf32> to vector<8x96xf32>
    %110 = vector.extract_strided_slice %105 {offsets = [0, 96], sizes = [8, 96], strides = [1, 1]} : vector<8x384xf32> to vector<8x96xf32>
    %111 = arith.mulf %109, %110 : vector<8x96xf32>
    %112 = arith.addf %108, %111 : vector<8x96xf32>
    %113 = vector.extract_strided_slice %15 {offsets = [0, 0], sizes = [8, 96], strides = [1, 1]} : vector<8x1536xf32> to vector<8x96xf32>
    %114 = vector.extract_strided_slice %105 {offsets = [0, 192], sizes = [8, 96], strides = [1, 1]} : vector<8x384xf32> to vector<8x96xf32>
    %115 = arith.mulf %113, %114 : vector<8x96xf32>
    %116 = arith.addf %112, %115 : vector<8x96xf32>
    %117 = vector.extract_strided_slice %18 {offsets = [0, 0], sizes = [8, 96], strides = [1, 1]} : vector<8x1536xf32> to vector<8x96xf32>
    %118 = vector.extract_strided_slice %105 {offsets = [0, 288], sizes = [8, 96], strides = [1, 1]} : vector<8x384xf32> to vector<8x96xf32>
    %119 = arith.mulf %117, %118 : vector<8x96xf32>
    %120 = arith.addf %116, %119 : vector<8x96xf32>
    %121 = tpu.concatenate %71, %120 in 1 : vector<8x32xf32>, vector<8x96xf32> -> vector<8x128xf32>
    %c0_32 = arith.constant 0 : index
    %c0_33 = arith.constant 0 : index
    %122 = vector.load %arg10[%c0_32, %c0_33] : memref<128x128xf32, #tpu.memory_space<vmem>>, vector<128x128xf32>
    %cst_34 = arith.constant dense<0.000000e+00> : vector<8x128xf32>
    %123 = tpu.matmul %121, %122, %cst_34 {dimension_numbers = #tpu.dot_dimension_numbers<[1], [0], [0], [1], [0, 0, 1, 1], [], []>} : vector<8x128xf32>, vector<128x128xf32>, vector<8x128xf32> -> vector<8x128xf32>
    %c0_35 = arith.constant 0 : index
    %c0_36 = arith.constant 0 : index
    %124 = vector.load %arg11[%c0_35, %c0_36] : memref<8x128xf32, #tpu.memory_space<vmem>>, vector<8x128xf32>
    tpu.vector_store %arg11[%c0_35, %c0_36], %123 {strides = array<i32>} : memref<8x128xf32, #tpu.memory_space<vmem>>, vector<8x128xf32>,
    return
  }
  func.func @transform_0(%arg0: i32) -> (i32, i32) {
    %c0_i32 = arith.constant 0 : i32
    %c0_i32_0 = arith.constant 0 : i32
    return %arg0, %c0_i32 : i32, i32
  }
  func.func @transform_1(%arg0: i32) -> (i32, i32) {
    %c0_i32 = arith.constant 0 : i32
    %c0_i32_0 = arith.constant 0 : i32
    return %arg0, %c0_i32 : i32, i32
  }
  func.func @transform_2(%arg0: i32) -> (i32, i32) {
    %c0_i32 = arith.constant 0 : i32
    %c0_i32_0 = arith.constant 0 : i32
    %c0_i32_1 = arith.constant 0 : i32
    return %c0_i32, %c0_i32_0 : i32, i32
  }
  func.func @transform_3(%arg0: i32) -> (i32, i32) {
    %c0_i32 = arith.constant 0 : i32
    %c0_i32_0 = arith.constant 0 : i32
    %c0_i32_1 = arith.constant 0 : i32
    return %c0_i32, %c0_i32_0 : i32, i32
  }
  func.func @transform_4(%arg0: i32) -> (i32, i32) {
    %c0_i32 = arith.constant 0 : i32
    %c0_i32_0 = arith.constant 0 : i32
    %c0_i32_1 = arith.constant 0 : i32
    return %c0_i32, %c0_i32_0 : i32, i32
  }
  func.func @transform_5(%arg0: i32) -> (i32, i32) {
    %c0_i32 = arith.constant 0 : i32
    %c0_i32_0 = arith.constant 0 : i32
    %c0_i32_1 = arith.constant 0 : i32
    return %c0_i32, %c0_i32_0 : i32, i32
  }
  func.func @transform_6(%arg0: i32) -> (i32, i32) {
    %c0_i32 = arith.constant 0 : i32
    %c0_i32_0 = arith.constant 0 : i32
    %c0_i32_1 = arith.constant 0 : i32
    return %c0_i32, %c0_i32_0 : i32, i32
  }
  func.func @transform_7(%arg0: i32) -> (i32, i32) {
    %c0_i32 = arith.constant 0 : i32
    %c0_i32_0 = arith.constant 0 : i32
    %c0_i32_1 = arith.constant 0 : i32
    return %c0_i32, %c0_i32_0 : i32, i32
  }
  func.func @transform_8(%arg0: i32) -> (i32, i32) {
    %c0_i32 = arith.constant 0 : i32
    %c0_i32_0 = arith.constant 0 : i32
    %c0_i32_1 = arith.constant 0 : i32
    return %c0_i32, %c0_i32_0 : i32, i32
  }
  func.func @transform_9(%arg0: i32) -> (i32, i32) {
    %c0_i32 = arith.constant 0 : i32
    %c0_i32_0 = arith.constant 0 : i32
    %c0_i32_1 = arith.constant 0 : i32
    return %c0_i32, %c0_i32_0 : i32, i32
  }
  func.func @transform_10(%arg0: i32) -> (i32, i32) {
    %c0_i32 = arith.constant 0 : i32
    %c0_i32_0 = arith.constant 0 : i32
    return %arg0, %c0_i32 : i32, i32
  }
}

</mosaic_0001>

<bundles_post_ra>
// kernel: interaction_block_forward.4
= control target key start
LH: loop header
LB: loop body
LE: loop exit
PB: predicated region body
PF: predicated region fallthrough
CT: control target
= control target key end

     0   :  { %s270_s1 = inlined_call_operand.vmem [shape: f32[128,128], index: 1, kind: input, shape index: {}]   ;;  %s271_s0 = inlined_call_operand.vmem [shape: f32[16,128], index: 0, kind: input, shape index: {}]   ;;  %s272_s2 = inlined_call_operand.vmem [shape: f32[16,128], index: 2, kind: output, shape index: {}]  }
   0x1   :  { %v13_v0 = vld [vmem:[%s270_s1] sm:$0xff]  ;;  %v14_v1 = vld [vmem:[%s270_s1 + $0x8] sm:$0xff]  ;;  %v15_v2 = vld [vmem:[%s270_s1 + $0x10] sm:$0xff] }
   0x2   :  { %v163_v3 = vpack.c.bf16 %v14_v1, %v13_v0  ;;  %v16_v4 = vld [vmem:[%s270_s1 + $0x18] sm:$0xff]  ;;  %v17_v6 = vld [vmem:[%s270_s1 + $0x20] sm:$0xff]  ;;  %v18_v7 = vld [vmem:[%s270_s1 + $0x28] sm:$0xff] }
   0x3   :  { %v167_v5 = vpack.c.bf16 %v16_v4, %v15_v2  ;;  %v171_v8 = vpack.c.bf16 %v18_v7, %v17_v6  ;;  %v11_v9 = vld [vmem:[%s271_s0] sm:$0xff]  ;;  %v19_v10 = vld [vmem:[%s270_s1 + $0x30] sm:$0xff]  ;;  %v20_v11 = vld [vmem:[%s270_s1 + $0x38] sm:$0xff] }
   0x4   :  { %164 = vmatprep.subr.bf16.mxu0 %v163_v3  ;;  %160 = vmatprep.mubr.f32.mxu0 %v11_v9  ;;  %v175_v12 = vpack.c.bf16 %v20_v11, %v19_v10  ;;  %v21_v13 = vld [vmem:[%s270_s1 + $0x40] sm:$0xff]  ;;  %v22_v14 = vld [vmem:[%s270_s1 + $0x48] sm:$0xff]  ;;  %v23_v16 = vld [vmem:[%s270_s1 + $0x50] sm:$0xff] }
   0x5   :  { %166 = vmatpush3.bf16.msra.mxu0 %v163_v3  ;;  %v179_v15 = vpack.c.bf16 %v22_v14, %v21_v13  ;;  %v24_v17 = vld [vmem:[%s270_s1 + $0x58] sm:$0xff]  ;;  %v25_v19 = vld [vmem:[%s270_s1 + $0x60] sm:$0xff]  ;;  %v26_v20 = vld [vmem:[%s270_s1 + $0x68] sm:$0xff] }
   0x6   :  { %168 = vmatprep.subr.bf16.mxu0 %v167_v5  ;;  %v183_v18 = vpack.c.bf16 %v24_v17, %v23_v16  ;;  %v187_v21 = vpack.c.bf16 %v26_v20, %v25_v19  ;;  %v27_v22 = vld [vmem:[%s270_s1 + $0x70] sm:$0xff]  ;;  %v28_v23 = vld [vmem:[%s270_s1 + $0x78] sm:$0xff]  ;;  %v12_v25 = vld [vmem:[%s271_s0 + $0x8] sm:$0xff] }
   0x7   :  { %v191_v24 = vpack.c.bf16 %v28_v23, %v27_v22 }
   0x9   :  { %170 = vmatpush3.bf16.msra.mxu0 %v167_v5 }
   0xa   :  { %172 = vmatprep.subr.bf16.mxu0 %v171_v8 }
   0xd   :  { %174 = vmatpush3.bf16.msra.mxu0 %v171_v8 }
   0xe   :  { %176 = vmatprep.subr.bf16.mxu0 %v175_v12 }
  0x11   :  { %178 = vmatpush3.bf16.msra.mxu0 %v175_v12 }
  0x12   :  { %180 = vmatprep.subr.bf16.mxu0 %v179_v15 }
  0x15   :  { %182 = vmatpush3.bf16.msra.mxu0 %v179_v15 }
  0x16   :  { %184 = vmatprep.subr.bf16.mxu0 %v183_v18 }
  0x19   :  { %186 = vmatpush3.bf16.msra.mxu0 %v183_v18 }
  0x1a   :  { %188 = vmatprep.subr.bf16.mxu0 %v187_v21 }
  0x1d   :  { %190 = vmatpush3.bf16.msra.mxu0 %v187_v21 }
  0x1e   :  { %192 = vmatprep.subr.bf16.mxu0 %v191_v24 }
  0x21   :  { %194 = vmatpush3.bf16.msra.mxu0 %v191_v24 }
  0x24   :  { %161 = vmatmul.mubr.f32.vlgmr.msra.gmra.mrb[0].mxu0 %v12_v25 }
  0xf7   :  { %v162_v26 = vpop.f32.mrb[0].mxu0 }
  0xf8   :  { %105 = vst [vmem:[%s272_s2 + $0x8] sm:$0xff] %v162_v26  ;;  %v95_v27 = vpop.f32.mrb[1].mxu0 }
  0xf9   :  { %104 = vst [vmem:[%s272_s2] sm:$0xff] %v95_v27 }

// kernel: interaction_block_forward.6
= control target key start
LH: loop header
LB: loop body
LE: loop exit
PB: predicated region body
PF: predicated region fallthrough
CT: control target
= control target key end

     0   :  { %v26_v0 = vlaneseq  ;;  %v626_v4 = vmov 0.0   ;;  %vm61_vm1 = vcmask 261120   ;;  %vm20_vm3 = vcmask 785408   ;;  %s841_s1 = inlined_call_operand.vmem [shape: f32[32,352], index: 1, kind: input, shape index: {}]   ;;  %s842_s0 = inlined_call_operand.vmem [shape: s32[1,32], index: 0, kind: input, shape index: {}]   ;;  %s843_s2 = inlined_call_operand.vmem [shape: f32[352,128], index: 2, kind: input, shape index: {}]   ;;  %s844_s3 = inlined_call_operand.vmem [shape: f32[16,128], index: 3, kind: output, shape index: {}]  }
   0x1   :  { %v50_v1 = vld [vmem:[%s841_s1 + $0x8] sm:$0xff]  ;;  %v53_v2 = vld [vmem:[%s841_s1 + $0x20] sm:$0xff]  ;;  %132 = vmatprep.mubr.f32.mxu1 %v626_v4  ;;  %v52_v6 = vld [vmem:[%s841_s1 + $0x18] sm:$0xff]  ;;  %24 = vst.msk [vmem:[#allocation2 + $0x28] sm:$0xff] %vm20_vm3, %v626_v4 }
   0x2   :  { %v49_v3 = vld [vmem:[%s841_s1] sm:$0xff]  ;;  %v553_v5 = vpack.c.bf16 %v53_v2, %v50_v1  ;;  %v56_v7 = vld [vmem:[%s841_s1 + $0x38] sm:$0xff]  ;;  %v59_v8 = vld [vmem:[%s841_s1 + $0x50] sm:$0xff]  ;;  %v27_v9 = vshrl.u32 %v26_v0, 7  ;;  %21 = vst.msk [vmem:[#allocation2 + $0x10] sm:$0xff] %vm20_vm3, %v626_v4 }
   0x3   :  { %v555_v10 = vpack.c.bf16 %v52_v6, %v49_v3  ;;  %v557_v11 = vpack.c.bf16 %v59_v8, %v56_v7  ;;  %v55_v12 = vld [vmem:[%s841_s1 + $0x30] sm:$0xff]  ;;  %v58_v13 = vld [vmem:[%s841_s1 + $0x48] sm:$0xff]  ;;  %v448_v14 = vld [vmem:[%s842_s0] ss:$0 sm:$0xff] }
   0x4   :  { %554 = vmatprep.subr.bf16.mxu1 %v553_v5  ;;  %v51_v15 = vld [vmem:[%s841_s1 + $0x10] sm:$0xff]  ;;  %v54_v16 = vld [vmem:[%s841_s1 + $0x28] sm:$0xff]  ;;  %v559_v17 = vpack.c.bf16 %v58_v13, %v55_v12  ;;  %v57_v18 = vld [vmem:[%s841_s1 + $0x40] sm:$0xff]  ;;  %vm37_vm0 = vcmp.eq.s32.totalorder %v27_v9, %v448_v14  ;;  %v28_v23 = vadd.s32 8, %v27_v9 }
   0x5   :  { %556 = vmatpush1.bf16.msra.mxu1 %v555_v10  ;;  %v60_v19 = vld [vmem:[%s841_s1 + $0x58] sm:$0xff]  ;;  %v258_v20 = vld [vmem:[%s843_s2 + $0x80] sm:$0xff]  ;;  %v259_v21 = vld [vmem:[%s843_s2 + $0x88] sm:$0xff]  ;;  %v561_v22 = vpack.c.bf16 %v54_v16, %v51_v15  ;;  %v449_v35 = vsel %vm37_vm0, 1.0, %v626_v4 }
   0x6   :  { %558 = vmatprep.subr.bf16.mxu1 %v557_v11  ;;  %v569_v24 = vpack.c.bf16 %v259_v21, %v258_v20  ;;  %v242_v25 = vld [vmem:[%s843_s2] sm:$0xff]  ;;  %v243_v26 = vld [vmem:[%s843_s2 + $0x8] sm:$0xff]  ;;  %v260_v27 = vld [vmem:[%s843_s2 + $0x90] sm:$0xff]  ;;  %vm38_vm2 = vcmp.eq.s32.totalorder %v28_v23, %v448_v14  ;;  %v565_v36 = vpack.c.bf16 %v60_v19, %v57_v18 }
   0x7   :  { %v571_v28 = vpack.c.bf16 %v243_v26, %v242_v25  ;;  %v261_v29 = vld [vmem:[%s843_s2 + $0x98] sm:$0xff]  ;;  %v244_v30 = vld [vmem:[%s843_s2 + $0x10] sm:$0xff]  ;;  %v262_v33 = vld [vmem:[%s843_s2 + $0xa0] sm:$0xff]  ;;  %v450_v45 = vsel %vm38_vm2, 1.0, %v626_v4 }
   0x8   :  { %v245_v31 = vld [vmem:[%s843_s2 + $0x18] sm:$0xff]  ;;  %570 = vmatprep.subr.bf16.mxu0 %v569_v24  ;;  %v573_v32 = vpack.c.bf16 %v261_v29, %v260_v27  ;;  %v263_v34 = vld [vmem:[%s843_s2 + $0xa8] sm:$0xff]  ;;  %v246_v38 = vld [vmem:[%s843_s2 + $0x20] sm:$0xff] }
   0x9   :  { %560 = vmatpush1.bf16.msra.mxu1 %v559_v17  ;;  %572 = vmatpush3.bf16.msra.mxu0 %v571_v28  ;;  %v575_v37 = vpack.c.bf16 %v245_v31, %v244_v30  ;;  %v577_v39 = vpack.c.bf16 %v263_v34, %v262_v33  ;;  %v247_v40 = vld [vmem:[%s843_s2 + $0x28] sm:$0xff]  ;;  %v274_v41 = vld [vmem:[%s843_s2 + $0x100] sm:$0xff]  ;;  %v264_v43 = vld [vmem:[%s843_s2 + $0xb0] sm:$0xff] }
   0xa   :  { %562 = vmatprep.subr.bf16.mxu1 %v561_v22  ;;  %574 = vmatprep.subr.bf16.mxu0 %v573_v32  ;;  %v275_v42 = vld [vmem:[%s843_s2 + $0x108] sm:$0xff]  ;;  %v265_v44 = vld [vmem:[%s843_s2 + $0xb8] sm:$0xff]  ;;  %v579_v46 = vpack.c.bf16 %v247_v40, %v246_v38  ;;  %v248_v49 = vld [vmem:[%s843_s2 + $0x30] sm:$0xff] }
   0xb   :  { %v601_v47 = vpack.c.bf16 %v275_v42, %v274_v41  ;;  %v581_v48 = vpack.c.bf16 %v265_v44, %v264_v43  ;;  %v249_v50 = vld [vmem:[%s843_s2 + $0x38] sm:$0xff]  ;;  %v266_v51 = vld [vmem:[%s843_s2 + $0xc0] sm:$0xff]  ;;  %v267_v52 = vld [vmem:[%s843_s2 + $0xc8] sm:$0xff] }
   0xc   :  { %451 = vmatmul.mubr.msk.f32.vlgmr.msra.gmra.mrb[0].mxu1 %vm61_vm1, %v449_v35  ;;  %v583_v53 = vpack.c.bf16 %v249_v50, %v248_v49  ;;  %v585_v54 = vpack.c.bf16 %v267_v52, %v266_v51  ;;  %v250_v55 = vld [vmem:[%s843_s2 + $0x40] sm:$0xff]  ;;  %v251_v56 = vld [vmem:[%s843_s2 + $0x48] sm:$0xff]  ;;  %v268_v58 = vld [vmem:[%s843_s2 + $0xd0] sm:$0xff] }
   0xd   :  { %564 = vmatpush3.bf16.msra.mxu1 %v561_v22  ;;  %138 = vmatprep.mubr.f32.mxu1 %v626_v4  ;;  %v587_v57 = vpack.c.bf16 %v251_v56, %v250_v55  ;;  %v269_v59 = vld [vmem:[%s843_s2 + $0xd8] sm:$0xff]  ;;  %v252_v61 = vld [vmem:[%s843_s2 + $0x50] sm:$0xff]  ;;  %v270_v0 = vld [vmem:[%s843_s2 + $0xe0] sm:$0xff] }
   0xe   :  { %566 = vmatprep.subr.bf16.mxu1 %v565_v36  ;;  %576 = vmatpush3.bf16.msra.mxu0 %v575_v37  ;;  %v589_v60 = vpack.c.bf16 %v269_v59, %v268_v58  ;;  %v253_v62 = vld [vmem:[%s843_s2 + $0x58] sm:$0xff]  ;;  %v271_v1 = vld [vmem:[%s843_s2 + $0xe8] sm:$0xff]  ;;  %v254_v3 = vld [vmem:[%s843_s2 + $0x60] sm:$0xff] }
   0xf   :  { %578 = vmatprep.subr.bf16.mxu0 %v577_v39  ;;  %v591_v63 = vpack.c.bf16 %v253_v62, %v252_v61  ;;  %v593_v2 = vpack.c.bf16 %v271_v1, %v270_v0  ;;  %v255_v5 = vld [vmem:[%s843_s2 + $0x68] sm:$0xff]  ;;  %v276_v7 = vld [vmem:[%s843_s2 + $0x110] sm:$0xff]  ;;  %v277_v8 = vld [vmem:[%s843_s2 + $0x118] sm:$0xff] }
  0x10   :  { %452 = vmatmul.mubr.msk.f32.gmra.mrb[2].mxu1 %vm61_vm1, %v450_v45  ;;  %v595_v6 = vpack.c.bf16 %v255_v5, %v254_v3  ;;  %v272_v9 = vld [vmem:[%s843_s2 + $0xf0] sm:$0xff]  ;;  %v605_v10 = vpack.c.bf16 %v277_v8, %v276_v7  ;;  %v273_v11 = vld [vmem:[%s843_s2 + $0xf8] sm:$0xff]  ;;  %v278_v16 = vld [vmem:[%s843_s2 + $0x120] sm:$0xff] }
  0x11   :  { %568 = vmatpush3.bf16.msra.mxu1 %v565_v36  ;;  %523 = vmatprep.mubr.msk.f32.mxu1 %vm61_vm1, %v449_v35  ;;  %v256_v12 = vld [vmem:[%s843_s2 + $0x70] sm:$0xff]  ;;  %v257_v13 = vld [vmem:[%s843_s2 + $0x78] sm:$0xff]  ;;  %v597_v14 = vpack.c.bf16 %v273_v11, %v272_v9  ;;  %v279_v17 = vld [vmem:[%s843_s2 + $0x128] sm:$0xff] }
  0x12   :  { %580 = vmatpush3.bf16.msra.mxu0 %v579_v46  ;;  %602 = vmatprep.subr.bf16.mxu1 %v601_v47  ;;  %v599_v15 = vpack.c.bf16 %v257_v13, %v256_v12  ;;  %v609_v18 = vpack.c.bf16 %v279_v17, %v278_v16  ;;  %v280_v19 = vld [vmem:[%s843_s2 + $0x130] sm:$0xff]  ;;  %v281_v4 = vld [vmem:[%s843_s2 + $0x138] sm:$0xff]  ;;  %v282_v21 = vld [vmem:[%s843_s2 + $0x140] sm:$0xff] }
  0x13   :  { %582 = vmatprep.subr.bf16.mxu0 %v581_v48  ;;  %v613_v20 = vpack.c.bf16 %v281_v4, %v280_v19  ;;  %v283_v22 = vld [vmem:[%s843_s2 + $0x148] sm:$0xff]  ;;  %v284_v24 = vld [vmem:[%s843_s2 + $0x150] sm:$0xff]  ;;  %v285_v25 = vld [vmem:[%s843_s2 + $0x158] sm:$0xff] }
  0x14   :  { %524 = vmatmul.mubr.msk.f32.vlgmr.msra.gmra.mrb[4].mxu1 %vm61_vm1, %v450_v45  ;;  %v617_v23 = vpack.c.bf16 %v283_v22, %v282_v21  ;;  %v621_v26 = vpack.c.bf16 %v285_v25, %v284_v24  ;;  %v48_v31 = vld [vmem:[#allocation2 + $0x28] sm:$0xff]  ;;  %v45_v32 = vld [vmem:[#allocation2 + $0x10] sm:$0xff] }
  0x15   :  { %604 = vmatpush3.bf16.msra.mxu1 %v601_v47 }
  0x16   :  { %584 = vmatpush3.bf16.msra.mxu0 %v583_v53  ;;  %606 = vmatprep.subr.bf16.mxu1 %v605_v10 }
  0x17   :  { %586 = vmatprep.subr.bf16.mxu0 %v585_v54 }
  0x19   :  { %608 = vmatpush3.bf16.msra.mxu1 %v605_v10 }
  0x1a   :  { %588 = vmatpush3.bf16.msra.mxu0 %v587_v57  ;;  %610 = vmatprep.subr.bf16.mxu1 %v609_v18 }
  0x1b   :  { %590 = vmatprep.subr.bf16.mxu0 %v589_v60 }
  0x1d   :  { %612 = vmatpush3.bf16.msra.mxu1 %v609_v18 }
  0x1e   :  { %592 = vmatpush3.bf16.msra.mxu0 %v591_v63  ;;  %614 = vmatprep.subr.bf16.mxu1 %v613_v20 }
  0x1f   :  { %594 = vmatprep.subr.bf16.mxu0 %v593_v2 }
  0x21   :  { %616 = vmatpush3.bf16.msra.mxu1 %v613_v20 }
  0x22   :  { %596 = vmatpush3.bf16.msra.mxu0 %v595_v6  ;;  %618 = vmatprep.subr.bf16.mxu1 %v617_v23 }
  0x23   :  { %598 = vmatprep.subr.bf16.mxu0 %v597_v14 }
  0x25   :  { %620 = vmatpush3.bf16.msra.mxu1 %v617_v23 }
  0x26   :  { %600 = vmatpush3.bf16.msra.mxu0 %v599_v15  ;;  %622 = vmatprep.subr.bf16.mxu1 %v621_v26 }
  0x29   :  { %624 = vmatpush3.bf16.msra.mxu1 %v621_v26 }
  0xdf   :  { %v134_v27 = vpop.f32.mrb[0].mxu1 }
  0xe0   :  { %v136_v28 = vpop.f32.mrb[1].mxu1 }
  0xe1   :  { %356 = vmatprep.mubr.f32.mxu0 %v136_v28 }
  0xe2   :  { %357 = vmatmul.mubr.f32.vlgmr.msra.gmra.mrb[0].mxu0 %v134_v27 }
  0xe3   :  { %v140_v29 = vpop.f32.mrb[2].mxu1 }
  0xe4   :  { %v142_v30 = vpop.f32.mrb[3].mxu1 }
  0xe5   :  { %361 = vmatprep.mubr.f32.mxu0 %v142_v30 }
  0xe6   :  { %362 = vmatmul.mubr.f32.gmra.mrb[2].mxu0 %v140_v29 }
  0xe7   :  { %v525_v33 = vpop.f32.mrb[4].mxu1 }
  0xe8   :  { %v225_v34 = vadd.f32 %v525_v33, %v48_v31  ;;  %v211_v35 = vpop.f32.mrb[5].mxu1 }
  0xe9   :  { %v222_v36 = vadd.f32 %v211_v35, %v45_v32 }
  0xea   :  { %232 = vst.msk [vmem:[#allocation2 + $0x28] sm:$0xff] %vm20_vm3, %v225_v34 }
  0xeb   :  { %229 = vst.msk [vmem:[#allocation2 + $0x10] sm:$0xff] %vm20_vm3, %v222_v36 }
  0xf1   :  { %v241_v38 = vld [vmem:[#allocation2 + $0x28] sm:$0xff] }
  0xf2   :  { %v238_v37 = vld [vmem:[#allocation2 + $0x10] sm:$0xff] }
  0xf3   :  { %550 = vmatprep.mubr.msk.f32.mxu1 %vm20_vm3, %v238_v37 }
  0xf4   :  { %551 = vmatmul.mubr.msk.f32.vlgmr.msra.gmra.mrb[6].mxu1 %vm20_vm3, %v241_v38 }
 0x1b5   :  { %v495_v39 = vpop.f32.mrb[0].mxu0 }
 0x1b6   :  { %v496_v40 = vpop.f32.mrb[1].mxu0 }
 0x1b7   :  { %v497_v41 = vadd.f32 %v496_v40, %v495_v39 }
 0x1b9   :  { %v498_v42 = vpop.f32.mrb[2].mxu0 }
 0x1ba   :  { %v499_v43 = vpop.f32.mrb[3].mxu0 }
 0x1bb   :  { %v500_v44 = vadd.f32 %v499_v43, %v498_v42 }
 0x1c7   :  { %v552_v45 = vpop.f32.mrb[6].mxu1 }
 0x1c8   :  { %v439_v46 = vadd.f32 %v552_v45, %v500_v44  ;;  %v433_v47 = vpop.f32.mrb[7].mxu1 }
 0x1c9   :  { %v434_v48 = vadd.f32 %v497_v41, %v433_v47 }
 0x1ca   :  { %443 = vst [vmem:[%s844_s3 + $0x8] sm:$0xff] %v439_v46 }
 0x1cb   :  { %442 = vst [vmem:[%s844_s3] sm:$0xff] %v434_v48 }

// kernel: interaction_block_forward.5
= control target key start
LH: loop header
LB: loop body
LE: loop exit
PB: predicated region body
PF: predicated region fallthrough
CT: control target
= control target key end

     0   :  { %vm34_vm0 = vcmask 64512   ;;  %vm565_vm1 = vcmask 1043456   ;;  %s1476_s24 = smov 64   ;;  %s1477_s27 = smov 32   ;;  %vm552_vm2 = vcmask 31744   ;;  %vm774_vm3 = vcmask 261120   ;;  %s2233_s3 = inlined_call_operand.vmem [shape: f32[8,128], index: 3, kind: input, shape index: {}]   ;;  %s2234_s0 = inlined_call_operand.vmem [shape: f32[32,8], index: 0, kind: input, shape index: {}]   ;;  %s2235_s4 = inlined_call_operand.vmem [shape: f32[128,128], index: 4, kind: input, shape index: {}]   ;;  %s2236_s5 = inlined_call_operand.vmem [shape: f32[128,128], index: 5, kind: input, shape index: {}]   ;;  %s2237_s7 = inlined_call_operand.vmem [shape: f32[4,288], index: 7, kind: input, shape index: {}]   ;;  %s2238_s1 = inlined_call_operand.vmem [shape: f32[32,4], index: 1, kind: input, shape index: {}]   ;;  %s2239_s6 = inlined_call_operand.vmem [shape: f32[128,160], index: 6, kind: input, shape index: {}]   ;;  %s2240_s2 = inlined_call_operand.vmem [shape: f32[32,128], index: 2, kind: input, shape index: {}]   ;;  %s2241_s8 = inlined_call_operand.vmem [shape: f32[32,352], index: 8, kind: output, shape index: {}]  }
   0x1   :  { %v33_v0 = vld [vmem:[%s2233_s3] sm:$0xff]  ;;  %v30_v2 = vld [vmem:[%s2234_s0 + $0x8] sm:$0xff]  ;;  %v31_v3 = vld [vmem:[%s2234_s0 + $0x10] sm:$0xff]  ;;  %s1478_s12 = smov 96   ;;  %vm775_vm4 = vcmask 523264   ;;  %vm1138_vm5 = vcmask 785408  }
   0x2   :  { %v29_v1 = vld [vmem:[%s2234_s0] sm:$0xff]  ;;  %1230 = vmatprep.subr.mxu0 %v33_v0  ;;  %v161_v5 = vld [vmem:[%s2235_s4 + $0x8] sm:$0xff]  ;;  %v32_v7 = vld [vmem:[%s2234_s0 + $0x18] sm:$0xff] }
   0x3   :  { %1232 = vmatprep.mubr.msk.f32.mxu0 %vm34_vm0, %v29_v1  ;;  %v160_v4 = vld [vmem:[%s2235_s4] sm:$0xff]  ;;  %1231 = vmatpush3.msra.mxu0 %v33_v0  ;;  %v162_v8 = vld [vmem:[%s2235_s4 + $0x10] sm:$0xff]  ;;  %v163_v9 = vld [vmem:[%s2235_s4 + $0x18] sm:$0xff] }
   0x4   :  { %1233 = vmatmul.mubr.msk.f32.vlgmr.msra.gmra.mrb[0].mxu0 %vm34_vm0, %v30_v2  ;;  %v1322_v6 = vpack.c.bf16 %v161_v5, %v160_v4  ;;  %v1326_v10 = vpack.c.bf16 %v163_v9, %v162_v8  ;;  %v164_v11 = vld [vmem:[%s2235_s4 + $0x20] sm:$0xff]  ;;  %v165_v12 = vld [vmem:[%s2235_s4 + $0x28] sm:$0xff]  ;;  %v166_v14 = vld [vmem:[%s2235_s4 + $0x30] sm:$0xff] }
   0x5   :  { %1235 = vmatprep.mubr.msk.f32.mxu0 %vm34_vm0, %v31_v3  ;;  %v1330_v13 = vpack.c.bf16 %v165_v12, %v164_v11  ;;  %v167_v15 = vld [vmem:[%s2235_s4 + $0x38] sm:$0xff]  ;;  %v168_v17 = vld [vmem:[%s2235_s4 + $0x40] sm:$0xff]  ;;  %v169_v18 = vld [vmem:[%s2235_s4 + $0x48] sm:$0xff] }
   0x6   :  { %1323 = vmatprep.subr.bf16.mxu1 %v1322_v6  ;;  %v1334_v16 = vpack.c.bf16 %v167_v15, %v166_v14  ;;  %v1338_v19 = vpack.c.bf16 %v169_v18, %v168_v17  ;;  %v170_v20 = vld [vmem:[%s2235_s4 + $0x50] sm:$0xff]  ;;  %v171_v21 = vld [vmem:[%s2235_s4 + $0x58] sm:$0xff]  ;;  %v172_v23 = vld [vmem:[%s2235_s4 + $0x60] sm:$0xff]  ;;  %v1474_v15 = vmov 0.0   ;;  %v1475_v18 = vmov 0  }
   0x7   :  { %1325 = vmatpush3.bf16.msra.mxu1 %v1322_v6  ;;  %v1342_v22 = vpack.c.bf16 %v171_v21, %v170_v20  ;;  %v173_v24 = vld [vmem:[%s2235_s4 + $0x68] sm:$0xff]  ;;  %v174_v26 = vld [vmem:[%s2235_s4 + $0x70] sm:$0xff]  ;;  %v175_v27 = vld [vmem:[%s2235_s4 + $0x78] sm:$0xff]  ;;  %1423 = vset.pattern.permute.xlu0 %v1475_v18 }
   0x8   :  { %1236 = vmatmul.mubr.msk.f32.gmra.mrb[2].mxu0 %vm34_vm0, %v32_v7  ;;  %1327 = vmatprep.subr.bf16.mxu1 %v1326_v10  ;;  %v1346_v25 = vpack.c.bf16 %v173_v24, %v172_v23  ;;  %v1350_v28 = vpack.c.bf16 %v175_v27, %v174_v26  ;;  %v289_v29 = vld [vmem:[%s2236_s5] sm:$0xff]  ;;  %v290_v30 = vld [vmem:[%s2236_s5 + $0x8] sm:$0xff]  ;;  %v291_v56 = vld [vmem:[%s2236_s5 + $0x10] sm:$0xff] }
   0x9   :  { %v1354_v31 = vpack.c.bf16 %v290_v30, %v289_v29  ;;  %v292_v57 = vld [vmem:[%s2236_s5 + $0x18] sm:$0xff]  ;;  %v293_v59 = vld [vmem:[%s2236_s5 + $0x20] sm:$0xff]  ;;  %v294_v60 = vld [vmem:[%s2236_s5 + $0x28] sm:$0xff]  ;;  %1424 = vset.pattern.permute.xlu1 %v1475_v18 }
   0xa   :  { %v1358_v58 = vpack.c.bf16 %v292_v57, %v291_v56  ;;  %v1362_v61 = vpack.c.bf16 %v294_v60, %v293_v59  ;;  %v295_v62 = vld [vmem:[%s2236_s5 + $0x30] sm:$0xff]  ;;  %v296_v63 = vld [vmem:[%s2236_s5 + $0x38] sm:$0xff]  ;;  %v297_v1 = vld [vmem:[%s2236_s5 + $0x40] sm:$0xff] }
   0xb   :  { %1329 = vmatpush3.bf16.msra.mxu1 %v1326_v10  ;;  %1355 = vmatprep.subr.bf16.mxu0 %v1354_v31  ;;  %v1366_v0 = vpack.c.bf16 %v296_v63, %v295_v62  ;;  %v298_v2 = vld [vmem:[%s2236_s5 + $0x48] sm:$0xff]  ;;  %v299_v4 = vld [vmem:[%s2236_s5 + $0x50] sm:$0xff]  ;;  %v300_v5 = vld [vmem:[%s2236_s5 + $0x58] sm:$0xff] }
   0xc   :  { %1331 = vmatprep.subr.bf16.mxu1 %v1330_v13  ;;  %1357 = vmatpush3.bf16.msra.mxu0 %v1354_v31  ;;  %v1370_v3 = vpack.c.bf16 %v298_v2, %v297_v1  ;;  %v1374_v6 = vpack.c.bf16 %v300_v5, %v299_v4  ;;  %v301_v7 = vld [vmem:[%s2236_s5 + $0x60] sm:$0xff]  ;;  %v302_v8 = vld [vmem:[%s2236_s5 + $0x68] sm:$0xff]  ;;  %v303_v10 = vld [vmem:[%s2236_s5 + $0x70] sm:$0xff] }
   0xd   :  { %1359 = vmatprep.subr.bf16.mxu0 %v1358_v58  ;;  %v1378_v9 = vpack.c.bf16 %v302_v8, %v301_v7  ;;  %v304_v11 = vld [vmem:[%s2236_s5 + $0x78] sm:$0xff]  ;;  %v1656_v17 = vld [vmem:[%s2238_s1 + $0x10] sm:$0xff]  ;;  %v1687_v27 = vld [vmem:[%s2240_s2] sm:$0xff] }
   0xe   :  { %v1382_v12 = vpack.c.bf16 %v304_v11, %v303_v10  ;;  %801 = vperm.xlu1 %1424, %v1656_v17   ;;  %v421_v20 = vld [vmem:[%s2239_s6 + $0x18] sm:$0xff]  ;;  %v420_v23 = vld [vmem:[%s2239_s6 + $0x10] sm:$0xff] }
   0xf   :  { %1333 = vmatpush3.bf16.msra.mxu1 %v1330_v13  ;;  %v1642_v13 = vld [vmem:[%s2237_s7] sm:$0xff]  ;;  %v1680_v26 = vld [vmem:[%s2238_s1 + $0x18] sm:$0xff]  ;;  %v1701_v29 = vld [vmem:[%s2240_s2 + $0x10] sm:$0xff] }
  0x10   :  { %1335 = vmatprep.subr.bf16.mxu1 %v1334_v16  ;;  %1361 = vmatpush3.bf16.msra.mxu0 %v1358_v58  ;;  %v551_v14 = vcombine.high %v1642_v13, %v1642_v13  ;;  %v1706_v30 = vld [vmem:[%s2240_s2 + $0x18] sm:$0xff]  ;;  %v422_v58 = vld [vmem:[%s2239_s6 + $0x20] sm:$0xff]  ;;  %v424_v59 = vld [vmem:[%s2239_s6 + $0x30] sm:$0xff] }
  0x11   :  { %1363 = vmatprep.subr.bf16.mxu0 %v1362_v61  ;;  %v425_v56 = vld [vmem:[%s2239_s6 + $0x38] sm:$0xff]  ;;  %v1392_v60 = vpack.c.bf16 %v424_v59, %v422_v58  ;;  %v428_v1 = vld [vmem:[%s2239_s6 + $0x50] sm:$0xff] }
  0x12   :  { %805 = vperm.xlu1 %1424, %v1680_v26   ;;  %v429_v62 = vld [vmem:[%s2239_s6 + $0x58] sm:$0xff]  ;;  %v432_v7 = vld [vmem:[%s2239_s6 + $0x70] sm:$0xff] }
  0x13   :  { %1337 = vmatpush3.bf16.msra.mxu1 %v1334_v16  ;;  %v1651_v16 = vld [vmem:[%s2238_s1] sm:$0xff]  ;;  %v433_v4 = vld [vmem:[%s2239_s6 + $0x78] sm:$0xff] }
  0x14   :  { %1339 = vmatprep.subr.bf16.mxu1 %v1338_v19  ;;  %1365 = vmatpush3.bf16.msra.mxu0 %v1362_v61  ;;  %v427_v61 = vld [vmem:[%s2239_s6 + $0x48] sm:$0xff]  ;;  %v437_v10 = vld [vmem:[%s2239_s6 + $0x98] sm:$0xff] }
  0x15   :  { %1367 = vmatprep.subr.bf16.mxu0 %v1366_v0  ;;  %793 = vperm.xlu0 %1423, %v1651_v16   ;;  %v1394_v63 = vpack.c.bf16 %v429_v62, %v427_v61  ;;  %v441_v18 = vld [vmem:[%s2239_s6 + $0xb8] sm:$0xff] }
  0x17   :  { %1341 = vmatpush3.bf16.msra.mxu1 %v1338_v19  ;;  %v419_v19 = vld [vmem:[%s2239_s6 + $0x8] sm:$0xff] }
  0x18   :  { %1343 = vmatprep.subr.bf16.mxu1 %v1342_v22  ;;  %1369 = vmatpush3.bf16.msra.mxu0 %v1366_v0  ;;  %v1386_v21 = vpack.c.bf16 %v421_v20, %v419_v19  ;;  %v426_v0 = vld [vmem:[%s2239_s6 + $0x40] sm:$0xff] }
  0x19   :  { %1371 = vmatprep.subr.bf16.mxu0 %v1370_v3  ;;  %v1396_v2 = vpack.c.bf16 %v428_v1, %v426_v0  ;;  %v438_v20 = vld [vmem:[%s2239_s6 + $0xa0] sm:$0xff] }
  0x1b   :  { %1345 = vmatpush3.bf16.msra.mxu1 %v1342_v22  ;;  %v418_v22 = vld [vmem:[%s2239_s6] sm:$0xff] }
  0x1c   :  { %1347 = vmatprep.subr.bf16.mxu1 %v1346_v25  ;;  %1373 = vmatpush3.bf16.msra.mxu0 %v1370_v3  ;;  %v1388_v24 = vpack.c.bf16 %v420_v23, %v418_v22  ;;  %v431_v3 = vld [vmem:[%s2239_s6 + $0x68] sm:$0xff] }
  0x1d   :  { %1375 = vmatprep.subr.bf16.mxu0 %v1374_v6  ;;  %v1398_v5 = vpack.c.bf16 %v433_v4, %v431_v3  ;;  %v443_v23 = vld [vmem:[%s2239_s6 + $0xc8] sm:$0xff] }
  0x1f   :  { %1349 = vmatpush3.bf16.msra.mxu1 %v1346_v25  ;;  %v1675_v25 = vld [vmem:[%s2238_s1 + $0x8] sm:$0xff] }
  0x20   :  { %1351 = vmatprep.subr.bf16.mxu1 %v1350_v28  ;;  %1377 = vmatpush3.bf16.msra.mxu0 %v1374_v6  ;;  %v430_v6 = vld [vmem:[%s2239_s6 + $0x60] sm:$0xff] }
  0x21   :  { %1379 = vmatprep.subr.bf16.mxu0 %v1378_v9  ;;  %797 = vperm.xlu0 %1423, %v1675_v25   ;;  %v1400_v8 = vpack.c.bf16 %v432_v7, %v430_v6 }
  0x23   :  { %1353 = vmatpush3.bf16.msra.mxu1 %v1350_v28  ;;  %v1692_v28 = vld [vmem:[%s2240_s2 + $0x8] sm:$0xff] }
  0x24   :  { %1381 = vmatpush3.bf16.msra.mxu0 %v1378_v9  ;;  %1387 = vmatprep.subr.bf16.mxu1 %v1386_v21  ;;  %v435_v9 = vld [vmem:[%s2239_s6 + $0x88] sm:$0xff]  ;;  %v440_v21 = vld [vmem:[%s2239_s6 + $0xb0] sm:$0xff] }
  0x25   :  { %1383 = vmatprep.subr.bf16.mxu0 %v1382_v12  ;;  %750 = vrot.lane.b32.xlu0 %v1687_v27, %s1476_s24  ;;  %v1402_v11 = vpack.c.bf16 %v437_v10, %v435_v9  ;;  %v1408_v22 = vpack.c.bf16 %v440_v21, %v438_v20 }
  0x26   :  { %752 = vrot.lane.b32.xlu1 %v1692_v28, %s1476_s24 }
  0x28   :  { %1385 = vmatpush3.bf16.msra.mxu0 %v1382_v12  ;;  %v434_v12 = vld [vmem:[%s2239_s6 + $0x80] sm:$0xff] }
  0x29   :  { %1169 = vmatprep.subr.msk.mxu0 %vm565_vm1, %v551_v14  ;;  %754 = vrot.lane.b32.xlu0 %v1701_v29, %s1476_s24 }
  0x2a   :  { %756 = vrot.lane.b32.xlu1 %v1706_v30, %s1476_s24 }
  0x2d   :  { %762 = vrot.lane.b32.xlu0 %v1687_v27, %s1477_s27 }
  0x2e   :  { %764 = vrot.lane.b32.xlu1 %v1692_v28, %s1477_s27 }
  0x31   :  { %766 = vrot.lane.b32.xlu0 %v1701_v29, %s1477_s27 }
  0x32   :  { %768 = vrot.lane.b32.xlu1 %v1706_v30, %s1477_s27 }
  0x35   :  { %974 = vrot.lane.b32.xlu0 %v1692_v28, %s1478_s12 }
  0x36   :  { %972 = vrot.lane.b32.xlu1 %v1687_v27, %s1478_s12 }
  0x39   :  { %978 = vrot.lane.b32.xlu0 %v1706_v30, %s1478_s12 }
  0x3a   :  { %976 = vrot.lane.b32.xlu1 %v1701_v29, %s1478_s12 }
  0x94   :  { %v1866_v7 = vpop.permute.xlu0 %793 }
  0xa0   :  { %v1870_v9 = vpop.permute.xlu0 %797 }
  0xd7   :  { %v1234_v32 = vpop.f32.mrb[0].mxu0 }
  0xd8   :  { %v1158_v33 = vmul.f32 -1.442695, %v1234_v32  ;;  %v113_v34 = vpop.f32.mrb[1].mxu0 }
  0xd9   :  { %v1157_v35 = vmul.f32 -1.442695, %v113_v34 }
  0xda   :  { %1426 = vpow2.f32 %v1158_v33 }
  0xdb   :  { %1428 = vpow2.f32 %v1157_v35  ;;  %v1237_v36 = vpop.f32.mrb[2].mxu0 }
  0xdc   :  { %v1160_v37 = vmul.f32 -1.442695, %v1237_v36  ;;  %v123_v38 = vpop.f32.mrb[3].mxu0 }
  0xdd   :  { %v1159_v39 = vmul.f32 -1.442695, %v123_v38 }
  0xde   :  { %1430 = vpow2.f32 %v1160_v37 }
  0xdf   :  { %1432 = vpow2.f32 %v1159_v39 }
  0xe4   :  { %v1427_v40 = vpop.eup %1426 }
  0xe5   :  { %v1429_v41 = vpop.eup %1428  ;;  %v145_v42 = vadd.f32 1.0, %v1427_v40 }
  0xe6   :  { %v144_v43 = vadd.f32 1.0, %v1429_v41 }
  0xe7   :  { %1434 = vrcp.f32 %v145_v42 }
  0xe8   :  { %v1431_v44 = vpop.eup %1430  ;;  %1436 = vrcp.f32 %v144_v43 }
  0xe9   :  { %v1433_v45 = vpop.eup %1432  ;;  %v147_v46 = vadd.f32 1.0, %v1431_v44 }
  0xea   :  { %v146_v47 = vadd.f32 1.0, %v1433_v45 }
  0xeb   :  { %1438 = vrcp.f32 %v147_v46 }
  0xec   :  { %1440 = vrcp.f32 %v146_v47 }
  0xf1   :  { %v1435_v48 = vpop.eup %1434 }
  0xf2   :  { %v1437_v49 = vpop.eup %1436  ;;  %v157_v51 = vmul.f32 %v1435_v48, %v1234_v32 }
  0xf3   :  { %v156_v50 = vmul.f32 %v1437_v49, %v113_v34 }
  0xf5   :  { %v1439_v52 = vpop.eup %1438  ;;  %1270 = vmatprep.mubr.f32.mxu1 %v156_v50 }
  0xf6   :  { %v1441_v53 = vpop.eup %1440  ;;  %1271 = vmatmul.mubr.f32.vlgmr.msra.gmra.mrb[0].mxu1 %v157_v51  ;;  %v159_v55 = vmul.f32 %v1439_v52, %v1237_v36 }
  0xf7   :  { %v158_v54 = vmul.f32 %v1441_v53, %v123_v38  ;;  %1389 = vmatpush1.bf16.msra.mxu1 %v1388_v24  ;;  %v445_v24 = vld [vmem:[%s2239_s6 + $0xd8] sm:$0xff] }
  0xf9   :  { %1273 = vmatprep.mubr.f32.mxu1 %v158_v54 }
  0xfa   :  { %1274 = vmatmul.mubr.f32.gmra.mrb[2].mxu1 %v159_v55  ;;  %v423_v55 = vld [vmem:[%s2239_s6 + $0x28] sm:$0xff] }
  0xfb   :  { %514 = vmatprep.mubr.f32.mxu1 %v1474_v15  ;;  %v1390_v57 = vpack.c.bf16 %v425_v56, %v423_v55 }
  0xfd   :  { %1391 = vmatprep.subr.bf16.mxu1 %v1390_v57 }
  0xfe   :  { %1393 = vmatpush1.bf16.msra.mxu1 %v1392_v60 }
  0xff   :  { %1395 = vmatprep.subr.bf16.mxu1 %v1394_v63 }
 0x102   :  { %1397 = vmatpush1.bf16.msra.mxu1 %v1396_v2 }
 0x103   :  { %1399 = vmatprep.subr.bf16.mxu1 %v1398_v5 }
 0x106   :  { %1401 = vmatpush1.bf16.msra.mxu1 %v1400_v8  ;;  %v1868_v8 = vpop.permute.xlu1 %801 }
 0x107   :  { %1403 = vmatprep.subr.bf16.mxu1 %v1402_v11  ;;  %v1874_v11 = vpop.permute.xlu0 %750 }
 0x10a   :  { %v1872_v10 = vpop.permute.xlu1 %805 }
 0x1c9   :  { %v1272_v31 = vpop.f32.mrb[0].mxu1 }
 0x1ca   :  { %v1162_v32 = vmul.f32 -1.442695, %v1272_v31  ;;  %v242_v33 = vpop.f32.mrb[1].mxu1 }
 0x1cb   :  { %v1161_v34 = vmul.f32 -1.442695, %v242_v33 }
 0x1cc   :  { %1442 = vpow2.f32 %v1162_v32  ;;  %v442_v32 = vld [vmem:[%s2239_s6 + $0xc0] sm:$0xff] }
 0x1cd   :  { %1444 = vpow2.f32 %v1161_v34  ;;  %v1275_v35 = vpop.f32.mrb[2].mxu1 }
 0x1ce   :  { %v1164_v36 = vmul.f32 -1.442695, %v1275_v35  ;;  %v252_v37 = vpop.f32.mrb[3].mxu1 }
 0x1cf   :  { %v1163_v38 = vmul.f32 -1.442695, %v252_v37 }
 0x1d0   :  { %1446 = vpow2.f32 %v1164_v36  ;;  %v449_v36 = vld [vmem:[%s2239_s6 + $0xf8] sm:$0xff] }
 0x1d1   :  { %1448 = vpow2.f32 %v1163_v38  ;;  %v446_v38 = vld [vmem:[%s2239_s6 + $0xe0] sm:$0xff] }
 0x1d6   :  { %v1443_v39 = vpop.eup %1442 }
 0x1d7   :  { %v1445_v40 = vpop.eup %1444  ;;  %v274_v41 = vadd.f32 1.0, %v1443_v39  ;;  %v448_v39 = vld [vmem:[%s2239_s6 + $0xf0] sm:$0xff] }
 0x1d8   :  { %v273_v42 = vadd.f32 1.0, %v1445_v40  ;;  %v1416_v40 = vpack.c.bf16 %v448_v39, %v446_v38 }
 0x1d9   :  { %1450 = vrcp.f32 %v274_v41  ;;  %v548_v41 = vld [vmem:[%s2237_s7 + $0x8] sm:$0xf] }
 0x1da   :  { %v1447_v43 = vpop.eup %1446  ;;  %1452 = vrcp.f32 %v273_v42 }
 0x1db   :  { %v1449_v44 = vpop.eup %1448  ;;  %v276_v45 = vadd.f32 1.0, %v1447_v43 }
 0x1dc   :  { %v275_v46 = vadd.f32 1.0, %v1449_v44 }
 0x1dd   :  { %1454 = vrcp.f32 %v276_v45 }
 0x1de   :  { %1456 = vrcp.f32 %v275_v46 }
 0x1e3   :  { %v1451_v47 = vpop.eup %1450 }
 0x1e4   :  { %v1453_v48 = vpop.eup %1452  ;;  %v286_v50 = vmul.f32 %v1451_v47, %v1272_v31  ;;  %v1410_v31 = vpack.c.bf16 %v445_v24, %v443_v23 }
 0x1e5   :  { %v285_v49 = vmul.f32 %v1453_v48, %v242_v33  ;;  %v444_v33 = vld [vmem:[%s2239_s6 + $0xd0] sm:$0xff] }
 0x1e6   :  { %v1412_v34 = vpack.c.bf16 %v444_v33, %v442_v32 }
 0x1e7   :  { %v1455_v51 = vpop.eup %1454  ;;  %1308 = vmatprep.mubr.f32.mxu0 %v285_v49 }
 0x1e8   :  { %v1457_v52 = vpop.eup %1456  ;;  %1309 = vmatmul.mubr.f32.vlgmr.msra.gmra.mrb[4].mxu0 %v286_v50  ;;  %v288_v54 = vmul.f32 %v1455_v51, %v1275_v35  ;;  %v447_v35 = vld [vmem:[%s2239_s6 + $0xe8] sm:$0xff] }
 0x1e9   :  { %v287_v53 = vmul.f32 %v1457_v52, %v252_v37  ;;  %1170 = vmatpush1.msk.msra.mxu0 %vm565_vm1, %v1642_v13  ;;  %v436_v13 = vld [vmem:[%s2239_s6 + $0x90] sm:$0xff]  ;;  %v1414_v37 = vpack.c.bf16 %v449_v36, %v447_v35 }
 0x1ea   :  { %v1404_v14 = vpack.c.bf16 %v436_v13, %v434_v12  ;;  %1314 = vmatprep.subr.msk.mxu0 %vm565_vm1, %v548_v41  ;;  %v1876_v12 = vpop.permute.xlu1 %752  ;;  %v1878_v13 = vpop.permute.xlu0 %754 }
 0x1eb   :  { %1311 = vmatprep.mubr.f32.mxu0 %v287_v53 }
 0x1ec   :  { %1312 = vmatmul.mubr.f32.gmra.mrb[6].mxu0 %v288_v54  ;;  %1405 = vmatpush1.bf16.msra.mxu1 %v1404_v14 }
 0x1ed   :  { %636 = vmatprep.mubr.f32.mxu0 %v1474_v15 }
 0x1ee   :  { %v1880_v14 = vpop.permute.xlu1 %756 }
 0x1f0   :  { %1171 = vmatmul.mubr.msk.f32.vlgmr.msra.gmra.mrb[8].mxu0 %vm552_vm2, %v1651_v16 }
 0x1f1   :  { %642 = vmatprep.mubr.f32.mxu0 %v1474_v15  ;;  %1315 = vmatpush3.msk.msra.mxu0 %vm565_vm1, %v548_v41 }
 0x1f4   :  { %1172 = vmatmul.mubr.msk.f32.gmra.mrb[10].mxu0 %vm552_vm2, %v1675_v25 }
 0x1f5   :  { %648 = vmatprep.mubr.f32.mxu0 %v1474_v15 }
 0x1f8   :  { %1173 = vmatmul.mubr.msk.f32.gmra.mrb[12].mxu0 %vm552_vm2, %v1656_v17 }
 0x1f9   :  { %654 = vmatprep.mubr.f32.mxu0 %v1474_v15 }
 0x1fc   :  { %1174 = vmatmul.mubr.msk.f32.gmra.mrb[14].mxu0 %vm552_vm2, %v1680_v26 }
 0x1fd   :  { %1316 = vmatprep.mubr.msk.f32.mxu0 %vm552_vm2, %v1651_v16  ;;  %v439_v16 = vld [vmem:[%s2239_s6 + $0xa8] sm:$0xff] }
 0x1fe   :  { %v1406_v19 = vpack.c.bf16 %v441_v18, %v439_v16  ;;  %v1882_v16 = vpop.permute.xlu0 %762 }
 0x200   :  { %1407 = vmatprep.subr.bf16.mxu1 %v1406_v19  ;;  %1317 = vmatmul.mubr.msk.f32.vlgmr.msra.gmra.mrb[16].mxu0 %vm552_vm2, %v1675_v25 }
 0x201   :  { %1409 = vmatpush1.bf16.msra.mxu1 %v1408_v22  ;;  %1319 = vmatprep.mubr.msk.f32.mxu0 %vm552_vm2, %v1656_v17 }
 0x202   :  { %1411 = vmatprep.subr.bf16.mxu1 %v1410_v31  ;;  %v1886_v18 = vpop.permute.xlu0 %766 }
 0x204   :  { %1320 = vmatmul.mubr.msk.f32.gmra.mrb[18].mxu0 %vm552_vm2, %v1680_v26 }
 0x205   :  { %1413 = vmatpush1.bf16.msra.mxu1 %v1412_v34 }
 0x206   :  { %1415 = vmatprep.subr.bf16.mxu1 %v1414_v37  ;;  %v1890_v20 = vpop.permute.xlu0 %974 }
 0x209   :  { %1417 = vmatpush1.bf16.msra.mxu1 %v1416_v40 }
 0x20a   :  { %v1894_v22 = vpop.permute.xlu0 %978 }
 0x2bb   :  { %v1310_v42 = vpop.f32.mrb[4].mxu0 }
 0x2bc   :  { %v1166_v43 = vmul.f32 -1.442695, %v1310_v42  ;;  %v371_v44 = vpop.f32.mrb[5].mxu0 }
 0x2bd   :  { %v1165_v45 = vmul.f32 -1.442695, %v371_v44 }
 0x2be   :  { %1458 = vpow2.f32 %v1166_v43 }
 0x2bf   :  { %1460 = vpow2.f32 %v1165_v45  ;;  %v1313_v46 = vpop.f32.mrb[6].mxu0 }
 0x2c0   :  { %v381_v47 = vpop.f32.mrb[7].mxu0  ;;  %v1168_v48 = vmul.f32 -1.442695, %v1313_v46 }
 0x2c1   :  { %v1167_v49 = vmul.f32 -1.442695, %v381_v47 }
 0x2c3   :  { %1462 = vpow2.f32 %v1167_v49  ;;  %v1839_v50 = vpop.f32.mrb[8].mxu0 }
 0x2c4   :  { %816 = vrot.lane.b32.xlu0 %v1839_v50, %s1477_s27  ;;  %v1843_v17 = vpop.f32.mrb[9].mxu0  ;;  %1464 = vpow2.f32 %v1168_v48 }
 0x2c7   :  { %v1845_v25 = vpop.f32.mrb[10].mxu0 }
 0x2c8   :  { %v1459_v26 = vpop.eup %1458  ;;  %818 = vrot.lane.b32.xlu1 %v1845_v25, %s1477_s27  ;;  %v1849_v51 = vpop.f32.mrb[11].mxu0 }
 0x2c9   :  { %v1461_v52 = vpop.eup %1460  ;;  %v403_v53 = vadd.f32 1.0, %v1459_v26 }
 0x2ca   :  { %v402_v54 = vadd.f32 1.0, %v1461_v52 }
 0x2cb   :  { %v1851_v55 = vpop.f32.mrb[12].mxu0 }
 0x2cc   :  { %1466 = vrcp.f32 %v402_v54  ;;  %820 = vrot.lane.b32.xlu0 %v1851_v55, %s1477_s27  ;;  %v1855_v56 = vpop.f32.mrb[13].mxu0 }
 0x2cd   :  { %v1463_v57 = vpop.eup %1462  ;;  %1468 = vrcp.f32 %v403_v53 }
 0x2ce   :  { %v404_v58 = vadd.f32 1.0, %v1463_v57  ;;  %v1465_v59 = vpop.eup %1464 }
 0x2cf   :  { %v1857_v60 = vpop.f32.mrb[14].mxu0  ;;  %v405_v62 = vadd.f32 1.0, %v1465_v59 }
 0x2d0   :  { %822 = vrot.lane.b32.xlu1 %v1857_v60, %s1477_s27  ;;  %v1861_v61 = vpop.f32.mrb[15].mxu0  ;;  %1470 = vrcp.f32 %v404_v58 }
 0x2d1   :  { %1472 = vrcp.f32 %v405_v62 }
 0x2d3   :  { %v1318_v38 = vpop.f32.mrb[16].mxu0 }
 0x2d4   :  { %v727_v39 = vpop.f32.mrb[17].mxu0 }
 0x2d6   :  { %v1467_v63 = vpop.eup %1466 }
 0x2d7   :  { %v414_v0 = vmul.f32 %v1467_v63, %v371_v44  ;;  %v1469_v1 = vpop.eup %1468  ;;  %v1321_v40 = vpop.f32.mrb[18].mxu0 }
 0x2d8   :  { %v415_v2 = vmul.f32 %v1469_v1, %v1310_v42  ;;  %v737_v41 = vpop.f32.mrb[19].mxu0 }
 0x2d9   :  { %515 = vmatmul.mubr.f32.vlgmr.msra.gmra.mrb[4].mxu1 %v414_v0 }
 0x2da   :  { %520 = vmatprep.mubr.f32.mxu1 %v1474_v15  ;;  %v1471_v3 = vpop.eup %1470 }
 0x2db   :  { %v416_v4 = vmul.f32 %v1471_v3, %v381_v47  ;;  %v1473_v5 = vpop.eup %1472 }
 0x2dc   :  { %v417_v6 = vmul.f32 %v1473_v5, %v1313_v46 }
 0x2dd   :  { %521 = vmatmul.mubr.f32.gmra.mrb[6].mxu1 %v415_v2 }
 0x2de   :  { %526 = vmatprep.mubr.f32.mxu1 %v1474_v15 }
 0x2e1   :  { %527 = vmatmul.mubr.f32.gmra.mrb[8].mxu1 %v416_v4 }
 0x2e2   :  { %532 = vmatprep.mubr.f32.mxu1 %v1474_v15  ;;  %v1884_v15 = vpop.permute.xlu1 %764 }
 0x2e5   :  { %533 = vmatmul.mubr.f32.gmra.mrb[10].mxu1 %v417_v6 }
 0x2e6   :  { %v1888_v19 = vpop.permute.xlu1 %768 }
 0x2ea   :  { %v1892_v21 = vpop.permute.xlu1 %972 }
 0x2ee   :  { %v1896_v23 = vpop.permute.xlu1 %976 }
 0x336   :  { %v1898_v24 = vpop.permute.xlu0 %816 }
 0x337   :  { %v1902_v31 = vmul.f32 %v1898_v24, %v1687_v27 }
 0x339   :  { %836 = vrot.lane.b32.xlu0 %v1902_v31, %s1478_s12 }
 0x33a   :  { %v1906_v32 = vpop.permute.xlu1 %818 }
 0x33b   :  { %v1910_v33 = vmul.f32 %v1906_v32, %v1692_v28 }
 0x33d   :  { %838 = vrot.lane.b32.xlu1 %v1910_v33, %s1478_s12 }
 0x33e   :  { %v1914_v34 = vpop.permute.xlu0 %820 }
 0x33f   :  { %v1918_v35 = vmul.f32 %v1914_v34, %v1701_v29 }
 0x341   :  { %840 = vrot.lane.b32.xlu0 %v1918_v35, %s1478_s12 }
 0x342   :  { %v1922_v36 = vpop.permute.xlu1 %822 }
 0x343   :  { %v1926_v37 = vmul.f32 %v1922_v36, %v1706_v30 }
 0x345   :  { %842 = vrot.lane.b32.xlu1 %v1926_v37, %s1478_s12 }
 0x3ac   :  { %v1930_v42 = vpop.f32.mrb[4].mxu1 }
 0x3ad   :  { %v1932_v43 = vpop.f32.mrb[5].mxu1  ;;  %v1936_v44 = vmul.f32 %v1874_v11, %v1930_v42  ;;  %v920_v26 = vmul.f32 %v1866_v7, %v1930_v42 }
 0x3af   :  { %884 = vrot.lane.b32.xlu1 %v1936_v44, %s1476_s24 }
 0x3b0   :  { %v1940_v45 = vpop.f32.mrb[6].mxu1 }
 0x3b1   :  { %v1942_v46 = vpop.f32.mrb[7].mxu1  ;;  %v1946_v47 = vmul.f32 %v1876_v12, %v1940_v45  ;;  %v921_v54 = vmul.f32 %v1870_v9, %v1940_v45 }
 0x3b3   :  { %886 = vrot.lane.b32.xlu0 %v1946_v47, %s1476_s24  ;;  %896 = vrot.lane.b32.xlu1 %v1936_v44, %s1478_s12 }
 0x3b4   :  { %v1952_v48 = vpop.f32.mrb[8].mxu1 }
 0x3b5   :  { %v1954_v49 = vpop.f32.mrb[9].mxu1  ;;  %v1973_v57 = vmul.f32 %v1878_v13, %v1952_v48  ;;  %v922_v59 = vmul.f32 %v1868_v8, %v1952_v48 }
 0x3b7   :  { %898 = vrot.lane.b32.xlu0 %v1946_v47, %s1478_s12  ;;  %928 = vrot.lane.b32.xlu1 %v920_v26, %s1477_s27 }
 0x3b8   :  { %v1961_v52 = vpop.f32.mrb[10].mxu1 }
 0x3b9   :  { %v1963_v53 = vpop.f32.mrb[11].mxu1  ;;  %v1980_v58 = vmul.f32 %v1880_v14, %v1961_v52  ;;  %v923_v62 = vmul.f32 %v1872_v10, %v1961_v52 }
 0x3bb   :  { %930 = vrot.lane.b32.xlu0 %v921_v54, %s1477_s27  ;;  %940 = vrot.lane.b32.xlu1 %v920_v26, %s1476_s24 }
 0x3bf   :  { %942 = vrot.lane.b32.xlu0 %v921_v54, %s1476_s24  ;;  %952 = vrot.lane.b32.xlu1 %v920_v26, %s1478_s12 }
 0x3c3   :  { %954 = vrot.lane.b32.xlu0 %v921_v54, %s1478_s12  ;;  %888 = vrot.lane.b32.xlu1 %v1973_v57, %s1476_s24 }
 0x3c7   :  { %900 = vrot.lane.b32.xlu1 %v1973_v57, %s1478_s12  ;;  %890 = vrot.lane.b32.xlu0 %v1980_v58, %s1476_s24 }
 0x3cb   :  { %932 = vrot.lane.b32.xlu1 %v922_v59, %s1477_s27  ;;  %902 = vrot.lane.b32.xlu0 %v1980_v58, %s1478_s12 }
 0x3cf   :  { %944 = vrot.lane.b32.xlu1 %v922_v59, %s1476_s24  ;;  %934 = vrot.lane.b32.xlu0 %v923_v62, %s1477_s27 }
 0x3d3   :  { %956 = vrot.lane.b32.xlu1 %v922_v59, %s1478_s12  ;;  %946 = vrot.lane.b32.xlu0 %v923_v62, %s1476_s24 }
 0x3d7   :  { %998 = vrot.lane.b32.xlu1 %v727_v39, %s1476_s24  ;;  %958 = vrot.lane.b32.xlu0 %v923_v62, %s1478_s12 }
 0x3db   :  { %1002 = vrot.lane.b32.xlu1 %v1318_v38, %s1476_s24  ;;  %996 = vrot.lane.b32.xlu0 %v1843_v17, %s1476_s24 }
 0x3df   :  { %1006 = vrot.lane.b32.xlu1 %v737_v41, %s1476_s24  ;;  %1000 = vrot.lane.b32.xlu0 %v1849_v51, %s1476_s24 }
 0x3e3   :  { %1010 = vrot.lane.b32.xlu1 %v1321_v40, %s1476_s24  ;;  %1004 = vrot.lane.b32.xlu0 %v1855_v56, %s1476_s24 }
 0x3e7   :  { %1026 = vrot.lane.b32.xlu1 %v1849_v51, %s1477_s27  ;;  %1008 = vrot.lane.b32.xlu0 %v1861_v61, %s1476_s24  ;;  %v2044_v51 = vpop.permute.xlu0 %836 }
 0x3eb   :  { %1030 = vrot.lane.b32.xlu1 %v1861_v61, %s1477_s27  ;;  %1024 = vrot.lane.b32.xlu0 %v1843_v17, %s1477_s27  ;;  %v2042_v17 = vpop.permute.xlu1 %838  ;;  %v2048_v61 = vpop.permute.xlu0 %840 }
 0x3ef   :  { %854 = vrot.lane.b32.xlu1 %v1910_v33, %s1476_s24  ;;  %1028 = vrot.lane.b32.xlu0 %v1855_v56, %s1477_s27  ;;  %v2046_v56 = vpop.permute.xlu1 %842 }
 0x3f3   :  { %858 = vrot.lane.b32.xlu1 %v1926_v37, %s1476_s24  ;;  %852 = vrot.lane.b32.xlu0 %v1902_v31, %s1476_s24 }
 0x3f7   :  { %1054 = vrot.lane.b32.xlu1 %v1942_v46, %s1477_s27  ;;  %856 = vrot.lane.b32.xlu0 %v1918_v35, %s1476_s24 }
 0x3fb   :  { %1052 = vrot.lane.b32.xlu0 %v1932_v43, %s1477_s27  ;;  %1058 = vrot.lane.b32.xlu1 %v1963_v53, %s1477_s27 }
 0x3ff   :  { %1056 = vrot.lane.b32.xlu0 %v1954_v49, %s1477_s27  ;;  %1066 = vrot.lane.b32.xlu1 %v1942_v46, %s1476_s24 }
 0x403   :  { %1064 = vrot.lane.b32.xlu0 %v1932_v43, %s1476_s24  ;;  %1070 = vrot.lane.b32.xlu1 %v1963_v53, %s1476_s24 }
 0x407   :  { %1068 = vrot.lane.b32.xlu0 %v1954_v49, %s1476_s24 }
 0x421   :  { %v885_v63 = vpop.permute.xlu1 %884 }
 0x425   :  { %v887_v0 = vpop.permute.xlu0 %886  ;;  %v897_v1 = vpop.permute.xlu1 %896 }
 0x426   :  { %v908_v2 = vsel %vm774_vm3, %v885_v63, %v897_v1 }
 0x427   :  { %v912_v3 = vsel %vm775_vm4, %v908_v2, %v1936_v44 }
 0x428   :  { %v916_v4 = vmul.f32 %v912_v3, %v1839_v50 }
 0x429   :  { %v899_v5 = vpop.permute.xlu0 %898  ;;  %v929_v6 = vpop.permute.xlu1 %928 }
 0x42a   :  { %v909_v38 = vsel %vm774_vm3, %v887_v0, %v899_v5  ;;  %1096 = vrot.lane.b32.xlu0 %v916_v4, %s1476_s24 }
 0x42b   :  { %v913_v39 = vsel %vm775_vm4, %v909_v38, %v1946_v47 }
 0x42c   :  { %v917_v40 = vmul.f32 %v913_v39, %v1845_v25 }
 0x42d   :  { %v931_v41 = vpop.permute.xlu0 %930  ;;  %v941_v26 = vpop.permute.xlu1 %940 }
 0x42e   :  { %1098 = vrot.lane.b32.xlu1 %v917_v40, %s1476_s24  ;;  %v964_v54 = vsel %vm774_vm3, %v929_v6, %v941_v26 }
 0x431   :  { %v943_v44 = vpop.permute.xlu0 %942  ;;  %v953_v59 = vpop.permute.xlu1 %952 }
 0x432   :  { %v968_v50 = vsel %vm775_vm4, %v964_v54, %v953_v59  ;;  %v965_v63 = vsel %vm774_vm3, %v931_v41, %v943_v44 }
 0x433   :  { %v984_v62 = vmul.f32 %v1892_v21, %v968_v50 }
 0x435   :  { %v955_v0 = vpop.permute.xlu0 %954  ;;  %v889_v1 = vpop.permute.xlu1 %888  ;;  %1112 = vrot.lane.b32.xlu0 %v984_v62, %s1477_s27 }
 0x436   :  { %v969_v25 = vsel %vm775_vm4, %v965_v63, %v955_v0 }
 0x437   :  { %v985_v47 = vmul.f32 %v1890_v20, %v969_v25 }
 0x439   :  { %v901_v2 = vpop.permute.xlu1 %900  ;;  %v891_v3 = vpop.permute.xlu0 %890  ;;  %1114 = vrot.lane.b32.xlu1 %v985_v47, %s1477_s27 }
 0x43a   :  { %v910_v4 = vsel %vm774_vm3, %v889_v1, %v901_v2 }
 0x43b   :  { %v914_v5 = vsel %vm775_vm4, %v910_v4, %v1973_v57 }
 0x43c   :  { %v918_v21 = vmul.f32 %v914_v5, %v1851_v55 }
 0x43d   :  { %v933_v6 = vpop.permute.xlu1 %932  ;;  %v903_v38 = vpop.permute.xlu0 %902 }
 0x43e   :  { %v911_v39 = vsel %vm774_vm3, %v891_v3, %v903_v38  ;;  %1100 = vrot.lane.b32.xlu0 %v918_v21, %s1476_s24 }
 0x43f   :  { %v915_v20 = vsel %vm775_vm4, %v911_v39, %v1980_v58 }
 0x440   :  { %v919_v40 = vmul.f32 %v915_v20, %v1857_v60 }
 0x441   :  { %v945_v41 = vpop.permute.xlu1 %944  ;;  %v935_v26 = vpop.permute.xlu0 %934 }
 0x442   :  { %1102 = vrot.lane.b32.xlu1 %v919_v40, %s1476_s24  ;;  %v966_v54 = vsel %vm774_vm3, %v933_v6, %v945_v41  ;;  %v849_v6 = vadd.f32 %v2042_v17, %v1910_v33  ;;  %v848_v40 = vadd.f32 %v2044_v51, %v1902_v31  ;;  %v851_v41 = vadd.f32 %v2046_v56, %v1926_v37 }
 0x443   :  { %v791_v33 = vmul.f32 %v1706_v30, %v1961_v52  ;;  %v781_v31 = vsel %vm774_vm3, %v1884_v15, %v1692_v28  ;;  %v850_v37 = vadd.f32 %v2048_v61, %v1918_v35 }
 0x445   :  { %v957_v57 = vpop.permute.xlu1 %956  ;;  %v947_v44 = vpop.permute.xlu0 %946 }
 0x446   :  { %v970_v55 = vsel %vm775_vm4, %v966_v54, %v957_v57  ;;  %v967_v50 = vsel %vm774_vm3, %v935_v26, %v947_v44  ;;  %v788_v54 = vmul.f32 %v1687_v27, %v1930_v42 }
 0x447   :  { %v986_v59 = vmul.f32 %v1896_v23, %v970_v55 }
 0x449   :  { %v2082_v62 = vpop.permute.xlu1 %998  ;;  %1116 = vrot.lane.b32.xlu0 %v986_v59, %s1477_s27  ;;  %v959_v58 = vpop.permute.xlu0 %958 }
 0x44a   :  { %v971_v60 = vsel %vm775_vm4, %v967_v50, %v959_v58  ;;  %v808_v58 = vmul.f32 %v1866_v7, %v788_v54  ;;  %v783_v7 = vsel %vm774_vm3, %v1888_v19, %v1706_v30 }
 0x44b   :  { %v987_v63 = vmul.f32 %v1894_v22, %v971_v60  ;;  %v789_v22 = vmul.f32 %v1692_v28, %v1940_v45  ;;  %v811_v60 = vmul.f32 %v1872_v10, %v791_v33 }
 0x44d   :  { %v1003_v0 = vpop.permute.xlu1 %1002  ;;  %v997_v1 = vpop.permute.xlu0 %996  ;;  %1118 = vrot.lane.b32.xlu1 %v987_v63, %s1477_s27  ;;  %v809_v44 = vmul.f32 %v1870_v9, %v789_v22  ;;  %v790_v9 = vmul.f32 %v1701_v29, %v1952_v48  ;;  %v785_v22 = vsel %vm775_vm4, %v781_v31, %v1692_v28  ;;  %v777_v28 = vsel %vm775_vm4, %v1876_v12, %v1884_v15 }
 0x451   :  { %v2088_v25 = vpop.permute.xlu1 %1006  ;;  %v1001_v47 = vpop.permute.xlu0 %1000 }
 0x452   :  { %v1013_v10 = vsel %vm775_vm4, %v1001_v47, %v1003_v0 }
 0x455   :  { %v1011_v2 = vpop.permute.xlu1 %1010  ;;  %v2090_v23 = vpop.permute.xlu0 %1004 }
 0x459   :  { %v1027_v3 = vpop.permute.xlu1 %1026  ;;  %v1009_v4 = vpop.permute.xlu0 %1008 }
 0x45d   :  { %v1031_v5 = vpop.permute.xlu1 %1030  ;;  %v1025_v21 = vpop.permute.xlu0 %1024 }
 0x461   :  { %v855_v38 = vpop.permute.xlu1 %854  ;;  %v1029_v39 = vpop.permute.xlu0 %1028 }
 0x462   :  { %v865_v20 = vadd.f32 %v855_v38, %v849_v6  ;;  %v1033_v38 = vsel %vm774_vm3, %v1906_v32, %v1027_v3 }
 0x464   :  { %v869_v26 = vmul.f32 %v865_v20, %v1940_v45 }
 0x465   :  { %v859_v17 = vpop.permute.xlu1 %858  ;;  %v853_v57 = vpop.permute.xlu0 %852 }
 0x466   :  { %v873_v55 = vmul.f32 0.57735026, %v869_v26  ;;  %v867_v59 = vadd.f32 %v859_v17, %v851_v41  ;;  %v864_v50 = vadd.f32 %v853_v57, %v848_v40  ;;  %v1041_v40 = vmul.f32 %v1033_v38, %v785_v22 }
 0x467   :  { %v1035_v41 = vsel %vm774_vm3, %v1922_v36, %v1031_v5  ;;  %v1032_v26 = vsel %vm774_vm3, %v1898_v24, %v1025_v21  ;;  %v1012_v17 = vsel %vm775_vm4, %v997_v1, %v2082_v62  ;;  %v1021_v57 = vmul.f32 %v1013_v10, %v777_v28 }
 0x468   :  { %v871_v45 = vmul.f32 %v867_v59, %v1961_v52  ;;  %v868_v51 = vmul.f32 %v864_v50, %v1930_v42  ;;  %v2114_v56 = vsel %vm774_vm3, %v809_v44, %v873_v55  ;;  %v780_v42 = vsel %vm774_vm3, %v1882_v16, %v1687_v27 }
 0x469   :  { %v1055_v63 = vpop.permute.xlu1 %1054  ;;  %v857_v6 = vpop.permute.xlu0 %856  ;;  %v784_v0 = vsel %vm775_vm4, %v780_v42, %v1687_v27  ;;  %v1015_v36 = vsel %vm775_vm4, %v1009_v4, %v1011_v2  ;;  %v787_v24 = vsel %vm775_vm4, %v783_v7, %v1706_v30  ;;  %v782_v5 = vsel %vm774_vm3, %v1886_v18, %v1701_v29 }
 0x46a   :  { %v875_v35 = vmul.f32 0.57735026, %v871_v45  ;;  %v872_v61 = vmul.f32 0.57735026, %v868_v51  ;;  %v866_v52 = vadd.f32 %v857_v6, %v850_v37  ;;  %v1043_v12 = vmul.f32 %v1035_v41, %v787_v24 }
 0x46b   :  { %v1040_v15 = vmul.f32 %v1032_v26, %v784_v0  ;;  %v776_v27 = vsel %vm775_vm4, %v1874_v11, %v1882_v16  ;;  %v779_v62 = vsel %vm775_vm4, %v1880_v14, %v1888_v19  ;;  %v1077_v1 = vsel %vm774_vm3, %v1942_v46, %v1055_v63 }
 0x46c   :  { %v870_v20 = vmul.f32 %v866_v52, %v1952_v48  ;;  %v1124_v32 = vsel %vm774_vm3, %v808_v58, %v872_v61  ;;  %v2134_v3 = vsel %vm774_vm3, %v811_v60, %v875_v35  ;;  %v810_v48 = vmul.f32 %v1868_v8, %v790_v9 }
 0x46d   :  { %v1053_v54 = vpop.permute.xlu0 %1052  ;;  %v1059_v33 = vpop.permute.xlu1 %1058  ;;  %v1045_v2 = vsub.f32 %v1021_v57, %v1041_v40  ;;  %v1020_v21 = vmul.f32 %v1012_v17, %v776_v27  ;;  %v1023_v44 = vmul.f32 %v1015_v36, %v779_v62  ;;  %v1034_v55 = vsel %vm774_vm3, %v1914_v34, %v1029_v39 }
 0x46e   :  { %v874_v47 = vmul.f32 0.57735026, %v870_v20  ;;  %v786_v11 = vsel %vm775_vm4, %v782_v5, %v1701_v29  ;;  %v1014_v14 = vsel %vm775_vm4, %v2090_v23, %v2088_v25  ;;  %v1076_v31 = vsel %vm774_vm3, %v1932_v43, %v1053_v54 }
 0x46f   :  { %v1044_v19 = vsub.f32 %v1020_v21, %v1040_v15  ;;  %v1047_v46 = vsub.f32 %v1023_v44, %v1043_v12  ;;  %v1042_v50 = vmul.f32 %v1034_v55, %v786_v11  ;;  %v1079_v34 = vsel %vm774_vm3, %v1963_v53, %v1059_v33 }
 0x470   :  { %v1126_v8 = vsel %vm774_vm3, %v810_v48, %v874_v47  ;;  %v778_v29 = vsel %vm775_vm4, %v1878_v13, %v1886_v18 }
 0x471   :  { %v1057_v30 = vpop.permute.xlu0 %1056  ;;  %v1067_v4 = vpop.permute.xlu1 %1066  ;;  %v1022_v23 = vmul.f32 %v1014_v14, %v778_v29 }
 0x472   :  { %v1081_v59 = vsel %vm775_vm4, %v1077_v1, %v1067_v4  ;;  %v1078_v53 = vsel %vm774_vm3, %v1954_v49, %v1057_v30 }
 0x473   :  { %v1085_v16 = vmul.f32 %v1081_v59, %v1045_v2  ;;  %v1046_v63 = vsub.f32 %v1022_v23, %v1042_v50 }
 0x475   :  { %v1089_v39 = vmul.f32 0.70710677, %v1085_v16  ;;  %v1065_v37 = vpop.permute.xlu0 %1064  ;;  %v1071_v45 = vpop.permute.xlu1 %1070 }
 0x476   :  { %v1080_v51 = vsel %vm775_vm4, %v1076_v31, %v1065_v37  ;;  %v1083_v25 = vsel %vm775_vm4, %v1079_v34, %v1071_v45 }
 0x477   :  { %1142 = vst.msk [vmem:[%s2241_s8 + $0x28] sm:$0xff] %vm1138_vm5, %v1089_v39  ;;  %v1084_v43 = vmul.f32 %v1080_v51, %v1044_v19  ;;  %v1087_v58 = vmul.f32 %v1083_v25, %v1047_v46 }
 0x479   :  { %v1088_v9 = vmul.f32 0.70710677, %v1084_v43  ;;  %v1091_v60 = vmul.f32 0.70710677, %v1087_v58  ;;  %v1069_v6 = vpop.permute.xlu0 %1068 }
 0x47a   :  { %v1082_v13 = vsel %vm775_vm4, %v1078_v53, %v1069_v6 }
 0x47b   :  { %1139 = vst.msk [vmem:[%s2241_s8 + $0x10] sm:$0xff] %vm1138_vm5, %v1088_v9  ;;  %1148 = vst.msk [vmem:[%s2241_s8 + $0x58] sm:$0xff] %vm1138_vm5, %v1091_v60  ;;  %v1086_v18 = vmul.f32 %v1082_v13, %v1046_v63 }
 0x47d   :  { %v1090_v38 = vmul.f32 0.70710677, %v1086_v18 }
 0x47f   :  { %1145 = vst.msk [vmem:[%s2241_s8 + $0x40] sm:$0xff] %vm1138_vm5, %v1090_v38 }
 0x49c   :  { %v1097_v49 = vpop.permute.xlu0 %1096 }
 0x49d   :  { %v1128_v35 = vsel %vm775_vm4, %v1124_v32, %v1097_v49 }
 0x49e   :  { %1136 = vst [vmem:[%s2241_s8] sm:$0xff] %v1128_v35 }
 0x4a0   :  { %v1099_v61 = vpop.permute.xlu1 %1098 }
 0x4a1   :  { %v1129_v52 = vsel %vm775_vm4, %v2114_v56, %v1099_v61 }
 0x4a2   :  { %1140 = vst [vmem:[%s2241_s8 + $0x18] sm:$0xff] %v1129_v52 }
 0x4a7   :  { %v1113_v42 = vpop.permute.xlu0 %1112 }
 0x4a8   :  { %v1132_v7 = vsel %vm774_vm3, %v1097_v49, %v1113_v42 }
 0x4a9   :  { %1137 = vst [vmem:[%s2241_s8 + $0x8] sm:$0xff] %v1132_v7 }
 0x4ab   :  { %v1115_v22 = vpop.permute.xlu1 %1114 }
 0x4ac   :  { %v1133_v10 = vsel %vm774_vm3, %v1099_v61, %v1115_v22 }
 0x4ad   :  { %1141 = vst [vmem:[%s2241_s8 + $0x20] sm:$0xff] %v1133_v10 }
 0x4b0   :  { %v1101_v20 = vpop.permute.xlu0 %1100 }
 0x4b1   :  { %v1130_v56 = vsel %vm775_vm4, %v1126_v8, %v1101_v20 }
 0x4b2   :  { %1143 = vst [vmem:[%s2241_s8 + $0x30] sm:$0xff] %v1130_v56 }
 0x4b4   :  { %v1103_v32 = vpop.permute.xlu1 %1102 }
 0x4b5   :  { %v1131_v40 = vsel %vm775_vm4, %v2134_v3, %v1103_v32 }
 0x4b6   :  { %1146 = vst [vmem:[%s2241_s8 + $0x48] sm:$0xff] %v1131_v40 }
 0x4bb   :  { %v1117_v41 = vpop.permute.xlu0 %1116 }
 0x4bc   :  { %v1134_v26 = vsel %vm774_vm3, %v1101_v20, %v1117_v41 }
 0x4bd   :  { %1144 = vst [vmem:[%s2241_s8 + $0x38] sm:$0xff] %v1134_v26 }
 0x4bf   :  { %v1119_v54 = vpop.permute.xlu1 %1118 }
 0x4c0   :  { %v1135_v33 = vsel %vm774_vm3, %v1103_v32, %v1119_v54 }
 0x4c1   :  { %1147 = vst [vmem:[%s2241_s8 + $0x50] sm:$0xff] %v1135_v33 }

// kernel: interaction_block_forward.7
= control target key start
LH: loop header
LB: loop body
LE: loop exit
PB: predicated region body
PF: predicated region fallthrough
CT: control target
= control target key end

     0   :  { %15 = vsyncpa [#allocation3], 0  ;;  %s7297_s0 = inlined_call_operand.vmem [shape: f32[16,128], index: 0, kind: input, shape index: {}]   ;;  %s7298_s1 = inlined_call_operand.vmem [shape: s32[16,1], index: 1, kind: input, shape index: {}]   ;;  %s7299_s2 = inlined_call_operand.vmem [shape: f32[8,2048], index: 2, kind: input, shape index: {}]   ;;  %s7300_s3 = inlined_call_operand.vmem [shape: f32[8,512], index: 3, kind: input, shape index: {}]   ;;  %s7301_s4 = inlined_call_operand.vmem [shape: f32[8,128], index: 4, kind: input, shape index: {}]   ;;  %s7302_s5 = inlined_call_operand.vmem [shape: f32[8,6144], index: 5, kind: input, shape index: {}]   ;;  %s7303_s6 = inlined_call_operand.vmem [shape: f32[8,1536], index: 6, kind: input, shape index: {}]   ;;  %s7304_s7 = inlined_call_operand.vmem [shape: f32[8,384], index: 7, kind: input, shape index: {}]   ;;  %s7305_s8 = inlined_call_operand.vmem [shape: f32[32,1536], index: 8, kind: input, shape index: {}]   ;;  %s7306_s9 = inlined_call_operand.vmem [shape: f32[128,128], index: 9, kind: input, shape index: {}]   ;;  %s7307_s10 = inlined_call_operand.hbm [shape: f32[16,128], index: 10, kind: output, shape index: {}]  }
   0x1   :  { %17 = vsyncpa [#allocation3 + $0x1], 0  ;;  %s6205_s13 = smov 0   ;;  %s6207_s14 = smov 0  }
   0x2   :  { %s6209_s15 = smov 0   ;;  %s6211_s16 = smov 0  }
   0x3 LB: > { %s6226_s17 = sadd.s32 4294967295, %s6140_s16   ;;  %s5669_s18 = sadd.s32 4294967294, %s6140_s16   ;;  %s6140_s16 = sphi %s6211_s16, %s7335_s16   ;;  %s6136_s15 = sphi %s6209_s15, %s7334_s15   ;;  %s6132_s14 = sphi %s6207_s14, %s7333_s14   ;;  %s6128_s13 = sphi %s6205_s13, %s7332_s13  }
   0x4   : > { %s6230_s19 = sadd.s32 1, %s6140_s16   ;;  %s250_s20 = sadd.s32 1, %s6136_s15 }
   0x5   : > { %s247_s21 = ssub.s32 %s6140_s16, %s6230_s19  ;;  %p260_p0 = scmp.ne.s32.totalorder %s6136_s15, %s6132_s14 }
   0x6   : > { %p248_p1 = scmp.eq.s32.totalorder %s247_s21, 0  ;;  %p261_p2 = scmp.eq.s32.totalorder %s6226_s17, 1 }
   0x7   : > { %p266_p3 = scmp.ne.s32.totalorder %s6132_s14, %s6128_s13  ;;  %p267_p4 = scmp.eq.s32.totalorder %s5669_s18, 1 }
   0x8   : > { %s6241_s22 = scalar_select %p248_p1, %s6136_s15, %s250_s20  }
   0x9   : > { %p6243_p5 = por %p261_p2, %p260_p0  ;;  %p6247_p6 = por %p267_p4, %p266_p3 }
   0xa   : > { %p5672_p7 = scmp.ge.s32.totalorder %s6140_s16, 1  ;;  %p323_p8 = scmp.lt.s32.totalorder %s6140_s16, 3 }
   0xc   : > { %p324_p9 = pnand %p5672_p7, %p323_p8 }
   0xe   : > { %327 = sbr.rel (%p324_p9) target bundleno = 979 (0x3d3), region = 60 }
  0x15   : > { %p364_p10 = scmp.lt.s32.totalorder %s6226_s17, 1  ;;  %v383_v0 = vld [vmem:[%s7305_s8 + $0x8] sm:$0xff]  ;;  %v382_v2 = vld [vmem:[%s7305_s8] sm:$0xff]  ;;  %v6142_v3 = vmov 0   ;;  %v6143_v12 = vmov 0.0   ;;  %v385_v13 = vld [vmem:[%s7305_s8 + $0x18] sm:$0xff] }
  0x16   : > { %v395_v1 = vld [vmem:[%s7305_s8 + $0x68] sm:$0xff]  ;;  %6076 = vset.pattern.permute.xlu1 %v6142_v3  ;;  %v394_v5 = vld [vmem:[%s7305_s8 + $0x60] sm:$0xff]  ;;  %6077 = vset.pattern.permute.xlu0 %v6142_v3  ;;  %v397_v14 = vld [vmem:[%s7305_s8 + $0x78] sm:$0xff]  ;;  %s7308_s25 = smov 96   ;;  %s6145_s27 = smov 32   ;;  %vm430_vm0 = vcmask 261120  }
  0x17   : > { %v6263_v4 = vpack.c.bf16 %v395_v1, %v383_v0  ;;  %v407_v6 = vld [vmem:[%s7305_s8 + $0xc8] sm:$0xff]  ;;  %s365_s26 = scalar_select %p364_p10, %s6226_s17, 1  ;;  %v6275_v8 = vpack.c.bf16 %v394_v5, %v382_v2  ;;  %v406_v10 = vld [vmem:[%s7305_s8 + $0xc0] sm:$0xff]  ;;  %498 = vmatprep.mubr.f32.mxu0 %v6143_v12  ;;  %853 = vmatprep.mubr.f32.mxu1 %v6143_v12  ;;  %v6304_v16 = vpack.c.bf16 %v397_v14, %v385_v13  ;;  %v384_v18 = vld [vmem:[%s7305_s8 + $0x10] sm:$0xff]  ;;  %vm2166_vm2 = vcmask 64512  }
  0x18   : > { %v419_v7 = vld [vmem:[%s7305_s8 + $0x128] sm:$0xff]  ;;  %v418_v11 = vld [vmem:[%s7305_s8 + $0x120] sm:$0xff]  ;;  %v396_v19 = vld [vmem:[%s7305_s8 + $0x70] sm:$0xff]  ;;  %vm6147_vm3 = vmmov 0   ;;  %s7331_s20 = smov 96   ;;  %vm5482_vm4 = vcmask 523264  }
  0x19   : > { %v6277_v9 = vpack.c.bf16 %v419_v7, %v407_v6  ;;  %5815 = vmatprep.subr.bf16.mxu0 %v6263_v4  ;;  %s5674_s21 = sshll.u32 %s365_s26, 3  ;;  %v6295_v15 = vpack.c.bf16 %v418_v11, %v406_v10  ;;  %v409_v20 = vld [vmem:[%s7305_s8 + $0xd8] sm:$0xff]  ;;  %v6326_v23 = vpack.c.bf16 %v396_v19, %v384_v18  ;;  %v408_v25 = vld [vmem:[%s7305_s8 + $0xd0] sm:$0xff]  ;;  %v387_v27 = vld [vmem:[%s7305_s8 + $0x28] sm:$0xff]  ;;  %s5745_s30 = sshll.u32 %s6226_s17, 7 }
  0x1a   : > { %5817 = vmatpush1.bf16.msra.mxu0 %v6275_v8  ;;  %s367_s28 = scalar_lea.vmem %s7297_s0, %s5674_s21  ;;  %s371_s11 = scalar_lea.vmem %s7298_s1, %s5674_s21  ;;  %v421_v21 = vld [vmem:[%s7305_s8 + $0x138] sm:$0xff]  ;;  %v420_v26 = vld [vmem:[%s7305_s8 + $0x130] sm:$0xff]  ;;  %v399_v28 = vld [vmem:[%s7305_s8 + $0x88] sm:$0xff] }
  0x1b   : > { %5819 = vmatprep.subr.bf16.mxu0 %v6277_v9  ;;  %v6306_v17 = vld [vmem:[%s367_s28] sm:$0xff]  ;;  %v6328_v24 = vpack.c.bf16 %v421_v21, %v409_v20  ;;  %s7310_s21 = smov 64   ;;  %v393_v29 = vld [vmem:[%s7305_s8 + $0x58] sm:$0xff]  ;;  %v6353_v31 = vpack.c.bf16 %v420_v26, %v408_v25  ;;  %v392_v34 = vld [vmem:[%s7305_s8 + $0x50] sm:$0xff]  ;;  %v6365_v35 = vpack.c.bf16 %v399_v28, %v387_v27  ;;  %s6149_s17 = smov [#allocation2]  }
  0x1c   : > { %860 = vrot.lane.b32.xlu0 %v6306_v17, %s7308_s25  ;;  %1720 = vrot.lane.b32.xlu1 %v6306_v17, %s6145_s27  ;;  %v373_v22 = vld [vmem:[%s371_s11] sm:$0xff]  ;;  %v405_v30 = vld [vmem:[%s7305_s8 + $0xb8] sm:$0xff]  ;;  %s7330_s11 = smov 64   ;;  %s6082_s25 = sshll.u32 %s6149_s17, 4  ;;  %s6083_s25 = int_to_ptr.vmem [resolvable:$false] %s6082_s25 }
  0x1d   : > { %v386_v32 = vld [vmem:[%s7305_s8 + $0x20] sm:$0xff]  ;;  %v6359_v33 = vpack.c.bf16 %v405_v30, %v393_v29  ;;  %v411_v37 = vld [vmem:[%s7305_s8 + $0xe8] sm:$0xff]  ;;  %v404_v38 = vld [vmem:[%s7305_s8 + $0xb0] sm:$0xff] }
  0x1e   : > { %5821 = vmatpush1.bf16.msra.mxu0 %v6295_v15  ;;  %v398_v36 = vld [vmem:[%s7305_s8 + $0x80] sm:$0xff]  ;;  %v423_v39 = vld [vmem:[%s7305_s8 + $0x148] sm:$0xff]  ;;  %v6380_v40 = vpack.c.bf16 %v404_v38, %v392_v34  ;;  %v417_v41 = vld [vmem:[%s7305_s8 + $0x118] sm:$0xff] }
  0x1f   : > { %5823 = vmatprep.subr.bf16.mxu0 %v6304_v16  ;;  %5855 = vmatprep.subr.bf16.mxu1 %v6359_v33  ;;  %v429_v42 = vld [vmem:[%s7305_s8 + $0x178] sm:$0xff]  ;;  %v416_v44 = vld [vmem:[%s7305_s8 + $0x110] sm:$0xff]  ;;  %v6397_v46 = vpack.c.bf16 %v398_v36, %v386_v32  ;;  %v6401_v47 = vpack.c.bf16 %v423_v39, %v411_v37  ;;  %v410_v48 = vld [vmem:[%s7305_s8 + $0xe0] sm:$0xff] }
  0x20   : > { %1290 = vrot.lane.b32.xlu0 %v6306_v17, %s7310_s21  ;;  %377 = vperm.xlu1 %6076, %v373_v22   ;;  %v6388_v43 = vpack.c.bf16 %v429_v42, %v417_v41  ;;  %v428_v45 = vld [vmem:[%s7305_s8 + $0x170] sm:$0xff]  ;;  %v422_v49 = vld [vmem:[%s7305_s8 + $0x140] sm:$0xff]  ;;  %v389_v51 = vld [vmem:[%s7305_s8 + $0x38] sm:$0xff] }
  0x21   : > { %5677 = vmatmul.mubr.msk.f32.vlgmr.msra.gmra.mrb[0].mxu0 %vm430_vm0, %v6306_v17  ;;  %5857 = vmatpush1.bf16.msra.mxu1 %v6380_v40  ;;  %v6410_v50 = vpack.c.bf16 %v428_v45, %v416_v44  ;;  %v401_v52 = vld [vmem:[%s7305_s8 + $0x98] sm:$0xff]  ;;  %v6421_v53 = vpack.c.bf16 %v422_v49, %v410_v48  ;;  %v388_v55 = vld [vmem:[%s7305_s8 + $0x30] sm:$0xff]  ;;  %v391_v63 = vld [vmem:[%s7305_s8 + $0x48] sm:$0xff] }
  0x22   : > { %5825 = vmatpush1.bf16.msra.mxu0 %v6326_v23  ;;  %569 = vmatprep.mubr.f32.mxu0 %v6143_v12  ;;  %v6425_v54 = vpack.c.bf16 %v401_v52, %v389_v51  ;;  %v400_v56 = vld [vmem:[%s7305_s8 + $0x90] sm:$0xff]  ;;  %v413_v57 = vld [vmem:[%s7305_s8 + $0xf8] sm:$0xff]  ;;  %v403_v0 = vld [vmem:[%s7305_s8 + $0xa8] sm:$0xff] }
  0x23   : > { %5827 = vmatprep.subr.bf16.mxu0 %v6328_v24  ;;  %5859 = vmatprep.subr.bf16.mxu1 %v6388_v43  ;;  %v425_v58 = vld [vmem:[%s7305_s8 + $0x158] sm:$0xff]  ;;  %v6442_v59 = vpack.c.bf16 %v400_v56, %v388_v55  ;;  %v412_v61 = vld [vmem:[%s7305_s8 + $0xf0] sm:$0xff]  ;;  %v6471_v2 = vpack.c.bf16 %v403_v0, %v391_v63  ;;  %v390_v3 = vld [vmem:[%s7305_s8 + $0x40] sm:$0xff] }
  0x24   : > { %v6447_v60 = vpack.c.bf16 %v425_v58, %v413_v57  ;;  %v424_v62 = vld [vmem:[%s7305_s8 + $0x150] sm:$0xff]  ;;  %v402_v5 = vld [vmem:[%s7305_s8 + $0xa0] sm:$0xff]  ;;  %v415_v6 = vld [vmem:[%s7305_s8 + $0x108] sm:$0xff] }
  0x25   : > { %5861 = vmatpush1.bf16.msra.mxu1 %v6410_v50  ;;  %v6467_v1 = vpack.c.bf16 %v424_v62, %v412_v61  ;;  %v427_v7 = vld [vmem:[%s7305_s8 + $0x168] sm:$0xff]  ;;  %v6488_v10 = vpack.c.bf16 %v402_v5, %v390_v3  ;;  %v414_v13 = vld [vmem:[%s7305_s8 + $0x100] sm:$0xff]  ;;  %v2153_v20 = vld [vmem:[%s7299_s2 + $0x18] sm:$0xff] }
  0x26   : > { %5829 = vmatpush1.bf16.msra.mxu0 %v6353_v31  ;;  %5871 = vmatprep.subr.bf16.mxu1 %v6304_v16  ;;  %v6491_v11 = vpack.c.bf16 %v427_v7, %v415_v6  ;;  %v426_v14 = vld [vmem:[%s7305_s8 + $0x160] sm:$0xff]  ;;  %v2152_v22 = vld [vmem:[%s7299_s2 + $0x10] sm:$0xff]  ;;  %v2159_v28 = vld [vmem:[%s7299_s2 + $0x48] sm:$0xff] }
  0x27   : > { %5831 = vmatprep.subr.bf16.mxu0 %v6365_v35  ;;  %v6502_v18 = vpack.c.bf16 %v426_v14, %v414_v13  ;;  %v2150_v21 = vld [vmem:[%s7299_s2] sm:$0xff]  ;;  %v2156_v27 = vld [vmem:[%s7299_s2 + $0x30] sm:$0xff]  ;;  %v2161_v29 = vld [vmem:[%s7299_s2 + $0x58] sm:$0xff] }
  0x28   : > { %5682 = vmatmul.mubr.msk.f32.vlgmr.msra.gmra.mrb[0].mxu1 %vm430_vm0, %v6306_v17  ;;  %v2154_v26 = vld [vmem:[%s7299_s2 + $0x20] sm:$0xff]  ;;  %v2163_v32 = vld [vmem:[%s7299_s2 + $0x68] sm:$0xff]  ;;  %v2741_v37 = vld [vmem:[%s7300_s3 + $0x18] sm:$0xff] }
  0x29   : > { %5678 = vmatmul.mubr.msk.f32.vlgmr.msra.gmra.mrb[2].mxu0 %vm430_vm0, %v6306_v17  ;;  %5873 = vmatpush1.bf16.msra.mxu1 %v6326_v23  ;;  %v2158_v30 = vld [vmem:[%s7299_s2 + $0x40] sm:$0xff]  ;;  %v2739_v36 = vld [vmem:[%s7300_s3 + $0x8] sm:$0xff]  ;;  %v2740_v39 = vld [vmem:[%s7300_s3 + $0x10] sm:$0xff] }
  0x2a   : > { %5833 = vmatpush1.bf16.msra.mxu0 %v6397_v46  ;;  %640 = vmatprep.mubr.f32.mxu0 %v6143_v12  ;;  %v2162_v34 = vld [vmem:[%s7299_s2 + $0x60] sm:$0xff]  ;;  %v3017_v44 = vld [vmem:[%s7302_s5 + $0x28] sm:$0xff]  ;;  %v3014_v45 = vld [vmem:[%s7302_s5 + $0x10] sm:$0xff] }
  0x2b   : > { %5835 = vmatprep.subr.bf16.mxu0 %v6401_v47  ;;  %5875 = vmatprep.subr.bf16.mxu1 %v6328_v24  ;;  %v2738_v38 = vld [vmem:[%s7300_s3] sm:$0xff]  ;;  %v3021_v48 = vld [vmem:[%s7302_s5 + $0x48] sm:$0xff]  ;;  %v3018_v49 = vld [vmem:[%s7302_s5 + $0x30] sm:$0xff] }
  0x2c   : > { %999 = vmatprep.mubr.f32.mxu1 %v6143_v12  ;;  %v2884_v41 = vld [vmem:[%s7301_s4] sm:$0xff]  ;;  %v3023_v51 = vld [vmem:[%s7302_s5 + $0x58] sm:$0xff]  ;;  %v3025_v52 = vld [vmem:[%s7302_s5 + $0x68] sm:$0xff] }
  0x2d   : > { %5877 = vmatpush1.bf16.msra.mxu1 %v6353_v31  ;;  %v3012_v42 = vld [vmem:[%s7302_s5] sm:$0xff]  ;;  %v3027_v55 = vld [vmem:[%s7302_s5 + $0x78] sm:$0xff]  ;;  %v3029_v56 = vld [vmem:[%s7302_s5 + $0x88] sm:$0xff] }
  0x2e   : > { %5837 = vmatpush1.bf16.msra.mxu0 %v6421_v53  ;;  %5887 = vmatprep.subr.bf16.mxu1 %v6425_v54  ;;  %v3026_v57 = vld [vmem:[%s7302_s5 + $0x70] sm:$0xff]  ;;  %v3028_v58 = vld [vmem:[%s7302_s5 + $0x80] sm:$0xff]  ;;  %v3039_v6 = vld [vmem:[%s7302_s5 + $0xd8] sm:$0xff] }
  0x2f   : > { %5839 = vmatprep.subr.bf16.mxu0 %v6425_v54  ;;  %v3030_v62 = vld [vmem:[%s7302_s5 + $0x90] sm:$0xff]  ;;  %v3032_v0 = vld [vmem:[%s7302_s5 + $0xa0] sm:$0xff]  ;;  %v3041_v7 = vld [vmem:[%s7302_s5 + $0xe8] sm:$0xff] }
  0x30   : > { %v3034_v3 = vld [vmem:[%s7302_s5 + $0xb0] sm:$0xff]  ;;  %v3036_v5 = vld [vmem:[%s7302_s5 + $0xc0] sm:$0xff] }
  0x31   : > { %5679 = vmatmul.mubr.msk.f32.vlgmr.msra.gmra.mrb[4].mxu0 %vm430_vm0, %v6306_v17  ;;  %v3040_v14 = vld [vmem:[%s7302_s5 + $0xe0] sm:$0xff] }
  0x32   : > { %5841 = vmatpush1.bf16.msra.mxu0 %v6442_v59  ;;  %711 = vmatprep.mubr.f32.mxu0 %v6143_v12 }
  0x33   : > { %5843 = vmatprep.subr.bf16.mxu0 %v6447_v60 }
  0x36   : > { %5845 = vmatpush1.bf16.msra.mxu0 %v6467_v1 }
  0x37   : > { %5847 = vmatprep.subr.bf16.mxu0 %v6471_v2 }
  0x39   : > { %5680 = vmatmul.mubr.msk.f32.vlgmr.msra.gmra.mrb[6].mxu0 %vm430_vm0, %v6306_v17 }
  0x3a   : > { %5849 = vmatpush1.bf16.msra.mxu0 %v6488_v10  ;;  %782 = vmatprep.mubr.f32.mxu0 %v6143_v12 }
  0x3b   : > { %5851 = vmatprep.subr.bf16.mxu0 %v6491_v11 }
  0x3e   : > { %5853 = vmatpush1.bf16.msra.mxu0 %v6502_v18 }
  0x3f   : > { %5863 = vmatprep.subr.bf16.mxu0 %v6263_v4 }
  0x41   : > { %5681 = vmatmul.mubr.msk.f32.vlgmr.msra.gmra.mrb[8].mxu0 %vm430_vm0, %v6306_v17 }
  0x42   : > { %5865 = vmatpush1.bf16.msra.mxu0 %v6275_v8  ;;  %928 = vmatprep.mubr.f32.mxu0 %v6143_v12 }
  0x43   : > { %5867 = vmatprep.subr.bf16.mxu0 %v6277_v9 }
  0x46   : > { %5869 = vmatpush1.bf16.msra.mxu0 %v6295_v15 }
  0x47   : > { %5879 = vmatprep.subr.bf16.mxu0 %v6365_v35 }
  0x8e   : > { %v861_v19 = vpop.permute.xlu0 %860 }
  0x8f   : > { %5683 = vmatmul.mubr.msk.f32.vlgmr.msra.gmra.mrb[10].mxu0 %vm430_vm0, %v861_v19  ;;  %5684 = vmatmul.mubr.msk.f32.vlgmr.msra.gmra.mrb[2].mxu1 %vm430_vm0, %v861_v19 }
  0x90   : > { %5881 = vmatpush1.bf16.msra.mxu0 %v6397_v46  ;;  %5889 = vmatpush1.bf16.msra.mxu1 %v6442_v59 }
  0x91   : > { %5883 = vmatprep.subr.bf16.mxu0 %v6401_v47  ;;  %5891 = vmatprep.subr.bf16.mxu1 %v6447_v60 }
  0x92   : > { %1070 = vmatprep.mubr.f32.mxu0 %v6143_v12  ;;  %1141 = vmatprep.mubr.f32.mxu1 %v6143_v12  ;;  %v1291_v17 = vpop.permute.xlu0 %1290 }
  0x94   : > { %5885 = vmatpush1.bf16.msra.mxu0 %v6421_v53  ;;  %5893 = vmatpush1.bf16.msra.mxu1 %v6467_v1 }
  0x95   : > { %5895 = vmatprep.subr.bf16.mxu0 %v6471_v2  ;;  %5903 = vmatprep.subr.bf16.mxu1 %v6359_v33 }
  0x97   : > { %5685 = vmatmul.mubr.msk.f32.vlgmr.msra.gmra.mrb[12].mxu0 %vm430_vm0, %v861_v19  ;;  %5686 = vmatmul.mubr.msk.f32.vlgmr.msra.gmra.mrb[4].mxu1 %vm430_vm0, %v861_v19 }
  0x98   : > { %5897 = vmatpush1.bf16.msra.mxu0 %v6488_v10  ;;  %5905 = vmatpush1.bf16.msra.mxu1 %v6380_v40 }
  0x99   : > { %5899 = vmatprep.subr.bf16.mxu0 %v6491_v11  ;;  %5907 = vmatprep.subr.bf16.mxu1 %v6388_v43 }
  0x9a   : > { %1212 = vmatprep.mubr.f32.mxu0 %v6143_v12  ;;  %1283 = vmatprep.mubr.f32.mxu1 %v6143_v12 }
  0x9c   : > { %5901 = vmatpush1.bf16.msra.mxu0 %v6502_v18  ;;  %5909 = vmatpush1.bf16.msra.mxu1 %v6410_v50 }
  0x9d   : > { %5911 = vmatprep.subr.bf16.mxu0 %v6263_v4  ;;  %5919 = vmatprep.subr.bf16.mxu1 %v6304_v16 }
  0x9f   : > { %5687 = vmatmul.mubr.msk.f32.vlgmr.msra.gmra.mrb[14].mxu0 %vm430_vm0, %v861_v19  ;;  %5688 = vmatmul.mubr.msk.f32.vlgmr.msra.gmra.mrb[6].mxu1 %vm430_vm0, %v861_v19  ;;  %v3045_v19 = vld [vmem:[%s7302_s5 + $0x108] sm:$0xff] }
  0xa0   : > { %5913 = vmatpush1.bf16.msra.mxu0 %v6275_v8  ;;  %5921 = vmatpush1.bf16.msra.mxu1 %v6326_v23 }
  0xa1   : > { %5915 = vmatprep.subr.bf16.mxu0 %v6277_v9  ;;  %5923 = vmatprep.subr.bf16.mxu1 %v6328_v24 }
  0xa2   : > { %1358 = vmatprep.mubr.f32.mxu0 %v6143_v12  ;;  %1429 = vmatprep.mubr.f32.mxu1 %v6143_v12 }
  0xa4   : > { %5917 = vmatpush1.bf16.msra.mxu0 %v6295_v15  ;;  %5925 = vmatpush1.bf16.msra.mxu1 %v6353_v31 }
  0xa5   : > { %5927 = vmatprep.subr.bf16.mxu0 %v6365_v35  ;;  %5935 = vmatprep.subr.bf16.mxu1 %v6425_v54 }
  0xa7   : > { %5689 = vmatmul.mubr.msk.f32.vlgmr.msra.gmra.mrb[16].mxu0 %vm430_vm0, %v1291_v17  ;;  %5690 = vmatmul.mubr.msk.f32.vlgmr.msra.gmra.mrb[8].mxu1 %vm430_vm0, %v1291_v17 }
  0xa8   : > { %5929 = vmatpush1.bf16.msra.mxu0 %v6397_v46  ;;  %5937 = vmatpush1.bf16.msra.mxu1 %v6442_v59 }
  0xa9   : > { %5931 = vmatprep.subr.bf16.mxu0 %v6401_v47  ;;  %5939 = vmatprep.subr.bf16.mxu1 %v6447_v60 }
  0xaa   : > { %1500 = vmatprep.mubr.f32.mxu0 %v6143_v12  ;;  %1571 = vmatprep.mubr.f32.mxu1 %v6143_v12 }
  0xac   : > { %5933 = vmatpush1.bf16.msra.mxu0 %v6421_v53  ;;  %5941 = vmatpush1.bf16.msra.mxu1 %v6467_v1 }
  0xad   : > { %5943 = vmatprep.subr.bf16.mxu0 %v6471_v2  ;;  %5951 = vmatprep.subr.bf16.mxu1 %v6359_v33 }
  0xaf   : > { %5691 = vmatmul.mubr.msk.f32.vlgmr.msra.gmra.mrb[18].mxu0 %vm430_vm0, %v1291_v17  ;;  %5692 = vmatmul.mubr.msk.f32.vlgmr.msra.gmra.mrb[10].mxu1 %vm430_vm0, %v1291_v17 }
  0xb0   : > { %5945 = vmatpush1.bf16.msra.mxu0 %v6488_v10  ;;  %5953 = vmatpush1.bf16.msra.mxu1 %v6380_v40 }
  0xb1   : > { %5947 = vmatprep.subr.bf16.mxu0 %v6491_v11  ;;  %5955 = vmatprep.subr.bf16.mxu1 %v6388_v43 }
  0xb2   : > { %1642 = vmatprep.mubr.f32.mxu0 %v6143_v12  ;;  %1713 = vmatprep.mubr.f32.mxu1 %v6143_v12 }
  0xb4   : > { %5949 = vmatpush1.bf16.msra.mxu0 %v6502_v18  ;;  %5957 = vmatpush1.bf16.msra.mxu1 %v6410_v50 }
  0xb5   : > { %5959 = vmatprep.subr.bf16.mxu0 %v6263_v4  ;;  %5967 = vmatprep.subr.bf16.mxu1 %v6304_v16  ;;  %v1721_v4 = vpop.permute.xlu1 %1720 }
  0xb7   : > { %5693 = vmatmul.mubr.msk.f32.vlgmr.msra.gmra.mrb[20].mxu0 %vm430_vm0, %v1291_v17  ;;  %5694 = vmatmul.mubr.msk.f32.vlgmr.msra.gmra.mrb[12].mxu1 %vm430_vm0, %v1291_v17  ;;  %v3042_v17 = vld [vmem:[%s7302_s5 + $0xf0] sm:$0xff] }
  0xb8   : > { %5961 = vmatpush1.bf16.msra.mxu0 %v6275_v8  ;;  %5969 = vmatpush1.bf16.msra.mxu1 %v6326_v23  ;;  %v374_v8 = vlaneseq  ;;  %v2155_v23 = vld [vmem:[%s7299_s2 + $0x28] sm:$0xff] }
  0xb9   : > { %5963 = vmatprep.subr.bf16.mxu0 %v6277_v9  ;;  %5971 = vmatprep.subr.bf16.mxu1 %v6328_v24  ;;  %v378_v16 = vpop.permute.xlu1 %377  ;;  %v2157_v24 = vld [vmem:[%s7299_s2 + $0x38] sm:$0xff] }
  0xba   : > { %1788 = vmatprep.mubr.f32.mxu0 %v6143_v12  ;;  %1859 = vmatprep.mubr.f32.mxu1 %v6143_v12  ;;  %v375_v9 = vand.u32 127, %v374_v8  ;;  %v3044_v8 = vld [vmem:[%s7302_s5 + $0x100] sm:$0xff] }
  0xbc   : > { %5965 = vmatpush1.bf16.msra.mxu0 %v6295_v15  ;;  %5973 = vmatpush1.bf16.msra.mxu1 %v6353_v31  ;;  %v2151_v15 = vld [vmem:[%s7299_s2 + $0x8] sm:$0xff]  ;;  %vm379_vm1 = vcmp.eq.s32.totalorder %v378_v16, %v375_v9  ;;  %v2160_v31 = vld [vmem:[%s7299_s2 + $0x50] sm:$0xff] }
  0xbd   : > { %5975 = vmatprep.subr.bf16.mxu0 %v6365_v35  ;;  %5983 = vmatprep.subr.bf16.mxu1 %v6425_v54  ;;  %v6630_v25 = vsel %vm379_vm1, 1.0, %v6143_v12  ;;  %v2164_v35 = vld [vmem:[%s7299_s2 + $0x70] sm:$0xff]  ;;  %v3024_v54 = vld [vmem:[%s7302_s5 + $0x60] sm:$0xff]  ;;  %v3049_v16 = vld [vmem:[%s7302_s5 + $0x128] sm:$0xff] }
  0xbf   : > { %5695 = vmatmul.mubr.msk.f32.vlgmr.msra.gmra.mrb[22].mxu0 %vm430_vm0, %v1721_v4  ;;  %5696 = vmatmul.mubr.msk.f32.vlgmr.msra.gmra.mrb[14].mxu1 %vm430_vm0, %v1721_v4 }
  0xc0   : > { %5977 = vmatpush1.bf16.msra.mxu0 %v6397_v46  ;;  %5985 = vmatpush1.bf16.msra.mxu1 %v6442_v59  ;;  %v3016_v46 = vld [vmem:[%s7302_s5 + $0x20] sm:$0xff]  ;;  %v3031_v59 = vld [vmem:[%s7302_s5 + $0x98] sm:$0xff] }
  0xc1   : > { %5979 = vmatprep.subr.bf16.mxu0 %v6401_v47  ;;  %5987 = vmatprep.subr.bf16.mxu1 %v6447_v60  ;;  %v3019_v47 = vld [vmem:[%s7302_s5 + $0x38] sm:$0xff]  ;;  %v3033_v60 = vld [vmem:[%s7302_s5 + $0xa8] sm:$0xff] }
  0xc2   : > { %1930 = vmatprep.mubr.f32.mxu0 %v6143_v12  ;;  %2001 = vmatprep.mubr.f32.mxu1 %v6143_v12 }
  0xc4   : > { %5981 = vmatpush1.bf16.msra.mxu0 %v6421_v53  ;;  %5989 = vmatpush1.bf16.msra.mxu1 %v6467_v1  ;;  %v3022_v53 = vld [vmem:[%s7302_s5 + $0x50] sm:$0xff]  ;;  %v3035_v1 = vld [vmem:[%s7302_s5 + $0xb8] sm:$0xff] }
  0xc5   : > { %5991 = vmatprep.subr.bf16.mxu0 %v6471_v2  ;;  %5999 = vmatprep.subr.bf16.mxu1 %v6359_v33  ;;  %v2165_v33 = vld [vmem:[%s7299_s2 + $0x78] sm:$0xff]  ;;  %v3037_v2 = vld [vmem:[%s7302_s5 + $0xc8] sm:$0xff] }
  0xc7   : > { %5697 = vmatmul.mubr.msk.f32.vlgmr.msra.gmra.mrb[24].mxu0 %vm430_vm0, %v1721_v4  ;;  %5698 = vmatmul.mubr.msk.f32.vlgmr.msra.gmra.mrb[16].mxu1 %vm430_vm0, %v1721_v4 }
  0xc8   : > { %5993 = vmatpush1.bf16.msra.mxu0 %v6488_v10  ;;  %6001 = vmatpush1.bf16.msra.mxu1 %v6380_v40  ;;  %v3013_v40 = vld [vmem:[%s7302_s5 + $0x8] sm:$0xff] }
  0xc9   : > { %5995 = vmatprep.subr.bf16.mxu0 %v6491_v11  ;;  %6003 = vmatprep.subr.bf16.mxu1 %v6388_v43  ;;  %v3015_v43 = vld [vmem:[%s7302_s5 + $0x18] sm:$0xff]  ;;  %v3038_v11 = vld [vmem:[%s7302_s5 + $0xd0] sm:$0xff] }
  0xca   : > { %2072 = vmatprep.mubr.f32.mxu0 %v6143_v12  ;;  %2143 = vmatprep.mubr.f32.mxu1 %v6143_v12 }
  0xcc   : > { %5997 = vmatpush1.bf16.msra.mxu0 %v6502_v18  ;;  %6005 = vmatpush1.bf16.msra.mxu1 %v6410_v50  ;;  %v3020_v50 = vld [vmem:[%s7302_s5 + $0x40] sm:$0xff]  ;;  %v3043_v18 = vld [vmem:[%s7302_s5 + $0xf8] sm:$0xff] }
  0xcd   : > { %2170 = vmatprep.subr.mxu0 %v2151_v15  ;;  %2241 = vmatprep.subr.mxu1 %v2153_v20  ;;  %v3047_v15 = vld [vmem:[%s7302_s5 + $0x118] sm:$0xff] }
  0xcf   : > { %5699 = vmatmul.mubr.msk.f32.vlgmr.msra.gmra.mrb[26].mxu0 %vm430_vm0, %v1721_v4  ;;  %5700 = vmatmul.mubr.msk.f32.vlgmr.msra.gmra.mrb[18].mxu1 %vm430_vm0, %v1721_v4 }
  0xd0   : > { %2171 = vmatpush1.msra.mxu0 %v2150_v21  ;;  %2234 = vmatprep.mubr.f32.mxu0 %v6143_v12  ;;  %v3046_v21 = vld [vmem:[%s7302_s5 + $0x110] sm:$0xff] }
  0xd1   : > { %2242 = vmatpush1.msra.mxu1 %v2152_v22  ;;  %2305 = vmatprep.mubr.f32.mxu1 %v6143_v12 }
  0xd2   : > { %2312 = vmatprep.subr.mxu0 %v2155_v23  ;;  %2383 = vmatprep.subr.mxu1 %v2157_v24  ;;  %v3048_v23 = vld [vmem:[%s7302_s5 + $0x120] sm:$0xff]  ;;  %v3051_v24 = vld [vmem:[%s7302_s5 + $0x138] sm:$0xff] }
  0xd3   : > { %5701 = vmatmul.mubr.msk.f32.vlgmr.msra.gmra.mrb[28].mxu0 %vm2166_vm2, %v6630_v25  ;;  %5702 = vmatmul.mubr.msk.f32.vlgmr.msra.gmra.mrb[20].mxu1 %vm2166_vm2, %v6630_v25 }
  0xd4   : > { %2313 = vmatpush1.msra.mxu0 %v2154_v26  ;;  %2376 = vmatprep.mubr.f32.mxu0 %v6143_v12  ;;  %v3053_v26 = vld [vmem:[%s7302_s5 + $0x148] sm:$0xff] }
  0xd5   : > { %2384 = vmatpush1.msra.mxu1 %v2156_v27  ;;  %2447 = vmatprep.mubr.f32.mxu1 %v6143_v12  ;;  %v3050_v27 = vld [vmem:[%s7302_s5 + $0x130] sm:$0xff] }
  0xd6   : > { %2454 = vmatprep.subr.mxu0 %v2159_v28  ;;  %2525 = vmatprep.subr.mxu1 %v2161_v29  ;;  %v3052_v28 = vld [vmem:[%s7302_s5 + $0x140] sm:$0xff]  ;;  %v3055_v29 = vld [vmem:[%s7302_s5 + $0x158] sm:$0xff] }
  0xd7   : > { %5703 = vmatmul.mubr.msk.f32.vlgmr.msra.gmra.mrb[30].mxu0 %vm2166_vm2, %v6630_v25  ;;  %5704 = vmatmul.mubr.msk.f32.vlgmr.msra.gmra.mrb[22].mxu1 %vm2166_vm2, %v6630_v25 }
  0xd8   : > { %2455 = vmatpush1.msra.mxu0 %v2158_v30  ;;  %2518 = vmatprep.mubr.f32.mxu0 %v6143_v12  ;;  %v3057_v30 = vld [vmem:[%s7302_s5 + $0x168] sm:$0xff] }
  0xd9   : > { %2526 = vmatpush1.msra.mxu1 %v2160_v31  ;;  %2589 = vmatprep.mubr.f32.mxu1 %v6143_v12 }
  0xda   : > { %2596 = vmatprep.subr.mxu0 %v2163_v32  ;;  %2667 = vmatprep.subr.mxu1 %v2165_v33  ;;  %v3054_v32 = vld [vmem:[%s7302_s5 + $0x150] sm:$0xff] }
  0xdb   : > { %5705 = vmatmul.mubr.msk.f32.vlgmr.msra.gmra.mrb[32].mxu0 %vm2166_vm2, %v6630_v25  ;;  %5706 = vmatmul.mubr.msk.f32.vlgmr.msra.gmra.mrb[24].mxu1 %vm2166_vm2, %v6630_v25 }
  0xdc   : > { %2597 = vmatpush1.msra.mxu0 %v2162_v34  ;;  %2660 = vmatprep.mubr.f32.mxu0 %v6143_v12  ;;  %v3056_v34 = vld [vmem:[%s7302_s5 + $0x160] sm:$0xff] }
  0xdd   : > { %2668 = vmatpush1.msra.mxu1 %v2164_v35  ;;  %2731 = vmatprep.mubr.f32.mxu1 %v6143_v12  ;;  %v3059_v35 = vld [vmem:[%s7302_s5 + $0x178] sm:$0xff] }
  0xde   : > { %2742 = vmatprep.subr.mxu0 %v2739_v36  ;;  %2813 = vmatprep.subr.mxu1 %v2741_v37  ;;  %v4765_v36 = vld [vmem:[%s7303_s6 + $0x8] sm:$0xff]  ;;  %v3058_v37 = vld [vmem:[%s7302_s5 + $0x170] sm:$0xff] }
  0xdf   : > { %5707 = vmatmul.mubr.msk.f32.vlgmr.msra.gmra.mrb[34].mxu0 %vm2166_vm2, %v6630_v25  ;;  %5708 = vmatmul.mubr.msk.f32.vlgmr.msra.gmra.mrb[26].mxu1 %vm2166_vm2, %v6630_v25 }
  0xe0   : > { %2743 = vmatpush1.msra.mxu0 %v2738_v38  ;;  %2806 = vmatprep.mubr.f32.mxu0 %v6143_v12  ;;  %v4764_v38 = vld [vmem:[%s7303_s6] sm:$0xff] }
  0xe1   : > { %2814 = vmatpush1.msra.mxu1 %v2740_v39  ;;  %2877 = vmatprep.mubr.f32.mxu1 %v6143_v12  ;;  %v4767_v39 = vld [vmem:[%s7303_s6 + $0x18] sm:$0xff] }
  0xe2   : > { %5769 = vmatprep.subr.mxu0 %v6143_v12  ;;  %3060 = vmatprep.subr.mxu1 %v3013_v40  ;;  %v4769_v40 = vld [vmem:[%s7303_s6 + $0x28] sm:$0xff] }
  0xe3   : > { %5709 = vmatmul.mubr.msk.f32.vlgmr.msra.gmra.mrb[36].mxu0 %vm2166_vm2, %v6630_v25  ;;  %5710 = vmatmul.mubr.msk.f32.vlgmr.msra.gmra.mrb[28].mxu1 %vm2166_vm2, %v6630_v25 }
  0xe4   : > { %5770 = vmatpush3.msra.mxu0 %v2884_v41  ;;  %5771 = vmatprep.mubr.msk.f32.mxu0 %vm6147_vm3, %v6143_v12 }
  0xe5   : > { %3061 = vmatpush1.msra.mxu1 %v3012_v42  ;;  %3124 = vmatprep.mubr.f32.mxu1 %v6143_v12  ;;  %v4766_v42 = vld [vmem:[%s7303_s6 + $0x10] sm:$0xff] }
  0xe6   : > { %3131 = vmatprep.subr.mxu0 %v3015_v43  ;;  %3202 = vmatprep.subr.mxu1 %v3017_v44  ;;  %v4768_v44 = vld [vmem:[%s7303_s6 + $0x20] sm:$0xff] }
  0xe7   : > { %5772 = vmatmul.mubr.msk.f32.vlgmr.msra.gmra.mrb[38].mxu0 %vm2166_vm2, %v6630_v25  ;;  %5712 = vmatmul.mubr.msk.f32.vlgmr.msra.gmra.mrb[30].mxu1 %vm2166_vm2, %v6630_v25 }
  0xe8   : > { %3132 = vmatpush1.msra.mxu0 %v3014_v45  ;;  %3195 = vmatprep.mubr.f32.mxu0 %v6143_v12  ;;  %v4771_v45 = vld [vmem:[%s7303_s6 + $0x38] sm:$0xff] }
  0xe9   : > { %3203 = vmatpush1.msra.mxu1 %v3016_v46  ;;  %3266 = vmatprep.mubr.f32.mxu1 %v6143_v12  ;;  %v4773_v46 = vld [vmem:[%s7303_s6 + $0x48] sm:$0xff] }
  0xea   : > { %3273 = vmatprep.subr.mxu0 %v3019_v47  ;;  %3344 = vmatprep.subr.mxu1 %v3021_v48  ;;  %v4770_v47 = vld [vmem:[%s7303_s6 + $0x30] sm:$0xff]  ;;  %v4772_v48 = vld [vmem:[%s7303_s6 + $0x40] sm:$0xff] }
  0xeb   : > { %5713 = vmatmul.mubr.msk.f32.vlgmr.msra.gmra.mrb[40].mxu0 %vm2166_vm2, %v6630_v25  ;;  %5714 = vmatmul.mubr.msk.f32.vlgmr.msra.gmra.mrb[32].mxu1 %vm2166_vm2, %v6630_v25 }
  0xec   : > { %3274 = vmatpush1.msra.mxu0 %v3018_v49  ;;  %3337 = vmatprep.mubr.f32.mxu0 %v6143_v12  ;;  %v4775_v49 = vld [vmem:[%s7303_s6 + $0x58] sm:$0xff] }
  0xed   : > { %3345 = vmatpush1.msra.mxu1 %v3020_v50  ;;  %3408 = vmatprep.mubr.f32.mxu1 %v6143_v12  ;;  %v5203_v50 = vld [vmem:[%s7304_s7 + $0x8] sm:$0xff] }
  0xee   : > { %3415 = vmatprep.subr.mxu0 %v3023_v51  ;;  %3486 = vmatprep.subr.mxu1 %v3025_v52  ;;  %v4774_v51 = vld [vmem:[%s7303_s6 + $0x50] sm:$0xff]  ;;  %v5202_v52 = vld [vmem:[%s7304_s7] sm:$0xff] }
  0xef   : > { %5715 = vmatmul.mubr.msk.f32.vlgmr.msra.gmra.mrb[42].mxu0 %vm2166_vm2, %v6630_v25  ;;  %5716 = vmatmul.mubr.msk.f32.vlgmr.msra.gmra.mrb[34].mxu1 %vm2166_vm2, %v6630_v25 }
  0xf0   : > { %3416 = vmatpush1.msra.mxu0 %v3022_v53  ;;  %3479 = vmatprep.mubr.f32.mxu0 %v6143_v12  ;;  %v5204_v53 = vld [vmem:[%s7304_s7 + $0x10] sm:$0xff] }
  0xf1   : > { %3487 = vmatpush1.msra.mxu1 %v3024_v54  ;;  %3550 = vmatprep.mubr.f32.mxu1 %v6143_v12 }
  0xf2   : > { %3557 = vmatprep.subr.mxu0 %v3027_v55  ;;  %3628 = vmatprep.subr.mxu1 %v3029_v56 }
  0xf3   : > { %5717 = vmatmul.mubr.msk.f32.vlgmr.msra.gmra.mrb[44].mxu0 %vm2166_vm2, %v6630_v25  ;;  %5718 = vmatmul.mubr.msk.f32.vlgmr.msra.gmra.mrb[36].mxu1 %vm2166_vm2, %v6630_v25 }
  0xf4   : > { %3558 = vmatpush1.msra.mxu0 %v3026_v57  ;;  %3621 = vmatprep.mubr.f32.mxu0 %v6143_v12  ;;  %v6794_v61 = vpop.f32.mrb[0].mxu0 }
  0xf5   : > { %3629 = vmatpush1.msra.mxu1 %v3028_v58  ;;  %3692 = vmatprep.mubr.f32.mxu1 %v6143_v12  ;;  %v6800_v63 = vpop.f32.mrb[1].mxu0 }
  0xf6   : > { %3699 = vmatprep.subr.mxu0 %v3031_v59  ;;  %3770 = vmatprep.subr.mxu1 %v3033_v60 }
  0xf7   : > { %5719 = vmatmul.mubr.msk.f32.vlgmr.msra.gmra.mrb[46].mxu0 %vm2166_vm2, %v6630_v25  ;;  %5720 = vmatmul.mubr.msk.f32.vlgmr.msra.gmra.mrb[38].mxu1 %vm2166_vm2, %v6630_v25 }
  0xf8   : > { %3700 = vmatpush1.msra.mxu0 %v3030_v62  ;;  %3763 = vmatprep.mubr.f32.mxu0 %v6143_v12 }
  0xf9   : > { %3771 = vmatpush1.msra.mxu1 %v3032_v0  ;;  %3834 = vmatprep.mubr.f32.mxu1 %v6143_v12 }
  0xfa   : > { %3841 = vmatprep.subr.mxu0 %v3035_v1  ;;  %3912 = vmatprep.subr.mxu1 %v3037_v2 }
  0xfb   : > { %5721 = vmatmul.mubr.msk.f32.vlgmr.msra.gmra.mrb[48].mxu0 %vm2166_vm2, %v6630_v25  ;;  %5722 = vmatmul.mubr.msk.f32.vlgmr.msra.gmra.mrb[40].mxu1 %vm2166_vm2, %v6630_v25  ;;  %v6860_v4 = vpop.f32.mrb[0].mxu1 }
  0xfc   : > { %3842 = vmatpush1.msra.mxu0 %v3034_v3  ;;  %3905 = vmatprep.mubr.f32.mxu0 %v6143_v12  ;;  %v6834_v10 = vpop.f32.mrb[2].mxu0  ;;  %v6865_v9 = vpop.f32.mrb[1].mxu1 }
  0xfd   : > { %3913 = vmatpush1.msra.mxu1 %v3036_v5  ;;  %3976 = vmatprep.mubr.f32.mxu1 %v6143_v12  ;;  %v6840_v13 = vpop.f32.mrb[3].mxu0 }
  0xfe   : > { %3983 = vmatprep.subr.mxu0 %v3039_v6  ;;  %4054 = vmatprep.subr.mxu1 %v3041_v7 }
  0xff   : > { %5723 = vmatmul.mubr.msk.f32.vlgmr.msra.gmra.mrb[50].mxu0 %vm2166_vm2, %v6630_v25  ;;  %5724 = vmatmul.mubr.msk.f32.vlgmr.msra.gmra.mrb[42].mxu1 %vm2166_vm2, %v6630_v25 }
 0x100   : > { %3984 = vmatpush1.msra.mxu0 %v3038_v11  ;;  %4047 = vmatprep.mubr.f32.mxu0 %v6143_v12 }
 0x101   : > { %4055 = vmatpush1.msra.mxu1 %v3040_v14  ;;  %4118 = vmatprep.mubr.f32.mxu1 %v6143_v12 }
 0x102   : > { %4125 = vmatprep.subr.mxu0 %v3043_v18  ;;  %4196 = vmatprep.subr.mxu1 %v3045_v19 }
 0x103   : > { %5725 = vmatmul.mubr.msk.f32.vlgmr.msra.gmra.mrb[52].mxu0 %vm2166_vm2, %v6630_v25  ;;  %5726 = vmatmul.mubr.msk.f32.vlgmr.msra.gmra.mrb[44].mxu1 %vm2166_vm2, %v6630_v25 }
 0x104   : > { %4126 = vmatpush1.msra.mxu0 %v3042_v17  ;;  %4189 = vmatprep.mubr.f32.mxu0 %v6143_v12  ;;  %v6878_v20 = vpop.f32.mrb[4].mxu0 }
 0x105   : > { %4197 = vmatpush1.msra.mxu1 %v3044_v8  ;;  %4260 = vmatprep.mubr.f32.mxu1 %v6143_v12  ;;  %v6884_v22 = vpop.f32.mrb[5].mxu0 }
 0x106   : > { %4267 = vmatprep.subr.mxu0 %v3047_v15  ;;  %4338 = vmatprep.subr.mxu1 %v3049_v16 }
 0x107   : > { %5727 = vmatmul.mubr.msk.f32.vlgmr.msra.gmra.mrb[54].mxu0 %vm2166_vm2, %v6630_v25  ;;  %5728 = vmatmul.mubr.msk.f32.vlgmr.msra.gmra.mrb[46].mxu1 %vm2166_vm2, %v6630_v25 }
 0x108   : > { %4268 = vmatpush1.msra.mxu0 %v3046_v21  ;;  %4331 = vmatprep.mubr.f32.mxu0 %v6143_v12 }
 0x109   : > { %4339 = vmatpush1.msra.mxu1 %v3048_v23  ;;  %4402 = vmatprep.mubr.f32.mxu1 %v6143_v12 }
 0x10a   : > { %4409 = vmatprep.subr.mxu0 %v3051_v24  ;;  %4480 = vmatprep.subr.mxu1 %v3053_v26 }
 0x10b   : > { %5729 = vmatmul.mubr.msk.f32.vlgmr.msra.gmra.mrb[56].mxu0 %vm2166_vm2, %v6630_v25  ;;  %5730 = vmatmul.mubr.msk.f32.vlgmr.msra.gmra.mrb[48].mxu1 %vm2166_vm2, %v6630_v25 }
 0x10c   : > { %4410 = vmatpush1.msra.mxu0 %v3050_v27  ;;  %4473 = vmatprep.mubr.f32.mxu0 %v6143_v12  ;;  %v6918_v31 = vpop.f32.mrb[6].mxu0 }
 0x10d   : > { %4481 = vmatpush1.msra.mxu1 %v3052_v28  ;;  %4544 = vmatprep.mubr.f32.mxu1 %v6143_v12  ;;  %v6924_v33 = vpop.f32.mrb[7].mxu0 }
 0x10e   : > { %4551 = vmatprep.subr.mxu0 %v3055_v29  ;;  %4622 = vmatprep.subr.mxu1 %v3057_v30 }
 0x10f   : > { %5731 = vmatmul.mubr.msk.f32.vlgmr.msra.gmra.mrb[58].mxu0 %vm2166_vm2, %v6630_v25  ;;  %5732 = vmatmul.mubr.msk.f32.vlgmr.msra.gmra.mrb[50].mxu1 %vm2166_vm2, %v6630_v25 }
 0x110   : > { %4552 = vmatpush1.msra.mxu0 %v3054_v32  ;;  %4615 = vmatprep.mubr.f32.mxu0 %v6143_v12 }
 0x111   : > { %4623 = vmatpush1.msra.mxu1 %v3056_v34  ;;  %4686 = vmatprep.mubr.f32.mxu1 %v6143_v12 }
 0x112   : > { %4693 = vmatprep.subr.mxu0 %v3059_v35  ;;  %4776 = vmatprep.subr.mxu1 %v4765_v36 }
 0x113   : > { %5733 = vmatmul.mubr.msk.f32.vlgmr.msra.gmra.mrb[60].mxu0 %vm2166_vm2, %v6630_v25  ;;  %5734 = vmatmul.mubr.msk.f32.vlgmr.msra.gmra.mrb[52].mxu1 %vm2166_vm2, %v6630_v25 }
 0x114   : > { %4694 = vmatpush1.msra.mxu0 %v3058_v37  ;;  %4757 = vmatprep.mubr.f32.mxu0 %v6143_v12  ;;  %v6958_v41 = vpop.f32.mrb[8].mxu0 }
 0x115   : > { %4777 = vmatpush1.msra.mxu1 %v4764_v38  ;;  %4840 = vmatprep.mubr.f32.mxu1 %v6143_v12  ;;  %v6964_v43 = vpop.f32.mrb[9].mxu0 }
 0x116   : > { %4847 = vmatprep.subr.mxu0 %v4767_v39  ;;  %4918 = vmatprep.subr.mxu1 %v4769_v40 }
 0x117   : > { %5735 = vmatmul.mubr.msk.f32.vlgmr.msra.gmra.mrb[62].mxu0 %vm2166_vm2, %v6630_v25  ;;  %5736 = vmatmul.mubr.msk.f32.vlgmr.msra.gmra.mrb[54].mxu1 %vm2166_vm2, %v6630_v25 }
 0x118   : > { %4848 = vmatpush1.msra.mxu0 %v4766_v42  ;;  %4911 = vmatprep.mubr.f32.mxu0 %v6143_v12 }
 0x119   : > { %4919 = vmatpush1.msra.mxu1 %v4768_v44  ;;  %4982 = vmatprep.mubr.f32.mxu1 %v6143_v12 }
 0x11a   : > { %4989 = vmatprep.subr.mxu0 %v4771_v45  ;;  %5060 = vmatprep.subr.mxu1 %v4773_v46 }
 0x11b   : > { %5737 = vmatmul.mubr.msk.f32.vlgmr.msra.gmra.mrb[64].mxu0 %vm2166_vm2, %v6630_v25  ;;  %5738 = vmatmul.mubr.msk.f32.vlgmr.msra.gmra.mrb[56].mxu1 %vm2166_vm2, %v6630_v25 }
 0x11c   : > { %4990 = vmatpush1.msra.mxu0 %v4770_v47  ;;  %5053 = vmatprep.mubr.f32.mxu0 %v6143_v12 }
 0x11d   : > { %5061 = vmatpush1.msra.mxu1 %v4772_v48  ;;  %5124 = vmatprep.mubr.f32.mxu1 %v6143_v12 }
 0x11e   : > { %5131 = vmatprep.subr.mxu0 %v4775_v49  ;;  %5205 = vmatprep.subr.mxu1 %v5203_v50 }
 0x11f   : > { %5739 = vmatmul.mubr.msk.f32.vlgmr.msra.gmra.mrb[66].mxu0 %vm2166_vm2, %v6630_v25  ;;  %5740 = vmatmul.mubr.msk.f32.vlgmr.msra.gmra.mrb[58].mxu1 %vm2166_vm2, %v6630_v25 }
 0x120   : > { %5132 = vmatpush1.msra.mxu0 %v4774_v51  ;;  %5195 = vmatprep.mubr.f32.mxu0 %v6143_v12 }
 0x121   : > { %5206 = vmatpush1.msra.mxu1 %v5202_v52  ;;  %5269 = vmatprep.mubr.f32.mxu1 %v6143_v12 }
 0x122   : > { %5774 = vmatprep.subr.mxu0 %v6143_v12 }
 0x123   : > { %5741 = vmatmul.mubr.msk.f32.vlgmr.msra.gmra.mrb[68].mxu0 %vm2166_vm2, %v6630_v25  ;;  %5742 = vmatmul.mubr.msk.f32.vlgmr.msra.gmra.mrb[60].mxu1 %vm2166_vm2, %v6630_v25 }
 0x124   : > { %5775 = vmatpush3.msra.mxu0 %v5204_v53  ;;  %5776 = vmatprep.mubr.msk.f32.mxu0 %vm6147_vm3, %v6143_v12 }
 0x125   : > { %5811 = vmatprep.mubr.msk.f32.mxu1 %vm6147_vm3, %v6143_v12 }
 0x127   : > { %5777 = vmatmul.mubr.msk.f32.vlgmr.msra.gmra.mrb[70].mxu0 %vm2166_vm2, %v6630_v25 }
 0x162   : > { %v7025_v54 = vpop.f32.mrb[10].mxu0  ;;  %v7027_v55 = vpop.f32.mrb[2].mxu1 }
 0x163   : > { %v7029_v56 = vpop.f32.mrb[11].mxu0  ;;  %v7031_v57 = vpop.f32.mrb[3].mxu1 }
 0x16a   : > { %v7033_v58 = vpop.f32.mrb[12].mxu0  ;;  %v7035_v59 = vpop.f32.mrb[4].mxu1 }
 0x16b   : > { %v7037_v60 = vpop.f32.mrb[13].mxu0  ;;  %v7039_v62 = vpop.f32.mrb[5].mxu1 }
 0x172   : > { %v7041_v12 = vpop.f32.mrb[14].mxu0  ;;  %v7043_v0 = vpop.f32.mrb[6].mxu1 }
 0x173   : > { %v7045_v25 = vpop.f32.mrb[15].mxu0  ;;  %v7047_v1 = vpop.f32.mrb[7].mxu1 }
 0x17a   : > { %v7049_v2 = vpop.f32.mrb[16].mxu0  ;;  %v7051_v3 = vpop.f32.mrb[8].mxu1 }
 0x17b   : > { %v7053_v5 = vpop.f32.mrb[17].mxu0  ;;  %v7055_v6 = vpop.f32.mrb[9].mxu1 }
 0x182   : > { %v7057_v7 = vpop.f32.mrb[18].mxu0  ;;  %v7059_v11 = vpop.f32.mrb[10].mxu1 }
 0x183   : > { %v7061_v14 = vpop.f32.mrb[19].mxu0  ;;  %v7063_v18 = vpop.f32.mrb[11].mxu1 }
 0x18a   : > { %v7065_v19 = vpop.f32.mrb[20].mxu0  ;;  %v7067_v17 = vpop.f32.mrb[12].mxu1 }
 0x18b   : > { %v7069_v8 = vpop.f32.mrb[21].mxu0  ;;  %v7071_v15 = vpop.f32.mrb[13].mxu1 }
 0x192   : > { %v7073_v16 = vpop.f32.mrb[22].mxu0  ;;  %v7075_v21 = vpop.f32.mrb[14].mxu1 }
 0x193   : > { %v7077_v23 = vpop.f32.mrb[23].mxu0  ;;  %v7079_v24 = vpop.f32.mrb[15].mxu1 }
 0x19a   : > { %v7081_v26 = vpop.f32.mrb[24].mxu0  ;;  %v7083_v27 = vpop.f32.mrb[16].mxu1 }
 0x19b   : > { %7314 = vst [vmem:[#allocation5_spill] sm:$0xff] %v7081_v26  ;;  %7315 = vst [vmem:[#allocation6_spill] sm:$0xff] %v7083_v27  ;;  %v7085_v28 = vpop.f32.mrb[25].mxu0  ;;  %v7087_v29 = vpop.f32.mrb[17].mxu1 }
 0x19c   : > { %7316 = vst [vmem:[#allocation7_spill] sm:$0xff] %v7085_v28  ;;  %7317 = vst [vmem:[#allocation8_spill] sm:$0xff] %v7087_v29 }
 0x1a2   : > { %v7089_v30 = vpop.f32.mrb[26].mxu0  ;;  %v7091_v32 = vpop.f32.mrb[18].mxu1 }
 0x1a3   : > { %7318 = vst [vmem:[#allocation9_spill] sm:$0xff] %v7089_v30  ;;  %7319 = vst [vmem:[#allocation10_spill] sm:$0xff] %v7091_v32  ;;  %v7093_v34 = vpop.f32.mrb[27].mxu0  ;;  %v7095_v35 = vpop.f32.mrb[19].mxu1 }
 0x1a4   : > { %7320 = vst [vmem:[#allocation11_spill] sm:$0xff] %v7093_v34  ;;  %7321 = vst [vmem:[#allocation12_spill] sm:$0xff] %v7095_v35 }
 0x1a6   : > { %v2236_v36 = vpop.f32.mrb[28].mxu0  ;;  %v2307_v37 = vpop.f32.mrb[20].mxu1 }
 0x1a7   : > { %v2955_v38 = vmul.f32 %v2236_v36, %v6794_v61  ;;  %v2957_v39 = vmul.f32 %v2307_v37, %v6834_v10  ;;  %v2238_v40 = vpop.f32.mrb[29].mxu0  ;;  %v2309_v42 = vpop.f32.mrb[21].mxu1 }
 0x1a8   : > { %v2956_v44 = vmul.f32 %v2238_v40, %v6800_v63  ;;  %v2958_v45 = vmul.f32 %v2309_v42, %v6840_v13 }
 0x1aa   : > { %v2378_v46 = vpop.f32.mrb[30].mxu0  ;;  %v2449_v47 = vpop.f32.mrb[22].mxu1 }
 0x1ab   : > { %v2959_v48 = vmul.f32 %v2378_v46, %v7025_v54  ;;  %v2961_v49 = vmul.f32 %v2449_v47, %v7027_v55  ;;  %v2380_v50 = vpop.f32.mrb[31].mxu0  ;;  %v2451_v51 = vpop.f32.mrb[23].mxu1 }
 0x1ac   : > { %v2960_v52 = vmul.f32 %v2380_v50, %v7029_v56  ;;  %v2962_v53 = vmul.f32 %v2451_v51, %v7031_v57 }
 0x1ad   : > { %v2963_v36 = vadd.f32 %v2959_v48, %v2955_v38  ;;  %v2965_v37 = vadd.f32 %v2961_v49, %v2957_v39 }
 0x1ae   : > { %v2964_v35 = vadd.f32 %v2960_v52, %v2956_v44  ;;  %v2966_v32 = vadd.f32 %v2962_v53, %v2958_v45  ;;  %v2520_v34 = vpop.f32.mrb[32].mxu0  ;;  %v2591_v40 = vpop.f32.mrb[24].mxu1 }
 0x1af   : > { %v2967_v42 = vmul.f32 %v2520_v34, %v7049_v2  ;;  %v2969_v29 = vmul.f32 %v2591_v40, %v7051_v3  ;;  %v2522_v30 = vpop.f32.mrb[33].mxu0  ;;  %v2593_v46 = vpop.f32.mrb[25].mxu1 }
 0x1b0   : > { %v2968_v47 = vmul.f32 %v2522_v30, %v7053_v5  ;;  %v2970_v27 = vmul.f32 %v2593_v46, %v7055_v6 }
 0x1b1   : > { %v2971_v28 = vadd.f32 %v2967_v42, %v2963_v36  ;;  %v2973_v50 = vadd.f32 %v2969_v29, %v2965_v37 }
 0x1b2   : > { %v2972_v26 = vadd.f32 %v2968_v47, %v2964_v35  ;;  %v2974_v51 = vadd.f32 %v2970_v27, %v2966_v32  ;;  %v2662_v38 = vpop.f32.mrb[34].mxu0  ;;  %v2733_v39 = vpop.f32.mrb[26].mxu1 }
 0x1b3   : > { %v2975_v44 = vmul.f32 %v2662_v38, %v7073_v16  ;;  %v2977_v45 = vmul.f32 %v2733_v39, %v7075_v21  ;;  %v2664_v48 = vpop.f32.mrb[35].mxu0  ;;  %v2735_v34 = vpop.f32.mrb[27].mxu1 }
 0x1b4   : > { %v2976_v49 = vmul.f32 %v2664_v48, %v7077_v23  ;;  %v2978_v52 = vmul.f32 %v2735_v34, %v7079_v24 }
 0x1b5   : > { %v2979_v53 = vadd.f32 %v2975_v44, %v2971_v28  ;;  %v2981_v30 = vadd.f32 %v2977_v45, %v2973_v50 }
 0x1b6   : > { %v2808_v40 = vpop.f32.mrb[36].mxu0  ;;  %v2879_v46 = vpop.f32.mrb[28].mxu1  ;;  %v2980_v36 = vadd.f32 %v2976_v49, %v2972_v26  ;;  %v2982_v29 = vadd.f32 %v2978_v52, %v2974_v51 }
 0x1b7   : > { %v2983_v35 = vadd.f32 %v2979_v53, %v2808_v40  ;;  %v2985_v27 = vadd.f32 %v2981_v30, %v2879_v46  ;;  %v2810_v32 = vpop.f32.mrb[37].mxu0  ;;  %v2881_v37 = vpop.f32.mrb[29].mxu1 }
 0x1b8   : > { %v2984_v42 = vadd.f32 %v2980_v36, %v2810_v32  ;;  %v2986_v47 = vadd.f32 %v2982_v29, %v2881_v37 }
 0x1b9   : > { %v2987_v38 = vmul.f32 %v2983_v35, %v6794_v61  ;;  %v2990_v39 = vmul.f32 %v2985_v27, %v7049_v2 }
 0x1ba   : > { %v2988_v48 = vmul.f32 %v2984_v42, %v7025_v54  ;;  %v2992_v34 = vmul.f32 %v2986_v47, %v7073_v16  ;;  %v2951_v28 = vpop.f32.mrb[38].mxu0  ;;  %v3126_v50 = vpop.f32.mrb[30].mxu1 }
 0x1bb   : > { %v5346_v44 = vmul.f32 %v3126_v50, %v6794_v61  ;;  %v5773_v26 = vpop.f32.mrb[39].mxu0  ;;  %v3128_v51 = vpop.f32.mrb[31].mxu1 }
 0x1bc   : > { %v2989_v45 = vadd.f32 %v2988_v48, %v2987_v38  ;;  %v5347_v49 = vmul.f32 %v3128_v51, %v6800_v63 }
 0x1be   : > { %v2991_v52 = vadd.f32 %v2990_v39, %v2989_v45  ;;  %v3197_v53 = vpop.f32.mrb[40].mxu0  ;;  %v3268_v30 = vpop.f32.mrb[32].mxu1 }
 0x1bf   : > { %v5348_v40 = vmul.f32 %v3197_v53, %v6834_v10  ;;  %v5350_v46 = vmul.f32 %v3268_v30, %v6878_v20  ;;  %v3199_v36 = vpop.f32.mrb[41].mxu0  ;;  %v3270_v29 = vpop.f32.mrb[33].mxu1 }
 0x1c0   : > { %v2993_v35 = vadd.f32 %v2992_v34, %v2991_v52  ;;  %v5349_v27 = vmul.f32 %v3199_v36, %v6840_v13  ;;  %v5351_v32 = vmul.f32 %v3270_v29, %v6884_v22 }
 0x1c2   : > { %v7123_v37 = vadd.f32 %v2993_v35, %v2951_v28  ;;  %v3339_v42 = vpop.f32.mrb[42].mxu0  ;;  %v3410_v47 = vpop.f32.mrb[34].mxu1 }
 0x1c3   : > { %v5352_v38 = vmul.f32 %v3339_v42, %v6918_v31  ;;  %v5354_v39 = vmul.f32 %v3410_v47, %v6958_v41  ;;  %v3341_v48 = vpop.f32.mrb[43].mxu0  ;;  %v3412_v50 = vpop.f32.mrb[35].mxu1 }
 0x1c4   : > { %v5353_v26 = vmul.f32 %v3341_v48, %v6924_v33  ;;  %v5355_v20 = vmul.f32 %v3412_v50, %v6964_v43 }
 0x1c6   : > { %v3481_v51 = vpop.f32.mrb[44].mxu0  ;;  %v3552_v34 = vpop.f32.mrb[36].mxu1 }
 0x1c7   : > { %v5356_v13 = vmul.f32 %v3481_v51, %v6860_v4  ;;  %v5358_v22 = vmul.f32 %v3552_v34, %v7025_v54  ;;  %v3483_v28 = vpop.f32.mrb[45].mxu0  ;;  %v3554_v45 = vpop.f32.mrb[37].mxu1 }
 0x1c8   : > { %v5357_v52 = vmul.f32 %v3483_v28, %v6865_v9  ;;  %v5359_v31 = vmul.f32 %v3554_v45, %v7029_v56 }
 0x1c9   : > { %v5370_v53 = vadd.f32 %v5358_v22, %v5346_v44 }
 0x1ca   : > { %v5371_v41 = vadd.f32 %v5359_v31, %v5347_v49  ;;  %v3623_v30 = vpop.f32.mrb[46].mxu0  ;;  %v3694_v36 = vpop.f32.mrb[38].mxu1 }
 0x1cb   : > { %v5360_v33 = vmul.f32 %v3623_v30, %v7027_v55  ;;  %v5362_v43 = vmul.f32 %v3694_v36, %v7033_v58  ;;  %v3625_v29 = vpop.f32.mrb[47].mxu0  ;;  %v3696_v35 = vpop.f32.mrb[39].mxu1 }
 0x1cc   : > { %v5361_v4 = vmul.f32 %v3625_v29, %v7031_v57  ;;  %v5363_v42 = vmul.f32 %v3696_v35, %v7037_v60 }
 0x1cd   : > { %v5372_v47 = vadd.f32 %v5360_v33, %v5348_v40  ;;  %v5374_v48 = vadd.f32 %v5362_v43, %v5350_v46 }
 0x1ce   : > { %v5373_v50 = vadd.f32 %v5361_v4, %v5349_v27  ;;  %v5375_v9 = vadd.f32 %v5363_v42, %v5351_v32  ;;  %v3765_v51 = vpop.f32.mrb[48].mxu0  ;;  %v3836_v34 = vpop.f32.mrb[40].mxu1 }
 0x1cf   : > { %v5364_v44 = vmul.f32 %v3765_v51, %v7035_v59  ;;  %v5366_v49 = vmul.f32 %v3836_v34, %v7041_v12  ;;  %v3767_v22 = vpop.f32.mrb[49].mxu0  ;;  %v3838_v28 = vpop.f32.mrb[41].mxu1 }
 0x1d0   : > { %v5365_v58 = vmul.f32 %v3767_v22, %v7039_v62  ;;  %v5367_v45 = vmul.f32 %v3838_v28, %v7045_v25 }
 0x1d1   : > { %v5376_v31 = vadd.f32 %v5364_v44, %v5352_v38  ;;  %v5378_v57 = vadd.f32 %v5366_v49, %v5354_v39 }
 0x1d2   : > { %v5377_v30 = vadd.f32 %v5365_v58, %v5353_v26  ;;  %v5379_v60 = vadd.f32 %v5367_v45, %v5355_v20  ;;  %v3907_v40 = vpop.f32.mrb[50].mxu0  ;;  %v3978_v46 = vpop.f32.mrb[42].mxu1 }
 0x1d3   : > { %v5368_v27 = vmul.f32 %v3907_v40, %v7043_v0  ;;  %v5382_v32 = vmul.f32 %v3978_v46, %v7049_v2  ;;  %v3909_v36 = vpop.f32.mrb[51].mxu0  ;;  %v3980_v59 = vpop.f32.mrb[43].mxu1 }
 0x1d4   : > { %v5369_v12 = vmul.f32 %v3909_v36, %v7047_v1  ;;  %v5383_v33 = vmul.f32 %v3980_v59, %v7053_v5 }
 0x1d5   : > { %v5380_v43 = vadd.f32 %v5368_v27, %v5356_v13  ;;  %v5394_v62 = vadd.f32 %v5382_v32, %v5370_v53 }
 0x1d6   : > { %v5381_v29 = vadd.f32 %v5369_v12, %v5357_v52  ;;  %v5395_v25 = vadd.f32 %v5383_v33, %v5371_v41  ;;  %v4049_v38 = vpop.f32.mrb[52].mxu0  ;;  %v4120_v39 = vpop.f32.mrb[44].mxu1  ;;  %v7323_v33 = vld [vmem:[#allocation7_spill] sm:$0xff] }
 0x1d7   : > { %v5384_v26 = vmul.f32 %v4049_v38, %v7051_v3  ;;  %v5386_v20 = vmul.f32 %v4120_v39, %v7057_v7  ;;  %v4051_v35 = vpop.f32.mrb[53].mxu0  ;;  %v4122_v0 = vpop.f32.mrb[45].mxu1 }
 0x1d8   : > { %v5385_v4 = vmul.f32 %v4051_v35, %v7055_v6  ;;  %v5387_v42 = vmul.f32 %v4122_v0, %v7061_v14  ;;  %v7325_v0 = vld [vmem:[#allocation9_spill] sm:$0xff] }
 0x1d9   : > { %v5396_v51 = vadd.f32 %v5384_v26, %v5372_v47  ;;  %v5398_v1 = vadd.f32 %v5386_v20, %v5374_v48 }
 0x1da   : > { %v5397_v34 = vadd.f32 %v5385_v4, %v5373_v50  ;;  %v5399_v44 = vadd.f32 %v5387_v42, %v5375_v9  ;;  %v4191_v13 = vpop.f32.mrb[54].mxu0  ;;  %v4262_v53 = vpop.f32.mrb[46].mxu1 }
 0x1db   : > { %v5388_v52 = vmul.f32 %v4191_v13, %v7059_v11  ;;  %v5390_v41 = vmul.f32 %v4262_v53, %v7065_v19  ;;  %v4193_v49 = vpop.f32.mrb[55].mxu0  ;;  %v4264_v22 = vpop.f32.mrb[47].mxu1  ;;  %v7326_v13 = vld [vmem:[#allocation8_spill] sm:$0xff] }
 0x1dc   : > { %v5389_v7 = vmul.f32 %v4193_v49, %v7063_v18  ;;  %v5391_v28 = vmul.f32 %v4264_v22, %v7069_v8 }
 0x1dd   : > { %v5400_v58 = vadd.f32 %v5388_v52, %v5376_v31  ;;  %v5402_v6 = vadd.f32 %v5390_v41, %v5378_v57  ;;  %v7327_v52 = vld [vmem:[#allocation11_spill] sm:$0xff] }
 0x1de   : > { %v5401_v45 = vadd.f32 %v5389_v7, %v5377_v30  ;;  %v5403_v14 = vadd.f32 %v5391_v28, %v5379_v60  ;;  %v4333_v47 = vpop.f32.mrb[56].mxu0  ;;  %v4404_v48 = vpop.f32.mrb[48].mxu1  ;;  %v7322_v60 = vld [vmem:[#allocation5_spill] sm:$0xff]  ;;  %v7328_v28 = vld [vmem:[#allocation10_spill] sm:$0xff] }
 0x1df   : > { %v5392_v50 = vmul.f32 %v4333_v47, %v7067_v17  ;;  %v5406_v9 = vmul.f32 %v4404_v48, %v7073_v16  ;;  %v4335_v40 = vpop.f32.mrb[57].mxu0  ;;  %v4406_v11 = vpop.f32.mrb[49].mxu1 }
 0x1e0   : > { %v5393_v19 = vmul.f32 %v4335_v40, %v7071_v15  ;;  %v5407_v46 = vmul.f32 %v4406_v11, %v7077_v23 }
 0x1e1   : > { %v5404_v27 = vadd.f32 %v5392_v50, %v5380_v43  ;;  %v5418_v18 = vadd.f32 %v5406_v9, %v5394_v62  ;;  %v7329_v50 = vld [vmem:[#allocation12_spill] sm:$0xff] }
 0x1e2   : > { %v5405_v32 = vadd.f32 %v5393_v19, %v5381_v29  ;;  %v4475_v8 = vpop.f32.mrb[58].mxu0  ;;  %v4546_v31 = vpop.f32.mrb[50].mxu1  ;;  %v5419_v57 = vadd.f32 %v5407_v46, %v5395_v25  ;;  %v7324_v29 = vld [vmem:[#allocation6_spill] sm:$0xff] }
 0x1e3   : > { %v5408_v30 = vmul.f32 %v4475_v8, %v7075_v21  ;;  %v5410_v36 = vmul.f32 %v4546_v31, %v7322_v60  ;;  %v4477_v59 = vpop.f32.mrb[59].mxu0  ;;  %v4548_v17 = vpop.f32.mrb[51].mxu1 }
 0x1e4   : > { %v5409_v12 = vmul.f32 %v4477_v59, %v7079_v24  ;;  %v5411_v38 = vmul.f32 %v4548_v17, %v7323_v33 }
 0x1e5   : > { %v5420_v39 = vadd.f32 %v5408_v30, %v5396_v51  ;;  %v5422_v15 = vadd.f32 %v5410_v36, %v5398_v1 }
 0x1e6   : > { %v4617_v26 = vpop.f32.mrb[60].mxu0  ;;  %v4688_v20 = vpop.f32.mrb[52].mxu1  ;;  %v5421_v43 = vadd.f32 %v5409_v12, %v5397_v34  ;;  %v5423_v62 = vadd.f32 %v5411_v38, %v5399_v44 }
 0x1e7   : > { %v5412_v35 = vmul.f32 %v4617_v26, %v7324_v29  ;;  %v5414_v25 = vmul.f32 %v4688_v20, %v7325_v0  ;;  %v4619_v4 = vpop.f32.mrb[61].mxu0  ;;  %v4690_v42 = vpop.f32.mrb[53].mxu1 }
 0x1e8   : > { %v5413_v53 = vmul.f32 %v4619_v4, %v7326_v13  ;;  %v5415_v41 = vmul.f32 %v4690_v42, %v7327_v52 }
 0x1e9   : > { %v5424_v49 = vadd.f32 %v5412_v35, %v5400_v58  ;;  %v5426_v24 = vadd.f32 %v5414_v25, %v5402_v6 }
 0x1ea   : > { %v4759_v22 = vpop.f32.mrb[62].mxu0  ;;  %v4842_v7 = vpop.f32.mrb[54].mxu1  ;;  %v5425_v51 = vadd.f32 %v5413_v53, %v5401_v45  ;;  %v5427_v1 = vadd.f32 %v5415_v41, %v5403_v14 }
 0x1eb   : > { %v5416_v47 = vmul.f32 %v4759_v22, %v7328_v28  ;;  %v5430_v34 = vadd.f32 %v5418_v18, %v4842_v7  ;;  %v4761_v44 = vpop.f32.mrb[63].mxu0  ;;  %v4844_v48 = vpop.f32.mrb[55].mxu1 }
 0x1ec   : > { %v5417_v9 = vmul.f32 %v4761_v44, %v7329_v50  ;;  %v5431_v40 = vadd.f32 %v5419_v57, %v4844_v48  ;;  %v6148_v44 = vmov 0.0|0.0   ;;  %v5500_v50 = vld [vmem:[%s7306_s9 + $0x18] sm:$0xff] }
 0x1ed   : > { %v5442_v11 = vmul.f32 %v5430_v34, %v6794_v61  ;;  %v5428_v19 = vadd.f32 %v5416_v47, %v5404_v27  ;;  %v5499_v34 = vld [vmem:[%s7306_s9 + $0x10] sm:$0xff]  ;;  %6006 = vmatprep.subr.bf16.mxu1 %v6148_v44 }
 0x1ee   : > { %v5443_v46 = vmul.f32 %v5431_v40, %v6800_v63  ;;  %v4913_v8 = vpop.f32.mrb[64].mxu0  ;;  %v4984_v58 = vpop.f32.mrb[56].mxu1  ;;  %v5429_v6 = vadd.f32 %v5417_v9, %v5405_v32  ;;  %v6010_v9 = vpack.c.bf16 %v5500_v50, %v5499_v34  ;;  %v5501_v40 = vld [vmem:[%s7306_s9 + $0x20] sm:$0xff] }
 0x1ef   : > { %v5432_v31 = vadd.f32 %v5420_v39, %v4913_v8  ;;  %v5434_v30 = vadd.f32 %v5422_v15, %v4984_v58  ;;  %v4915_v45 = vpop.f32.mrb[65].mxu0  ;;  %v4986_v14 = vpop.f32.mrb[57].mxu1  ;;  %v5504_v8 = vld [vmem:[%s7306_s9 + $0x38] sm:$0xff] }
 0x1f0   : > { %v5433_v60 = vadd.f32 %v5421_v43, %v4915_v45  ;;  %v5435_v36 = vadd.f32 %v5423_v62, %v4986_v14  ;;  %v5507_v45 = vld [vmem:[%s7306_s9 + $0x50] sm:$0xff]  ;;  %v5508_v14 = vld [vmem:[%s7306_s9 + $0x58] sm:$0xff] }
 0x1f1   : > { %v5444_v18 = vmul.f32 %v5432_v31, %v6834_v10  ;;  %v5446_v59 = vmul.f32 %v5434_v30, %v7029_v56  ;;  %v5506_v31 = vld [vmem:[%s7306_s9 + $0x48] sm:$0xff] }
 0x1f2   : > { %v5445_v57 = vmul.f32 %v5433_v60, %v7025_v54  ;;  %v5447_v17 = vmul.f32 %v5435_v36, %v7027_v55  ;;  %v5055_v27 = vpop.f32.mrb[66].mxu0  ;;  %v5126_v12 = vpop.f32.mrb[58].mxu1  ;;  %v6022_v60 = vpack.c.bf16 %v5508_v14, %v5507_v45  ;;  %v5509_v36 = vld [vmem:[%s7306_s9 + $0x60] sm:$0xff] }
 0x1f3   : > { %v5449_v63 = vadd.f32 %v5446_v59, %v5443_v46  ;;  %v5436_v33 = vadd.f32 %v5424_v49, %v5055_v27  ;;  %v5438_v38 = vadd.f32 %v5426_v24, %v5126_v12  ;;  %v5057_v32 = vpop.f32.mrb[67].mxu0  ;;  %v5128_v39 = vpop.f32.mrb[59].mxu1  ;;  %v5503_v46 = vld [vmem:[%s7306_s9 + $0x30] sm:$0xff] }
 0x1f4   : > { %v5448_v15 = vadd.f32 %v5445_v57, %v5442_v11  ;;  %v5450_v26 = vadd.f32 %v5447_v17, %v5444_v18  ;;  %v5437_v20 = vadd.f32 %v5425_v51, %v5057_v32  ;;  %v5439_v43 = vadd.f32 %v5427_v1, %v5128_v39  ;;  %v5502_v11 = vld [vmem:[%s7306_s9 + $0x28] sm:$0xff]  ;;  %v5511_v57 = vld [vmem:[%s7306_s9 + $0x70] sm:$0xff]  ;;  %v5512_v17 = vld [vmem:[%s7306_s9 + $0x78] sm:$0xff] }
 0x1f5   : > { %v5451_v62 = vmul.f32 %v5436_v33, %v7049_v2  ;;  %v5453_v10 = vmul.f32 %v5438_v38, %v7051_v3  ;;  %v6016_v58 = vpack.c.bf16 %v5504_v8, %v5503_v46  ;;  %v5510_v18 = vld [vmem:[%s7306_s9 + $0x68] sm:$0xff]  ;;  %v6028_v27 = vpack.c.bf16 %v5512_v17, %v5511_v57 }
 0x1f6   : > { %v5452_v56 = vmul.f32 %v5437_v20, %v7053_v5  ;;  %v5457_v29 = vmul.f32 %v5439_v43, %v7073_v16  ;;  %v5197_v55 = vpop.f32.mrb[68].mxu0  ;;  %v5271_v35 = vpop.f32.mrb[60].mxu1  ;;  %v6025_v59 = vpack.c.bf16 %v5510_v18, %v5509_v36 }
 0x1f7   : > { %v5440_v0 = vadd.f32 %v5428_v19, %v5197_v55  ;;  %v5454_v25 = vadd.f32 %v5451_v62, %v5448_v15  ;;  %v5199_v4 = vpop.f32.mrb[69].mxu0  ;;  %v5273_v42 = vpop.f32.mrb[61].mxu1  ;;  %v5456_v13 = vadd.f32 %v5453_v10, %v5450_v26  ;;  %v6013_v19 = vpack.c.bf16 %v5502_v11, %v5501_v40 }
 0x1f8   : > { %v5441_v53 = vadd.f32 %v5429_v6, %v5199_v4  ;;  %v5455_v52 = vadd.f32 %v5452_v56, %v5449_v63  ;;  %v5505_v6 = vld [vmem:[%s7306_s9 + $0x40] sm:$0xff] }
 0x1f9   : > { %v5458_v41 = vmul.f32 %v5440_v0, %v7077_v23  ;;  %v5460_v49 = vadd.f32 %v5457_v29, %v5454_v25  ;;  %v5497_v23 = vld [vmem:[%s7306_s9] sm:$0xff]  ;;  %v6019_v30 = vpack.c.bf16 %v5506_v31, %v5505_v6  ;;  %v2995_v29 = vmul.f32 %v7123_v37, %v6794_v61 }
 0x1fa   : > { %v5459_v24 = vmul.f32 %v5441_v53, %v7075_v21  ;;  %v5342_v22 = vpop.f32.mrb[70].mxu0  ;;  %v5498_v21 = vld [vmem:[%s7306_s9 + $0x8] sm:$0xff] }
 0x1fb   : > { %v5463_v3 = vadd.f32 %v5460_v49, %v5271_v35  ;;  %v5461_v7 = vadd.f32 %v5458_v41, %v5455_v52  ;;  %v5778_v5 = vpop.f32.mrb[71].mxu0  ;;  %v6007_v48 = vpack.c.bf16 %v5498_v21, %v5497_v23 }
 0x1fc   : > { %v5462_v51 = vadd.f32 %v5459_v24, %v5456_v13 }
 0x1fd   : > { %v5466_v1 = vmul.f32 %v5463_v3, %v6794_v61  ;;  %v5464_v28 = vadd.f32 %v5461_v7, %v5273_v42  ;;  %5469 = vrot.lane.b32.xlu0 %v5463_v3, %s6145_s27  ;;  %6008 = vmatpush3.bf16.msra.mxu1 %v6007_v48 }
 0x1fe   : > { %v5465_v47 = vadd.f32 %v5462_v51, %v5342_v22  ;;  %6009 = vmatprep.subr.bf16.mxu1 %v6148_v44 }
 0x1ff   : > { %5471 = vrot.lane.b32.xlu1 %v5464_v28, %s6145_s27 }
 0x201   : > { %5478 = vrot.lane.b32.xlu0 %v5464_v28, %s7330_s11  ;;  %6011 = vmatpush3.bf16.msra.mxu1 %v6010_v9 }
 0x202   : > { %6012 = vmatprep.subr.bf16.mxu1 %v6148_v44 }
 0x203   : > { %5480 = vrot.lane.b32.xlu1 %v5465_v47, %s7330_s11 }
 0x205   : > { %5487 = vrot.lane.b32.xlu0 %v5465_v47, %s7331_s20  ;;  %6014 = vmatpush3.bf16.msra.mxu1 %v6013_v19 }
 0x206   : > { %6015 = vmatprep.subr.bf16.mxu1 %v6148_v44 }
 0x207   : > { %2997 = vrot.lane.b32.xlu1 %v7123_v37, %s7331_s20 }
 0x209   : > { %3002 = vrot.lane.b32.xlu0 %v7123_v37, %s7330_s11  ;;  %6017 = vmatpush3.bf16.msra.mxu1 %v6016_v58  ;;  %s361_s11 = sand.u32 1, %s6132_s14  }
 0x20a   : > { %6018 = vmatprep.subr.bf16.mxu1 %v6148_v44  ;;  %s5673_s21 = sshll.u32 %s361_s11, 3  ;;  %s5585_s18 = scalar_lea.sflag [#allocation3], %s361_s11 }
 0x20b   : > { %3007 = vrot.lane.b32.xlu1 %v7123_v37, %s6145_s27  ;;  %s363_s29 = scalar_lea.vmem [#allocation2], %s5673_s21  ;;  %s6084_s21 = scalar_lea.vmem %s6083_s25, 256 }
 0x20c   : > { %s5598_s28 = sshll.u32 %s363_s29, 4  ;;  %s7252_s28 = int_to_ptr.vmem [resolvable:$true] %s5598_s28 }
 0x20d   : > { %6020 = vmatpush3.bf16.msra.mxu1 %v6019_v30  ;;  %s6078_s20 = scalar_lea.vmem %s7252_s28, 128  ;;  %p6085_p0 = scmp.lt.s32.totalorder %s7252_s28, %s6083_s25 }
 0x20e   : > { %6021 = vmatprep.subr.bf16.mxu1 %v6148_v44  ;;  %p6079_p11 = scmp.ne.s32.totalorder %s7252_s28, %s6078_s20  ;;  %p6086_p1 = scmp.lt.s32.totalorder %s6084_s21, %s6078_s20 }
 0x210   : > { %p6080_p12 = pnand %p6079_p11, %p6243_p5  ;;  %p6087_p2 = por %p6086_p1, %p6085_p0 }
 0x211   : > { %6023 = vmatpush3.bf16.msra.mxu1 %v6022_v60 }
 0x212   : > { %6024 = vmatprep.subr.bf16.mxu1 %v6148_v44  ;;  %p6081_p13 = pneg %p6080_p12 }
 0x214   : > { %p6088_p3 = pnand %p6087_p2, %p6081_p13 }
 0x215   : > { %6026 = vmatpush3.bf16.msra.mxu1 %v6025_v59 }
 0x216   : > { %6027 = vmatprep.subr.bf16.mxu1 %v6148_v44 }
 0x219   : > { %6029 = vmatpush3.bf16.msra.mxu1 %v6028_v27 }
 0x26f   : > { %v5470_v12 = vpop.permute.xlu0 %5469 }
 0x271   : > { %v5472_v63 = vpop.permute.xlu1 %5471 }
 0x272   : > { %v5473_v33 = vsel %vm430_vm0, %v5470_v12, %v5472_v63 }
 0x273   : > { %v5475_v38 = vmul.f32 %v5473_v33, %v7025_v54  ;;  %v5479_v32 = vpop.permute.xlu0 %5478 }
 0x275   : > { %v5476_v39 = vadd.f32 %v5475_v38, %v5466_v1  ;;  %v5481_v15 = vpop.permute.xlu1 %5480 }
 0x276   : > { %v5483_v26 = vsel %vm5482_vm4, %v5479_v32, %v5481_v15 }
 0x277   : > { %v5485_v20 = vmul.f32 %v5483_v26, %v7049_v2  ;;  %v5488_v43 = vpop.permute.xlu0 %5487 }
 0x278   : > { %v5490_v62 = vmul.f32 %v5488_v43, %v7073_v16 }
 0x279   : > { %v5486_v10 = vadd.f32 %v5485_v20, %v5476_v39  ;;  %v2998_v56 = vpop.permute.xlu1 %2997 }
 0x27a   : > { %v3000_v55 = vmul.f32 %v2998_v56, %v7025_v54 }
 0x27b   : > { %v5491_v35 = vadd.f32 %v5490_v62, %v5486_v10  ;;  %v3003_v0 = vpop.permute.xlu0 %3002 }
 0x27c   : > { %v3001_v25 = vadd.f32 %v3000_v55, %v2995_v29  ;;  %v3005_v4 = vmul.f32 %v3003_v0, %v7049_v2 }
 0x27d   : > { %5493 = vrot.lane.b32.xlu0 %v5491_v35, %s6145_s27  ;;  %v3008_v42 = vpop.permute.xlu1 %3007  ;;  %s7257_s27 = scalar_lea.hbm %s7307_s10, %s5745_s30 }
 0x27e   : > { %v3006_v13 = vadd.f32 %v3005_v4, %v3001_v25  ;;  %v3010_v53 = vmul.f32 %v3008_v42, %v7073_v16 }
 0x280   : > { %v3011_v52 = vadd.f32 %v3010_v53, %v3006_v13 }
 0x2ef   : > { %v5494_v41 = vpop.permute.xlu0 %5493 }
 0x2f0   : > { %v5496_v49 = vsel %vm430_vm0, %v3011_v52, %v5494_v41 }
 0x2f1   : > { %5812 = vmatmul.mubr.f32.vlgmr.msra.gmra.mrb[62].mxu1 %v5496_v49 }
 0x3c4   : > { %v5579_v61 = vpop.f32.mrb[62].mxu1 }
 0x3c5   : > { %5583 = vst [vmem:[%s363_s29] sm:$0xff] %v5579_v61  ;;  %v5813_v54 = vpop.f32.mrb[63].mxu1 }
 0x3c6   : > { %6091 = shalt.err (!%p6088_p3)
}
 0x3c7   : > { %s6092_s11 = scalar_lea.hbm %s7257_s27, 128  ;;  %s6096_s12 = scalar_lea.hbm %s7307_s10, 256 }
 0x3c8   : > { %p6093_p4 = scmp.ne.s32.totalorder %s7257_s27, %s6092_s11  ;;  %p6097_p9 = scmp.lt.u32.totalorder %s7257_s27, %s7307_s10 }
 0x3c9   : > { %p6098_p10 = scmp.lt.u32.totalorder %s6096_s12, %s6092_s11  ;;  %p6100_p12 = scmp.lt.u32.totalorder %s6092_s11, %s7257_s27 }
 0x3ca   : > { %p6094_p7 = pnand %p6093_p4, %p6243_p5 }
 0x3cb   : > { %p6099_p11 = por %p6098_p10, %p6097_p9 }
 0x3cc   : > { %p6095_p8 = pneg %p6094_p7 }
 0x3cd   : > { %p6101_p13 = por %p6100_p12, %p6099_p11 }
 0x3cf   : > { %p6102_p0 = pnand %p6101_p13, %p6095_p8 }
 0x3d1   : > { %6105 = shalt.err (!%p6102_p0)
}
 0x3d2   : > { %6030 = dma.vmem_to_hbm [thread:$0]  (%p6243_p5), %s7252_s28, 128, %s7257_s27, %s5585_s18  }
 0x3d3 PF: > { %p6036_p1 = scmp.ge.s32.totalorder %s6140_s16, 2  ;;  %s5610_s20 = sand.u32 1, %s6128_s13  }
 0x3d4   : > { %s5611_s25 = scalar_lea.sflag [#allocation3], %s5610_s20 }
 0x3d5   : > { %p6033_p2 = pnand %p6036_p1, %p6247_p6 }
 0x3d7   : > { %6123 = dma.done.wait (!%p6033_p2), %s5611_s25, 128  }
 0x3d8   : > { %6125 = vsyncadd (!%p6033_p2), %s5611_s25, 4294967168  ;;  %p20_p3 = scmp.ge.s32.totalorder %s6230_s19, 4   ;;  %s7332_s13 = smov %s6132_s14 }
 0x3d9   : > { %s7333_s14 = smov %s6136_s15  ;;  %s7334_s15 = smov %s6241_s22 }
 0x3da   : > { %s7335_s16 = smov %s6230_s19  ;;  %22 = sbr.rel (!%p20_p3) target bundleno = 3 (0x3), region = 98 }
 0x3e1   :  { %5616 = vsyncpa [#allocation3], 1 }
 0x3e2   :  { %5618 = vsyncpa [#allocation3 + $0x1], 1 }

</bundles_post_ra>
